<compile_context>
chip_gen: v5e
topology: v5e:2x2
jax: 0.10.0
libtpu: 0.0.40
codegen_flags: <defaults>
</compile_context>

<pallas_src>
import functools

import jax
import jax.numpy as jnp
from jax.experimental import pallas as pl
from jax.experimental.pallas import tpu as pltpu


def _layernorm(v, gamma, beta, eps=1e-5):
    mu = jnp.mean(v, axis=-1, keepdims=True)
    var = jnp.mean((v - mu) ** 2, axis=-1, keepdims=True)
    return (v - mu) * jax.lax.rsqrt(var + eps) * gamma + beta


def block_kernel(x_ref, ln1g_ref, ln1b_ref, wq_ref, wk_ref, wv_ref,
                 wproj_ref, bproj_ref, ln2g_ref, ln2b_ref,
                 w1_ref, b1_ref, w2_ref, b2_ref, o_ref,
                 *, num_heads, head_size, kv_block, exp_dtype, approx_recip):
    Bb, T, C = x_ref.shape
    N = Bb * T
    nh, hs = num_heads, head_size
    cdt = wq_ref.dtype                        # matmul operand dtype (f32 or bf16)
    f32 = jnp.float32

    x = x_ref[...].astype(f32).reshape(N, C)  # activations/residuals stay f32 in-kernel

    # ---- ln1 (f32, VPU) ----
    h = _layernorm(x, ln1g_ref[...].astype(f32), ln1b_ref[...].astype(f32))
    hc = h.astype(cdt)

    # ---- q/k/v projections: full-width (N,C)@(C,C) matmuls, f32 accumulation ----
    q = jnp.dot(hc, wq_ref[...], preferred_element_type=f32)
    k = jnp.dot(hc, wk_ref[...], preferred_element_type=f32)
    v = jnp.dot(hc, wv_ref[...], preferred_element_type=f32)

    # NOTE: the PyTorch Head scales by n_embd**-0.5 (full embedding dim), not
    # head_size**-0.5 -- reproduced exactly.  Folded into q once (Bb*T*C mults)
    # instead of scaling the (Bb*nh, T, T_k) score tensor.
    q = q * (1.0 / (C ** 0.5))

    # Heads onto a leading batch axis once (single relayout) -- no per-head lane
    # slicing and no lane-dim concat.
    def to_heads(a):
        return (a.reshape(Bb, T, nh, hs)
                 .transpose(0, 2, 1, 3)
                 .reshape(Bb * nh, T, hs)
                 .astype(cdt))

    q3, k3, v3 = to_heads(q), to_heads(k), to_heads(v)

    # ---- KV-chunked online-softmax (flash-style) attention ----
    # Scores/probs are only (Bb*nh, T, kv_block) per chunk, so attention VMEM is
    # bounded independently of T.  Chunking is static (trace-time loop).
    # TODO(synk): for very long T convert this to a fori_loop / extra grid axis with
    #             scratch-ref K/V to also bound unrolled code size.
    row = jax.lax.broadcasted_iota(jnp.int32, (T, kv_block), 0)
    col = jax.lax.broadcasted_iota(jnp.int32, (T, kv_block), 1)

    n_chunks = T // kv_block
    m_i = l_i = acc = None
    for c in range(n_chunks):
        j0 = c * kv_block
        kc = k3[:, j0:j0 + kv_block, :]
        vc = v3[:, j0:j0 + kv_block, :]
        s = jnp.einsum('bqd,bkd->bqk', q3, kc, preferred_element_type=f32)
        # Causal mask as an additive -1e30 bias (NaN-safe; exp underflows to 0).
        bias = jnp.where((col + j0) <= row, 0.0, -1e30).astype(f32)
        s = s + bias
        m_c = jnp.max(s, axis=-1, keepdims=True)
        if c == 0:
            # Chunk 0 always contains key 0, so m_i is finite for every query row.
            m_i = m_c
            p = jnp.exp((s - m_i).astype(exp_dtype))
            l_i = jnp.sum(p.astype(f32), axis=-1, keepdims=True)
            acc = jnp.einsum('bqk,bkd->bqd', p.astype(cdt), vc,
                             preferred_element_type=f32)
        else:
            m_new = jnp.maximum(m_i, m_c)
            a = jnp.exp(m_i - m_new)                       # rescale factor stays f32
            p = jnp.exp((s - m_new).astype(exp_dtype))     # bf16 exp on v6e/v7x EUP
            l_i = a * l_i + jnp.sum(p.astype(f32), axis=-1, keepdims=True)
            acc = a * acc + jnp.einsum('bqk,bkd->bqd', p.astype(cdt), vc,
                                       preferred_element_type=f32)
            m_i = m_new

    # Normalization: reciprocal + multiply (T reciprocals, not T*T divides).
    # approx=True routes to the otherwise-idle EUP slot; exact kept for the
    # f32 bit-match debug path.
    ctx = acc * pl.reciprocal(l_i, approx=approx_recip)

    # Heads back onto the embedding axis (single relayout), one output projection.
    ctx = ctx.reshape(Bb, nh, T, hs).transpose(0, 2, 1, 3).reshape(N, C)
    sa = jnp.dot(ctx.astype(cdt), wproj_ref[...],
                 preferred_element_type=f32) + bproj_ref[...].astype(f32)
    x1 = x + sa                                # residual 1 (f32)

    # ---- ln2 + feed-forward (f32 elementwise, matmul operands in cdt) ----
    h2 = _layernorm(x1, ln2g_ref[...].astype(f32), ln2b_ref[...].astype(f32))
    ff = jnp.dot(h2.astype(cdt), w1_ref[...],
                 preferred_element_type=f32) + b1_ref[...].astype(f32)
    ff = jnp.maximum(ff, 0.0)
    ff = jnp.dot(ff.astype(cdt), w2_ref[...],
                 preferred_element_type=f32) + b2_ref[...].astype(f32)

    o_ref[...] = (x1 + ff).reshape(Bb, T, C).astype(o_ref.dtype)  # residual 2


# ---------------------------------------------------------------------------
# Sizing helpers (generation-aware VMEM budget -> block_b -> vmem_limit_bytes)
# ---------------------------------------------------------------------------

def _vmem_budget_bytes():
    """~7/8 of this generation's per-core VMEM (v7x ~56 MiB, v5e/v6e ~112 MiB)."""
    cap = None
    try:
        cap = int(pltpu.get_tpu_info().vmem_capacity_bytes)
    except Exception:
        cap = None
    if not cap or cap <= 0:
        cap = 64 << 20                 # conservative fallback: v7x per-TensorCore VMEM
    return (cap // 8) * 7


def _pick_kv_block(T, target=256):
    kvb = min(T, target)
    while T % kvb:
        kvb -= 1
    return max(1, kvb)


def _weight_bytes(C, mm_itemsize):
    """Resident weight/param bytes, counted double-buffered (conservative: the
    single-buffer request below may be ignored by the pipeline)."""
    big = 12 * C * C * mm_itemsize     # wq,wk,wv,wproj (4C^2) + w1,w2 (8C^2)
    small = 16 * C * 4                 # LN params + biases (approx)
    return 2 * (big + small)


def _per_seq_bytes(T, C, nh, kvb, mm_itemsize, io_itemsize):
    """Approximate VMEM bytes per sequence in the batch tile (explicit terms,
    no blanket fudge factor)."""
    f32 = 4
    io = 2 * 2 * T * C * io_itemsize                     # x + o blocks, double-buffered
    f32_acts = 9 * T * C * f32 + T * 4 * C * f32         # x,h,q,k,v,x1,acc,ctx,h2 + FFN hid
    cdt_acts = 5 * T * C * mm_itemsize + T * 4 * C * mm_itemsize   # cdt-cast copies
    attn = nh * T * kvb * (2 * f32 + mm_itemsize)        # chunk scores + probs (+ cdt p)
    return io + f32_acts + cdt_acts + attn


def _choose_block_b(B, budget_left, per_seq_bytes):
    """Largest batch tile that fits the leftover budget, while keeping >=2 grid
    steps (>=4 when B allows) with an *even* step count so v7x's two TensorCores
    get balanced work."""
    cap = max(1, min(B, budget_left // max(per_seq_bytes, 1)))
    min_steps = 4 if B >= 4 else (2 if B >= 2 else 1)
    cap = min(cap, max(1, B // min_steps))
    base = B // 2 if (B % 2 == 0 and B >= 2) else B      # bb | base => even step count
    bb = max(1, int(min(cap, base)))
    while base % bb:
        bb -= 1
    return max(1, bb)


# ---------------------------------------------------------------------------
# Wrapper
# ---------------------------------------------------------------------------

def block_forward(x, params, *, num_heads, block_b=None, kv_block=None,
                  matmul_dtype=jnp.bfloat16, exp_dtype=None, approx_recip=True):
    """Fused transformer Block forward.

    matmul_dtype: MXU operand dtype (default bf16 on all generations; f32 accumulation).
    exp_dtype:    softmax exp dtype (default bf16 when matmul_dtype is bf16 -- good on
                  v6e/v7x packed-bf16 EUP; pass jnp.float32 explicitly on v5e).
    approx_recip: EUP approximate reciprocal for softmax normalization (default True);
                  set False for the f32 bit-match debug path.
    x may be f32 or bf16; the output matches x.dtype (residuals stay f32 in-kernel).
    """
    B, T, C = x.shape
    assert C % num_heads == 0
    head_size = C // num_heads

    (ln1g, ln1b, wq, wk, wv, wproj, bproj, ln2g, ln2b, w1, b1, w2, b2) = params

    # Cast the big matmul weights once in the wrapper (halves DMA + residency for bf16).
    mm = lambda w: w.astype(matmul_dtype)
    wq, wk, wv, wproj, w1, w2 = map(mm, (wq, wk, wv, wproj, w1, w2))
    mm_isz = jnp.dtype(matmul_dtype).itemsize
    io_isz = x.dtype.itemsize

    if exp_dtype is None:
        exp_dtype = jnp.bfloat16 if matmul_dtype == jnp.bfloat16 else jnp.float32

    if kv_block is None:
        kv_block = _pick_kv_block(T)
    assert T % kv_block == 0

    budget = _vmem_budget_bytes()
    w_bytes = _weight_bytes(C, mm_isz)
    per_seq = _per_seq_bytes(T, C, num_heads, kv_block, mm_isz, io_isz)

    if block_b is None:
        block_b = _choose_block_b(B, budget - w_bytes - (2 << 20), per_seq)
    assert B % block_b == 0
    grid = (B // block_b,)

    vmem_limit = w_bytes + block_b * per_seq + (2 << 20)
    vmem_limit = int(max(min(vmem_limit, budget), min(16 << 20, budget)))

    kernel = functools.partial(block_kernel, num_heads=num_heads, head_size=head_size,
                               kv_block=kv_block, exp_dtype=exp_dtype,
                               approx_recip=approx_recip)

    args = (x, ln1g, ln1b, wq, wk, wv, wproj, bproj, ln2g, ln2b, w1, b1, w2, b2)

    def build(single_buffer_weights):
        def full(a):
            idx = lambda b, nd=a.ndim: (0,) * nd
            if single_buffer_weights:
                # Resident (constant-index) params: request single-buffering so the
                # weight set is not doubled in VMEM.
                return pl.BlockSpec(a.shape, idx, pipeline_mode=pl.Buffered(1))
            return pl.BlockSpec(a.shape, idx)

        in_specs = [pl.BlockSpec((block_b, T, C), lambda b: (b, 0, 0))]   # x
        in_specs += [full(a) for a in args[1:]]

        return pl.pallas_call(
            kernel,
            out_shape=jax.ShapeDtypeStruct((B, T, C), x.dtype),
            grid_spec=pltpu.PrefetchScalarGridSpec(
                num_scalar_prefetch=0,
                grid=grid,
                in_specs=in_specs,
                out_specs=pl.BlockSpec((block_b, T, C), lambda b: (b, 0, 0)),
            ),
            compiler_params=pltpu.CompilerParams(
                dimension_semantics=("parallel",),
                vmem_limit_bytes=vmem_limit),
        )

    try:
        return build(True)(*args)
    except Exception:
        # pipeline_mode=pl.Buffered(1) unsupported on this jax/libtpu combo; the
        # VMEM estimate already counts the weights double-buffered, so fall back.
        return build(False)(*args)


def reference_forward(x, params, *, num_heads):
    """Pure-JAX reference mirroring the PyTorch Block (eval mode)."""
    B, T, C = x.shape
    hs = C // num_heads
    (ln1g, ln1b, wq, wk, wv, wproj, bproj, ln2g, ln2b, w1, b1, w2, b2) = params

    def ln(v, g, b):
        mu = jnp.mean(v, -1, keepdims=True)
        var = jnp.mean((v - mu) ** 2, -1, keepdims=True)
        return (v - mu) / jnp.sqrt(var + 1e-5) * g + b

    h = ln(x, ln1g, ln1b)
    q, k, v = h @ wq, h @ wk, h @ wv
    mask = jnp.tril(jnp.ones((T, T), bool))
    outs = []
    for hd in range(num_heads):
        sl = slice(hd * hs, (hd + 1) * hs)
        wei = (q[..., sl] @ jnp.swapaxes(k[..., sl], -1, -2)) * (C ** -0.5)
        wei = jnp.where(mask, wei, -jnp.inf)
        wei = jax.nn.softmax(wei, axis=-1)
        outs.append(wei @ v[..., sl])
    sa = jnp.concatenate(outs, -1) @ wproj + bproj
    x1 = x + sa
    h2 = ln(x1, ln2g, ln2b)
    ff = jnp.maximum(h2 @ w1 + b1, 0.0) @ w2 + b2
    return x1 + ff


if __name__ == "__main__":
    B, T = 2, 16             # block_size = 16 (tril mask covers full T)
    n_embd, n_head = 32, 4

    key = jax.random.PRNGKey(0)
    keys = jax.random.split(key, 8)

    x = jax.random.normal(keys[0], (B, T, n_embd), jnp.float32)

    def init(k, shape, scale=0.02):
        return (jax.random.normal(k, shape, jnp.float32) * scale).astype(jnp.float32)

    params = (
        jnp.ones((1, n_embd), jnp.float32),                 # ln1 gamma
        jnp.zeros((1, n_embd), jnp.float32),                # ln1 beta
        init(keys[1], (n_embd, n_embd)),                    # Wq (heads concatenated)
        init(keys[2], (n_embd, n_embd)),                    # Wk
        init(keys[3], (n_embd, n_embd)),                    # Wv
        init(keys[4], (n_embd, n_embd)),                    # W proj
        jnp.zeros((1, n_embd), jnp.float32),                # b proj
        jnp.ones((1, n_embd), jnp.float32),                 # ln2 gamma
        jnp.zeros((1, n_embd), jnp.float32),                # ln2 beta
        init(keys[5], (n_embd, 4 * n_embd)),                # FFN W1
        jnp.zeros((1, 4 * n_embd), jnp.float32),            # FFN b1
        init(keys[6], (4 * n_embd, n_embd)),                # FFN W2
        jnp.zeros((1, n_embd), jnp.float32),                # FFN b2
    )

    ref = reference_forward(x, params, num_heads=n_head)

    # f32 debug path (f32 operands, f32 exp, exact reciprocal); kv_block=8 exercises
    # the 2-chunk online-softmax loop.
    out = jax.block_until_ready(block_forward(
        x, params, num_heads=n_head, matmul_dtype=jnp.float32,
        exp_dtype=jnp.float32, approx_recip=False, kv_block=8))
    assert out.shape == (B, T, n_embd)
    assert out.dtype == x.dtype
    assert jnp.allclose(out, ref, atol=1e-4, rtol=1e-4), "f32 mismatch vs reference"

    # Default fast path: bf16 matmul operands + bf16 exp + approx reciprocal.
    out_fast = jax.block_until_ready(
        block_forward(x, params, num_heads=n_head, kv_block=8))
    assert jnp.allclose(out_fast, ref, atol=3e-2, rtol=3e-2), "bf16 mismatch vs reference"

    # bf16 activation I/O: x and output in bf16, internals stay f32.
    x_bf16 = x.astype(jnp.bfloat16)
    out_io = jax.block_until_ready(block_forward(x_bf16, params, num_heads=n_head))
    assert out_io.dtype == jnp.bfloat16
    assert jnp.allclose(out_io.astype(jnp.float32), ref, atol=5e-2, rtol=5e-2), \
        "bf16-I/O mismatch vs reference"

    # TODO(synk): dropout is identity (eval mode); training-mode dropout masks not implemented.
    print("KERNEL_OK")
</pallas_src>

<mosaic_0001>
module attributes {stable_mosaic.version = 11 : i64} {
  func.func @block_kernel(%arg0: i32, %arg1: memref<1x16x32xf32, #tpu.memory_space<vmem>>, %arg2: memref<1x32xf32, #tpu.memory_space<vmem>>, %arg3: memref<1x32xf32, #tpu.memory_space<vmem>>, %arg4: memref<32x32xf32, #tpu.memory_space<vmem>>, %arg5: memref<32x32xf32, #tpu.memory_space<vmem>>, %arg6: memref<32x32xf32, #tpu.memory_space<vmem>>, %arg7: memref<32x32xf32, #tpu.memory_space<vmem>>, %arg8: memref<1x32xf32, #tpu.memory_space<vmem>>, %arg9: memref<1x32xf32, #tpu.memory_space<vmem>>, %arg10: memref<1x32xf32, #tpu.memory_space<vmem>>, %arg11: memref<32x128xf32, #tpu.memory_space<vmem>>, %arg12: memref<1x128xf32, #tpu.memory_space<vmem>>, %arg13: memref<128x32xf32, #tpu.memory_space<vmem>>, %arg14: memref<1x32xf32, #tpu.memory_space<vmem>>, %arg15: memref<1x16x32xf32, #tpu.memory_space<vmem>>) attributes {dimension_semantics = [#tpu.dimension_semantics<parallel>], iteration_bounds = array<i64: 2>, scalar_prefetch = 0 : i64, scratch_operands = 0 : i64, tpu.core_type = #tpu.core_type<tc>, window_params = [{transform_indices = @transform_0, window_bounds = array<i64: 1, 16, 32>}, {pipeline_mode = #tpu.pipeline_mode<synchronous>, transform_indices = @transform_1, window_bounds = array<i64: 1, 32>}, {pipeline_mode = #tpu.pipeline_mode<synchronous>, transform_indices = @transform_2, window_bounds = array<i64: 1, 32>}, {pipeline_mode = #tpu.pipeline_mode<synchronous>, transform_indices = @transform_3, window_bounds = array<i64: 32, 32>}, {pipeline_mode = #tpu.pipeline_mode<synchronous>, transform_indices = @transform_4, window_bounds = array<i64: 32, 32>}, {pipeline_mode = #tpu.pipeline_mode<synchronous>, transform_indices = @transform_5, window_bounds = array<i64: 32, 32>}, {pipeline_mode = #tpu.pipeline_mode<synchronous>, transform_indices = @transform_6, window_bounds = array<i64: 32, 32>}, {pipeline_mode = #tpu.pipeline_mode<synchronous>, transform_indices = @transform_7, window_bounds = array<i64: 1, 32>}, {pipeline_mode = #tpu.pipeline_mode<synchronous>, transform_indices = @transform_8, window_bounds = array<i64: 1, 32>}, {pipeline_mode = #tpu.pipeline_mode<synchronous>, transform_indices = @transform_9, window_bounds = array<i64: 1, 32>}, {pipeline_mode = #tpu.pipeline_mode<synchronous>, transform_indices = @transform_10, window_bounds = array<i64: 32, 128>}, {pipeline_mode = #tpu.pipeline_mode<synchronous>, transform_indices = @transform_11, window_bounds = array<i64: 1, 128>}, {pipeline_mode = #tpu.pipeline_mode<synchronous>, transform_indices = @transform_12, window_bounds = array<i64: 128, 32>}, {pipeline_mode = #tpu.pipeline_mode<synchronous>, transform_indices = @transform_13, window_bounds = array<i64: 1, 32>}, {transform_indices = @transform_14, window_bounds = array<i64: 1, 16, 32>}]} {
    %c0 = arith.constant 0 : index
    %c0_0 = arith.constant 0 : index
    %c0_1 = arith.constant 0 : index
    %0 = vector.load %arg1[%c0, %c0_0, %c0_1] : memref<1x16x32xf32, #tpu.memory_space<vmem>>, vector<1x16x32xf32>
    %1 = vector.shape_cast %0 : vector<1x16x32xf32> to vector<16x32xf32>
    %c0_2 = arith.constant 0 : index
    %c0_3 = arith.constant 0 : index
    %2 = vector.load %arg2[%c0_2, %c0_3] : memref<1x32xf32, #tpu.memory_space<vmem>>, vector<1x32xf32>
    %c0_4 = arith.constant 0 : index
    %c0_5 = arith.constant 0 : index
    %3 = vector.load %arg3[%c0_4, %c0_5] : memref<1x32xf32, #tpu.memory_space<vmem>>, vector<1x32xf32>
    %cst = arith.constant dense<0.000000e+00> : vector<16xf32>
    %4 = vector.multi_reduction <add>, %1, %cst [1] : vector<16x32xf32> to vector<16xf32>
    %5 = vector.shape_cast %4 : vector<16xf32> to vector<16x1xf32>
    %cst_6 = arith.constant 3.200000e+01 : f32
    %6 = vector.broadcast %cst_6 : f32 to vector<16x1xf32>
    %7 = arith.divf %5, %6 : vector<16x1xf32>
    %8 = vector.broadcast %7 : vector<16x1xf32> to vector<16x32xf32>
    %9 = arith.subf %1, %8 : vector<16x32xf32>
    %10 = arith.mulf %9, %9 : vector<16x32xf32>
    %cst_7 = arith.constant dense<0.000000e+00> : vector<16xf32>
    %11 = vector.multi_reduction <add>, %10, %cst_7 [1] : vector<16x32xf32> to vector<16xf32>
    %12 = vector.shape_cast %11 : vector<16xf32> to vector<16x1xf32>
    %cst_8 = arith.constant 3.200000e+01 : f32
    %13 = vector.broadcast %cst_8 : f32 to vector<16x1xf32>
    %14 = arith.divf %12, %13 : vector<16x1xf32>
    %15 = vector.broadcast %7 : vector<16x1xf32> to vector<16x32xf32>
    %16 = arith.subf %1, %15 : vector<16x32xf32>
    %cst_9 = arith.constant 9.99999974E-6 : f32
    %17 = vector.broadcast %cst_9 : f32 to vector<16x1xf32>
    %18 = arith.addf %14, %17 : vector<16x1xf32>
    %19 = math.rsqrt %18 : vector<16x1xf32>
    %20 = vector.broadcast %19 : vector<16x1xf32> to vector<16x32xf32>
    %21 = arith.mulf %16, %20 : vector<16x32xf32>
    %22 = vector.broadcast %2 : vector<1x32xf32> to vector<16x32xf32>
    %23 = arith.mulf %21, %22 : vector<16x32xf32>
    %24 = vector.broadcast %3 : vector<1x32xf32> to vector<16x32xf32>
    %25 = arith.addf %23, %24 : vector<16x32xf32>
    %c0_10 = arith.constant 0 : index
    %c0_11 = arith.constant 0 : index
    %26 = vector.load %arg4[%c0_10, %c0_11] : memref<32x32xf32, #tpu.memory_space<vmem>>, vector<32x32xf32>
    %cst_12 = arith.constant dense<0.000000e+00> : vector<16x32xf32>
    %27 = tpu.matmul %25, %26, %cst_12 {dimension_numbers = #tpu.dot_dimension_numbers<[1], [0], [0], [1], [0, 0, 1, 1], [], []>} : vector<16x32xf32>, vector<32x32xf32>, vector<16x32xf32> -> vector<16x32xf32>
    %c0_13 = arith.constant 0 : index
    %c0_14 = arith.constant 0 : index
    %28 = vector.load %arg5[%c0_13, %c0_14] : memref<32x32xf32, #tpu.memory_space<vmem>>, vector<32x32xf32>
    %cst_15 = arith.constant dense<0.000000e+00> : vector<16x32xf32>
    %29 = tpu.matmul %25, %28, %cst_15 {dimension_numbers = #tpu.dot_dimension_numbers<[1], [0], [0], [1], [0, 0, 1, 1], [], []>} : vector<16x32xf32>, vector<32x32xf32>, vector<16x32xf32> -> vector<16x32xf32>
    %c0_16 = arith.constant 0 : index
    %c0_17 = arith.constant 0 : index
    %30 = vector.load %arg6[%c0_16, %c0_17] : memref<32x32xf32, #tpu.memory_space<vmem>>, vector<32x32xf32>
    %cst_18 = arith.constant dense<0.000000e+00> : vector<16x32xf32>
    %31 = tpu.matmul %25, %30, %cst_18 {dimension_numbers = #tpu.dot_dimension_numbers<[1], [0], [0], [1], [0, 0, 1, 1], [], []>} : vector<16x32xf32>, vector<32x32xf32>, vector<16x32xf32> -> vector<16x32xf32>
    %cst_19 = arith.constant 0.176776692 : f32
    %32 = vector.broadcast %cst_19 : f32 to vector<16x32xf32>
    %33 = arith.mulf %27, %32 : vector<16x32xf32>
    %34 = vector.shape_cast %33 : vector<16x32xf32> to vector<1x16x4x8xf32>
    %35 = tpu.transpose %34, [0, 2, 1, 3] : vector<1x16x4x8xf32> -> vector<1x4x16x8xf32>
    %36 = vector.shape_cast %35 : vector<1x4x16x8xf32> to vector<4x16x8xf32>
    %37 = vector.shape_cast %29 : vector<16x32xf32> to vector<1x16x4x8xf32>
    %38 = tpu.transpose %37, [0, 2, 1, 3] : vector<1x16x4x8xf32> -> vector<1x4x16x8xf32>
    %39 = vector.shape_cast %38 : vector<1x4x16x8xf32> to vector<4x16x8xf32>
    %40 = vector.shape_cast %31 : vector<16x32xf32> to vector<1x16x4x8xf32>
    %41 = tpu.transpose %40, [0, 2, 1, 3] : vector<1x16x4x8xf32> -> vector<1x4x16x8xf32>
    %42 = vector.shape_cast %41 : vector<1x4x16x8xf32> to vector<4x16x8xf32>
    %43 = tpu.iota {dimensions = array<i32: 0>} : vector<16x8xi32>
    %44 = tpu.iota {dimensions = array<i32: 1>} : vector<16x8xi32>
    %45 = vector.extract_strided_slice %39 {offsets = [0, 0, 0], sizes = [4, 8, 8], strides = [1, 1, 1]} : vector<4x16x8xf32> to vector<4x8x8xf32>
    %46 = vector.extract_strided_slice %42 {offsets = [0, 0, 0], sizes = [4, 8, 8], strides = [1, 1, 1]} : vector<4x16x8xf32> to vector<4x8x8xf32>
    "tpu.trace_start"() <{level = 10 : i32, message = "bqd,bkd->bqk"}> : () -> ()
    %cst_20 = arith.constant dense<0.000000e+00> : vector<4x16x8xf32>
    %47 = tpu.matmul %36, %45, %cst_20 {dimension_numbers = #tpu.dot_dimension_numbers<[2], [2], [1], [1], [0, 0, 0, 1, 1, 1], [0], [0]>} : vector<4x16x8xf32>, vector<4x8x8xf32>, vector<4x16x8xf32> -> vector<4x16x8xf32>
    "tpu.trace_stop"() : () -> ()
    %c0_i32 = arith.constant 0 : i32
    %48 = vector.broadcast %c0_i32 : i32 to vector<16x8xi32>
    %49 = arith.addi %44, %48 : vector<16x8xi32>
    %50 = arith.cmpi sle, %49, %43 : vector<16x8xi32>
    %cst_21 = arith.constant 0.000000e+00 : f32
    %cst_22 = arith.constant -1.000000e+30 : f32
    %51 = vector.broadcast %cst_21 : f32 to vector<16x8xf32>
    %52 = vector.broadcast %cst_22 : f32 to vector<16x8xf32>
    %53 = arith.select %50, %51, %52 : vector<16x8xi1>, vector<16x8xf32>
    %54 = vector.shape_cast %53 : vector<16x8xf32> to vector<1x16x8xf32>
    %55 = vector.broadcast %54 : vector<1x16x8xf32> to vector<4x16x8xf32>
    %56 = arith.addf %47, %55 : vector<4x16x8xf32>
    %cst_23 = arith.constant dense<0xFF800000> : vector<4x16xf32>
    %57 = vector.multi_reduction <maximumf>, %56, %cst_23 [2] : vector<4x16x8xf32> to vector<4x16xf32>
    %58 = vector.shape_cast %57 : vector<4x16xf32> to vector<4x16x1xf32>
    %59 = vector.broadcast %58 : vector<4x16x1xf32> to vector<4x16x8xf32>
    %60 = arith.subf %56, %59 : vector<4x16x8xf32>
    %61 = math.exp %60 : vector<4x16x8xf32>
    %cst_24 = arith.constant dense<0.000000e+00> : vector<4x16xf32>
    %62 = vector.multi_reduction <add>, %61, %cst_24 [2] : vector<4x16x8xf32> to vector<4x16xf32>
    %63 = vector.shape_cast %62 : vector<4x16xf32> to vector<4x16x1xf32>
    "tpu.trace_start"() <{level = 10 : i32, message = "bqk,bkd->bqd"}> : () -> ()
    %cst_25 = arith.constant dense<0.000000e+00> : vector<4x16x8xf32>
    %64 = tpu.matmul %61, %46, %cst_25 {dimension_numbers = #tpu.dot_dimension_numbers<[2], [1], [1], [2], [0, 0, 0, 1, 1, 2], [0], [0]>} : vector<4x16x8xf32>, vector<4x8x8xf32>, vector<4x16x8xf32> -> vector<4x16x8xf32>
    "tpu.trace_stop"() : () -> ()
    %65 = vector.extract_strided_slice %39 {offsets = [0, 8, 0], sizes = [4, 8, 8], strides = [1, 1, 1]} : vector<4x16x8xf32> to vector<4x8x8xf32>
    %66 = vector.extract_strided_slice %42 {offsets = [0, 8, 0], sizes = [4, 8, 8], strides = [1, 1, 1]} : vector<4x16x8xf32> to vector<4x8x8xf32>
    "tpu.trace_start"() <{level = 10 : i32, message = "bqd,bkd->bqk"}> : () -> ()
    %cst_26 = arith.constant dense<0.000000e+00> : vector<4x16x8xf32>
    %67 = tpu.matmul %36, %65, %cst_26 {dimension_numbers = #tpu.dot_dimension_numbers<[2], [2], [1], [1], [0, 0, 0, 1, 1, 1], [0], [0]>} : vector<4x16x8xf32>, vector<4x8x8xf32>, vector<4x16x8xf32> -> vector<4x16x8xf32>
    "tpu.trace_stop"() : () -> ()
    %c8_i32 = arith.constant 8 : i32
    %68 = vector.broadcast %c8_i32 : i32 to vector<16x8xi32>
    %69 = arith.addi %44, %68 : vector<16x8xi32>
    %70 = arith.cmpi sle, %69, %43 : vector<16x8xi32>
    %cst_27 = arith.constant 0.000000e+00 : f32
    %cst_28 = arith.constant -1.000000e+30 : f32
    %71 = vector.broadcast %cst_27 : f32 to vector<16x8xf32>
    %72 = vector.broadcast %cst_28 : f32 to vector<16x8xf32>
    %73 = arith.select %70, %71, %72 : vector<16x8xi1>, vector<16x8xf32>
    %74 = vector.shape_cast %73 : vector<16x8xf32> to vector<1x16x8xf32>
    %75 = vector.broadcast %74 : vector<1x16x8xf32> to vector<4x16x8xf32>
    %76 = arith.addf %67, %75 : vector<4x16x8xf32>
    %cst_29 = arith.constant dense<0xFF800000> : vector<4x16xf32>
    %77 = vector.multi_reduction <maximumf>, %76, %cst_29 [2] : vector<4x16x8xf32> to vector<4x16xf32>
    %78 = vector.shape_cast %77 : vector<4x16xf32> to vector<4x16x1xf32>
    %79 = arith.maximumf %58, %78 : vector<4x16x1xf32>
    %80 = arith.subf %58, %79 : vector<4x16x1xf32>
    %81 = math.exp %80 : vector<4x16x1xf32>
    %82 = vector.broadcast %79 : vector<4x16x1xf32> to vector<4x16x8xf32>
    %83 = arith.subf %76, %82 : vector<4x16x8xf32>
    %84 = math.exp %83 : vector<4x16x8xf32>
    %85 = arith.mulf %81, %63 : vector<4x16x1xf32>
    %cst_30 = arith.constant dense<0.000000e+00> : vector<4x16xf32>
    %86 = vector.multi_reduction <add>, %84, %cst_30 [2] : vector<4x16x8xf32> to vector<4x16xf32>
    %87 = vector.shape_cast %86 : vector<4x16xf32> to vector<4x16x1xf32>
    %88 = arith.addf %85, %87 : vector<4x16x1xf32>
    %89 = vector.broadcast %81 : vector<4x16x1xf32> to vector<4x16x8xf32>
    %90 = arith.mulf %89, %64 : vector<4x16x8xf32>
    "tpu.trace_start"() <{level = 10 : i32, message = "bqk,bkd->bqd"}> : () -> ()
    %cst_31 = arith.constant dense<0.000000e+00> : vector<4x16x8xf32>
    %91 = tpu.matmul %84, %66, %cst_31 {dimension_numbers = #tpu.dot_dimension_numbers<[2], [1], [1], [2], [0, 0, 0, 1, 1, 2], [0], [0]>} : vector<4x16x8xf32>, vector<4x8x8xf32>, vector<4x16x8xf32> -> vector<4x16x8xf32>
    "tpu.trace_stop"() : () -> ()
    %92 = arith.addf %90, %91 : vector<4x16x8xf32>
    %93 = tpu.reciprocal %88 : vector<4x16x1xf32> -> vector<4x16x1xf32>
    %94 = vector.broadcast %93 : vector<4x16x1xf32> to vector<4x16x8xf32>
    %95 = arith.mulf %92, %94 : vector<4x16x8xf32>
    %96 = vector.shape_cast %95 : vector<4x16x8xf32> to vector<1x4x16x8xf32>
    %97 = tpu.transpose %96, [0, 2, 1, 3] : vector<1x4x16x8xf32> -> vector<1x16x4x8xf32>
    %98 = vector.shape_cast %97 : vector<1x16x4x8xf32> to vector<16x32xf32>
    %c0_32 = arith.constant 0 : index
    %c0_33 = arith.constant 0 : index
    %99 = vector.load %arg7[%c0_32, %c0_33] : memref<32x32xf32, #tpu.memory_space<vmem>>, vector<32x32xf32>
    %cst_34 = arith.constant dense<0.000000e+00> : vector<16x32xf32>
    %100 = tpu.matmul %98, %99, %cst_34 {dimension_numbers = #tpu.dot_dimension_numbers<[1], [0], [0], [1], [0, 0, 1, 1], [], []>} : vector<16x32xf32>, vector<32x32xf32>, vector<16x32xf32> -> vector<16x32xf32>
    %c0_35 = arith.constant 0 : index
    %c0_36 = arith.constant 0 : index
    %101 = vector.load %arg8[%c0_35, %c0_36] : memref<1x32xf32, #tpu.memory_space<vmem>>, vector<1x32xf32>
    %102 = vector.broadcast %101 : vector<1x32xf32> to vector<16x32xf32>
    %103 = arith.addf %100, %102 : vector<16x32xf32>
    %104 = arith.addf %1, %103 : vector<16x32xf32>
    %c0_37 = arith.constant 0 : index
    %c0_38 = arith.constant 0 : index
    %105 = vector.load %arg9[%c0_37, %c0_38] : memref<1x32xf32, #tpu.memory_space<vmem>>, vector<1x32xf32>
    %c0_39 = arith.constant 0 : index
    %c0_40 = arith.constant 0 : index
    %106 = vector.load %arg10[%c0_39, %c0_40] : memref<1x32xf32, #tpu.memory_space<vmem>>, vector<1x32xf32>
    %cst_41 = arith.constant dense<0.000000e+00> : vector<16xf32>
    %107 = vector.multi_reduction <add>, %104, %cst_41 [1] : vector<16x32xf32> to vector<16xf32>
    %108 = vector.shape_cast %107 : vector<16xf32> to vector<16x1xf32>
    %cst_42 = arith.constant 3.200000e+01 : f32
    %109 = vector.broadcast %cst_42 : f32 to vector<16x1xf32>
    %110 = arith.divf %108, %109 : vector<16x1xf32>
    %111 = vector.broadcast %110 : vector<16x1xf32> to vector<16x32xf32>
    %112 = arith.subf %104, %111 : vector<16x32xf32>
    %113 = arith.mulf %112, %112 : vector<16x32xf32>
    %cst_43 = arith.constant dense<0.000000e+00> : vector<16xf32>
    %114 = vector.multi_reduction <add>, %113, %cst_43 [1] : vector<16x32xf32> to vector<16xf32>
    %115 = vector.shape_cast %114 : vector<16xf32> to vector<16x1xf32>
    %cst_44 = arith.constant 3.200000e+01 : f32
    %116 = vector.broadcast %cst_44 : f32 to vector<16x1xf32>
    %117 = arith.divf %115, %116 : vector<16x1xf32>
    %118 = vector.broadcast %110 : vector<16x1xf32> to vector<16x32xf32>
    %119 = arith.subf %104, %118 : vector<16x32xf32>
    %cst_45 = arith.constant 9.99999974E-6 : f32
    %120 = vector.broadcast %cst_45 : f32 to vector<16x1xf32>
    %121 = arith.addf %117, %120 : vector<16x1xf32>
    %122 = math.rsqrt %121 : vector<16x1xf32>
    %123 = vector.broadcast %122 : vector<16x1xf32> to vector<16x32xf32>
    %124 = arith.mulf %119, %123 : vector<16x32xf32>
    %125 = vector.broadcast %105 : vector<1x32xf32> to vector<16x32xf32>
    %126 = arith.mulf %124, %125 : vector<16x32xf32>
    %127 = vector.broadcast %106 : vector<1x32xf32> to vector<16x32xf32>
    %128 = arith.addf %126, %127 : vector<16x32xf32>
    %c0_46 = arith.constant 0 : index
    %c0_47 = arith.constant 0 : index
    %129 = vector.load %arg11[%c0_46, %c0_47] : memref<32x128xf32, #tpu.memory_space<vmem>>, vector<32x128xf32>
    %cst_48 = arith.constant dense<0.000000e+00> : vector<16x128xf32>
    %130 = tpu.matmul %128, %129, %cst_48 {dimension_numbers = #tpu.dot_dimension_numbers<[1], [0], [0], [1], [0, 0, 1, 1], [], []>} : vector<16x32xf32>, vector<32x128xf32>, vector<16x128xf32> -> vector<16x128xf32>
    %c0_49 = arith.constant 0 : index
    %c0_50 = arith.constant 0 : index
    %131 = vector.load %arg12[%c0_49, %c0_50] : memref<1x128xf32, #tpu.memory_space<vmem>>, vector<1x128xf32>
    %132 = vector.broadcast %131 : vector<1x128xf32> to vector<16x128xf32>
    %133 = arith.addf %130, %132 : vector<16x128xf32>
    %cst_51 = arith.constant 0.000000e+00 : f32
    %134 = vector.broadcast %cst_51 : f32 to vector<16x128xf32>
    %135 = arith.maximumf %133, %134 : vector<16x128xf32>
    %c0_52 = arith.constant 0 : index
    %c0_53 = arith.constant 0 : index
    %136 = vector.load %arg13[%c0_52, %c0_53] : memref<128x32xf32, #tpu.memory_space<vmem>>, vector<128x32xf32>
    %cst_54 = arith.constant dense<0.000000e+00> : vector<16x32xf32>
    %137 = tpu.matmul %135, %136, %cst_54 {dimension_numbers = #tpu.dot_dimension_numbers<[1], [0], [0], [1], [0, 0, 1, 1], [], []>} : vector<16x128xf32>, vector<128x32xf32>, vector<16x32xf32> -> vector<16x32xf32>
    %c0_55 = arith.constant 0 : index
    %c0_56 = arith.constant 0 : index
    %138 = vector.load %arg14[%c0_55, %c0_56] : memref<1x32xf32, #tpu.memory_space<vmem>>, vector<1x32xf32>
    %139 = vector.broadcast %138 : vector<1x32xf32> to vector<16x32xf32>
    %140 = arith.addf %137, %139 : vector<16x32xf32>
    %141 = arith.addf %104, %140 : vector<16x32xf32>
    %142 = vector.shape_cast %141 : vector<16x32xf32> to vector<1x16x32xf32>
    %c0_57 = arith.constant 0 : index
    %c0_58 = arith.constant 0 : index
    %c0_59 = arith.constant 0 : index
    %143 = vector.load %arg15[%c0_57, %c0_58, %c0_59] : memref<1x16x32xf32, #tpu.memory_space<vmem>>, vector<1x16x32xf32>
    tpu.vector_store %arg15[%c0_57, %c0_58, %c0_59], %142 {strides = array<i32>} : memref<1x16x32xf32, #tpu.memory_space<vmem>>, vector<1x16x32xf32>,
    return
  }
  func.func @transform_0(%arg0: i32) -> (i32, i32, i32) {
    %c0_i32 = arith.constant 0 : i32
    %c0_i32_0 = arith.constant 0 : i32
    %c0_i32_1 = arith.constant 0 : i32
    return %arg0, %c0_i32, %c0_i32_0 : i32, i32, i32
  }
  func.func @transform_1(%arg0: i32) -> (i32, i32) {
    %c0_i32 = arith.constant 0 : i32
    %c0_i32_0 = arith.constant 0 : i32
    %c0_i32_1 = arith.constant 0 : i32
    return %c0_i32, %c0_i32_0 : i32, i32
  }
  func.func @transform_2(%arg0: i32) -> (i32, i32) {
    %c0_i32 = arith.constant 0 : i32
    %c0_i32_0 = arith.constant 0 : i32
    %c0_i32_1 = arith.constant 0 : i32
    return %c0_i32, %c0_i32_0 : i32, i32
  }
  func.func @transform_3(%arg0: i32) -> (i32, i32) {
    %c0_i32 = arith.constant 0 : i32
    %c0_i32_0 = arith.constant 0 : i32
    %c0_i32_1 = arith.constant 0 : i32
    return %c0_i32, %c0_i32_0 : i32, i32
  }
  func.func @transform_4(%arg0: i32) -> (i32, i32) {
    %c0_i32 = arith.constant 0 : i32
    %c0_i32_0 = arith.constant 0 : i32
    %c0_i32_1 = arith.constant 0 : i32
    return %c0_i32, %c0_i32_0 : i32, i32
  }
  func.func @transform_5(%arg0: i32) -> (i32, i32) {
    %c0_i32 = arith.constant 0 : i32
    %c0_i32_0 = arith.constant 0 : i32
    %c0_i32_1 = arith.constant 0 : i32
    return %c0_i32, %c0_i32_0 : i32, i32
  }
  func.func @transform_6(%arg0: i32) -> (i32, i32) {
    %c0_i32 = arith.constant 0 : i32
    %c0_i32_0 = arith.constant 0 : i32
    %c0_i32_1 = arith.constant 0 : i32
    return %c0_i32, %c0_i32_0 : i32, i32
  }
  func.func @transform_7(%arg0: i32) -> (i32, i32) {
    %c0_i32 = arith.constant 0 : i32
    %c0_i32_0 = arith.constant 0 : i32
    %c0_i32_1 = arith.constant 0 : i32
    return %c0_i32, %c0_i32_0 : i32, i32
  }
  func.func @transform_8(%arg0: i32) -> (i32, i32) {
    %c0_i32 = arith.constant 0 : i32
    %c0_i32_0 = arith.constant 0 : i32
    %c0_i32_1 = arith.constant 0 : i32
    return %c0_i32, %c0_i32_0 : i32, i32
  }
  func.func @transform_9(%arg0: i32) -> (i32, i32) {
    %c0_i32 = arith.constant 0 : i32
    %c0_i32_0 = arith.constant 0 : i32
    %c0_i32_1 = arith.constant 0 : i32
    return %c0_i32, %c0_i32_0 : i32, i32
  }
  func.func @transform_10(%arg0: i32) -> (i32, i32) {
    %c0_i32 = arith.constant 0 : i32
    %c0_i32_0 = arith.constant 0 : i32
    %c0_i32_1 = arith.constant 0 : i32
    return %c0_i32, %c0_i32_0 : i32, i32
  }
  func.func @transform_11(%arg0: i32) -> (i32, i32) {
    %c0_i32 = arith.constant 0 : i32
    %c0_i32_0 = arith.constant 0 : i32
    %c0_i32_1 = arith.constant 0 : i32
    return %c0_i32, %c0_i32_0 : i32, i32
  }
  func.func @transform_12(%arg0: i32) -> (i32, i32) {
    %c0_i32 = arith.constant 0 : i32
    %c0_i32_0 = arith.constant 0 : i32
    %c0_i32_1 = arith.constant 0 : i32
    return %c0_i32, %c0_i32_0 : i32, i32
  }
  func.func @transform_13(%arg0: i32) -> (i32, i32) {
    %c0_i32 = arith.constant 0 : i32
    %c0_i32_0 = arith.constant 0 : i32
    %c0_i32_1 = arith.constant 0 : i32
    return %c0_i32, %c0_i32_0 : i32, i32
  }
  func.func @transform_14(%arg0: i32) -> (i32, i32, i32) {
    %c0_i32 = arith.constant 0 : i32
    %c0_i32_0 = arith.constant 0 : i32
    %c0_i32_1 = arith.constant 0 : i32
    return %arg0, %c0_i32, %c0_i32_0 : i32, i32, i32
  }
}

module attributes {stable_mosaic.version = 11 : i64} {
  func.func @block_kernel(%arg0: i32, %arg1: memref<1x16x32xf32, #tpu.memory_space<vmem>>, %arg2: memref<1x32xf32, #tpu.memory_space<vmem>>, %arg3: memref<1x32xf32, #tpu.memory_space<vmem>>, %arg4: memref<32x32xf32, #tpu.memory_space<vmem>>, %arg5: memref<32x32xf32, #tpu.memory_space<vmem>>, %arg6: memref<32x32xf32, #tpu.memory_space<vmem>>, %arg7: memref<32x32xf32, #tpu.memory_space<vmem>>, %arg8: memref<1x32xf32, #tpu.memory_space<vmem>>, %arg9: memref<1x32xf32, #tpu.memory_space<vmem>>, %arg10: memref<1x32xf32, #tpu.memory_space<vmem>>, %arg11: memref<32x128xf32, #tpu.memory_space<vmem>>, %arg12: memref<1x128xf32, #tpu.memory_space<vmem>>, %arg13: memref<128x32xf32, #tpu.memory_space<vmem>>, %arg14: memref<1x32xf32, #tpu.memory_space<vmem>>, %arg15: memref<1x16x32xf32, #tpu.memory_space<vmem>>) attributes {dimension_semantics = [#tpu.dimension_semantics<parallel>], iteration_bounds = array<i64: 2>, scalar_prefetch = 0 : i64, scratch_operands = 0 : i64, tpu.core_type = #tpu.core_type<tc>, window_params = [{transform_indices = @transform_0, window_bounds = array<i64: 1, 16, 32>}, {pipeline_mode = #tpu.pipeline_mode<synchronous>, transform_indices = @transform_1, window_bounds = array<i64: 1, 32>}, {pipeline_mode = #tpu.pipeline_mode<synchronous>, transform_indices = @transform_2, window_bounds = array<i64: 1, 32>}, {pipeline_mode = #tpu.pipeline_mode<synchronous>, transform_indices = @transform_3, window_bounds = array<i64: 32, 32>}, {pipeline_mode = #tpu.pipeline_mode<synchronous>, transform_indices = @transform_4, window_bounds = array<i64: 32, 32>}, {pipeline_mode = #tpu.pipeline_mode<synchronous>, transform_indices = @transform_5, window_bounds = array<i64: 32, 32>}, {pipeline_mode = #tpu.pipeline_mode<synchronous>, transform_indices = @transform_6, window_bounds = array<i64: 32, 32>}, {pipeline_mode = #tpu.pipeline_mode<synchronous>, transform_indices = @transform_7, window_bounds = array<i64: 1, 32>}, {pipeline_mode = #tpu.pipeline_mode<synchronous>, transform_indices = @transform_8, window_bounds = array<i64: 1, 32>}, {pipeline_mode = #tpu.pipeline_mode<synchronous>, transform_indices = @transform_9, window_bounds = array<i64: 1, 32>}, {pipeline_mode = #tpu.pipeline_mode<synchronous>, transform_indices = @transform_10, window_bounds = array<i64: 32, 128>}, {pipeline_mode = #tpu.pipeline_mode<synchronous>, transform_indices = @transform_11, window_bounds = array<i64: 1, 128>}, {pipeline_mode = #tpu.pipeline_mode<synchronous>, transform_indices = @transform_12, window_bounds = array<i64: 128, 32>}, {pipeline_mode = #tpu.pipeline_mode<synchronous>, transform_indices = @transform_13, window_bounds = array<i64: 1, 32>}, {transform_indices = @transform_14, window_bounds = array<i64: 1, 16, 32>}]} {
    %c0 = arith.constant 0 : index
    %c0_0 = arith.constant 0 : index
    %c0_1 = arith.constant 0 : index
    %0 = vector.load %arg1[%c0, %c0_0, %c0_1] : memref<1x16x32xf32, #tpu.memory_space<vmem>>, vector<1x16x32xf32>
    %1 = vector.shape_cast %0 : vector<1x16x32xf32> to vector<16x32xf32>
    %c0_2 = arith.constant 0 : index
    %c0_3 = arith.constant 0 : index
    %2 = vector.load %arg2[%c0_2, %c0_3] : memref<1x32xf32, #tpu.memory_space<vmem>>, vector<1x32xf32>
    %c0_4 = arith.constant 0 : index
    %c0_5 = arith.constant 0 : index
    %3 = vector.load %arg3[%c0_4, %c0_5] : memref<1x32xf32, #tpu.memory_space<vmem>>, vector<1x32xf32>
    %cst = arith.constant dense<0.000000e+00> : vector<16xf32>
    %4 = vector.multi_reduction <add>, %1, %cst [1] : vector<16x32xf32> to vector<16xf32>
    %5 = vector.shape_cast %4 : vector<16xf32> to vector<16x1xf32>
    %cst_6 = arith.constant 3.200000e+01 : f32
    %6 = vector.broadcast %cst_6 : f32 to vector<16x1xf32>
    %7 = arith.divf %5, %6 : vector<16x1xf32>
    %8 = vector.broadcast %7 : vector<16x1xf32> to vector<16x32xf32>
    %9 = arith.subf %1, %8 : vector<16x32xf32>
    %10 = arith.mulf %9, %9 : vector<16x32xf32>
    %cst_7 = arith.constant dense<0.000000e+00> : vector<16xf32>
    %11 = vector.multi_reduction <add>, %10, %cst_7 [1] : vector<16x32xf32> to vector<16xf32>
    %12 = vector.shape_cast %11 : vector<16xf32> to vector<16x1xf32>
    %cst_8 = arith.constant 3.200000e+01 : f32
    %13 = vector.broadcast %cst_8 : f32 to vector<16x1xf32>
    %14 = arith.divf %12, %13 : vector<16x1xf32>
    %15 = vector.broadcast %7 : vector<16x1xf32> to vector<16x32xf32>
    %16 = arith.subf %1, %15 : vector<16x32xf32>
    %cst_9 = arith.constant 9.99999974E-6 : f32
    %17 = vector.broadcast %cst_9 : f32 to vector<16x1xf32>
    %18 = arith.addf %14, %17 : vector<16x1xf32>
    %19 = math.rsqrt %18 : vector<16x1xf32>
    %20 = vector.broadcast %19 : vector<16x1xf32> to vector<16x32xf32>
    %21 = arith.mulf %16, %20 : vector<16x32xf32>
    %22 = vector.broadcast %2 : vector<1x32xf32> to vector<16x32xf32>
    %23 = arith.mulf %21, %22 : vector<16x32xf32>
    %24 = vector.broadcast %3 : vector<1x32xf32> to vector<16x32xf32>
    %25 = arith.addf %23, %24 : vector<16x32xf32>
    %c0_10 = arith.constant 0 : index
    %c0_11 = arith.constant 0 : index
    %26 = vector.load %arg4[%c0_10, %c0_11] : memref<32x32xf32, #tpu.memory_space<vmem>>, vector<32x32xf32>
    %cst_12 = arith.constant dense<0.000000e+00> : vector<16x32xf32>
    %27 = tpu.matmul %25, %26, %cst_12 {dimension_numbers = #tpu.dot_dimension_numbers<[1], [0], [0], [1], [0, 0, 1, 1], [], []>} : vector<16x32xf32>, vector<32x32xf32>, vector<16x32xf32> -> vector<16x32xf32>
    %c0_13 = arith.constant 0 : index
    %c0_14 = arith.constant 0 : index
    %28 = vector.load %arg5[%c0_13, %c0_14] : memref<32x32xf32, #tpu.memory_space<vmem>>, vector<32x32xf32>
    %cst_15 = arith.constant dense<0.000000e+00> : vector<16x32xf32>
    %29 = tpu.matmul %25, %28, %cst_15 {dimension_numbers = #tpu.dot_dimension_numbers<[1], [0], [0], [1], [0, 0, 1, 1], [], []>} : vector<16x32xf32>, vector<32x32xf32>, vector<16x32xf32> -> vector<16x32xf32>
    %c0_16 = arith.constant 0 : index
    %c0_17 = arith.constant 0 : index
    %30 = vector.load %arg6[%c0_16, %c0_17] : memref<32x32xf32, #tpu.memory_space<vmem>>, vector<32x32xf32>
    %cst_18 = arith.constant dense<0.000000e+00> : vector<16x32xf32>
    %31 = tpu.matmul %25, %30, %cst_18 {dimension_numbers = #tpu.dot_dimension_numbers<[1], [0], [0], [1], [0, 0, 1, 1], [], []>} : vector<16x32xf32>, vector<32x32xf32>, vector<16x32xf32> -> vector<16x32xf32>
    %cst_19 = arith.constant 0.176776692 : f32
    %32 = vector.broadcast %cst_19 : f32 to vector<16x32xf32>
    %33 = arith.mulf %27, %32 : vector<16x32xf32>
    %34 = vector.shape_cast %33 : vector<16x32xf32> to vector<1x16x4x8xf32>
    %35 = tpu.transpose %34, [0, 2, 1, 3] : vector<1x16x4x8xf32> -> vector<1x4x16x8xf32>
    %36 = vector.shape_cast %35 : vector<1x4x16x8xf32> to vector<4x16x8xf32>
    %37 = vector.shape_cast %29 : vector<16x32xf32> to vector<1x16x4x8xf32>
    %38 = tpu.transpose %37, [0, 2, 1, 3] : vector<1x16x4x8xf32> -> vector<1x4x16x8xf32>
    %39 = vector.shape_cast %38 : vector<1x4x16x8xf32> to vector<4x16x8xf32>
    %40 = vector.shape_cast %31 : vector<16x32xf32> to vector<1x16x4x8xf32>
    %41 = tpu.transpose %40, [0, 2, 1, 3] : vector<1x16x4x8xf32> -> vector<1x4x16x8xf32>
    %42 = vector.shape_cast %41 : vector<1x4x16x8xf32> to vector<4x16x8xf32>
    %43 = tpu.iota {dimensions = array<i32: 0>} : vector<16x8xi32>
    %44 = tpu.iota {dimensions = array<i32: 1>} : vector<16x8xi32>
    %45 = vector.extract_strided_slice %39 {offsets = [0, 0, 0], sizes = [4, 8, 8], strides = [1, 1, 1]} : vector<4x16x8xf32> to vector<4x8x8xf32>
    %46 = vector.extract_strided_slice %42 {offsets = [0, 0, 0], sizes = [4, 8, 8], strides = [1, 1, 1]} : vector<4x16x8xf32> to vector<4x8x8xf32>
    "tpu.trace_start"() <{level = 10 : i32, message = "bqd,bkd->bqk"}> : () -> ()
    %cst_20 = arith.constant dense<0.000000e+00> : vector<4x16x8xf32>
    %47 = tpu.matmul %36, %45, %cst_20 {dimension_numbers = #tpu.dot_dimension_numbers<[2], [2], [1], [1], [0, 0, 0, 1, 1, 1], [0], [0]>} : vector<4x16x8xf32>, vector<4x8x8xf32>, vector<4x16x8xf32> -> vector<4x16x8xf32>
    "tpu.trace_stop"() : () -> ()
    %c0_i32 = arith.constant 0 : i32
    %48 = vector.broadcast %c0_i32 : i32 to vector<16x8xi32>
    %49 = arith.addi %44, %48 : vector<16x8xi32>
    %50 = arith.cmpi sle, %49, %43 : vector<16x8xi32>
    %cst_21 = arith.constant 0.000000e+00 : f32
    %cst_22 = arith.constant -1.000000e+30 : f32
    %51 = vector.broadcast %cst_21 : f32 to vector<16x8xf32>
    %52 = vector.broadcast %cst_22 : f32 to vector<16x8xf32>
    %53 = arith.select %50, %51, %52 : vector<16x8xi1>, vector<16x8xf32>
    %54 = vector.shape_cast %53 : vector<16x8xf32> to vector<1x16x8xf32>
    %55 = vector.broadcast %54 : vector<1x16x8xf32> to vector<4x16x8xf32>
    %56 = arith.addf %47, %55 : vector<4x16x8xf32>
    %cst_23 = arith.constant dense<0xFF800000> : vector<4x16xf32>
    %57 = vector.multi_reduction <maximumf>, %56, %cst_23 [2] : vector<4x16x8xf32> to vector<4x16xf32>
    %58 = vector.shape_cast %57 : vector<4x16xf32> to vector<4x16x1xf32>
    %59 = vector.broadcast %58 : vector<4x16x1xf32> to vector<4x16x8xf32>
    %60 = arith.subf %56, %59 : vector<4x16x8xf32>
    %61 = math.exp %60 : vector<4x16x8xf32>
    %cst_24 = arith.constant dense<0.000000e+00> : vector<4x16xf32>
    %62 = vector.multi_reduction <add>, %61, %cst_24 [2] : vector<4x16x8xf32> to vector<4x16xf32>
    %63 = vector.shape_cast %62 : vector<4x16xf32> to vector<4x16x1xf32>
    "tpu.trace_start"() <{level = 10 : i32, message = "bqk,bkd->bqd"}> : () -> ()
    %cst_25 = arith.constant dense<0.000000e+00> : vector<4x16x8xf32>
    %64 = tpu.matmul %61, %46, %cst_25 {dimension_numbers = #tpu.dot_dimension_numbers<[2], [1], [1], [2], [0, 0, 0, 1, 1, 2], [0], [0]>} : vector<4x16x8xf32>, vector<4x8x8xf32>, vector<4x16x8xf32> -> vector<4x16x8xf32>
    "tpu.trace_stop"() : () -> ()
    %65 = vector.extract_strided_slice %39 {offsets = [0, 8, 0], sizes = [4, 8, 8], strides = [1, 1, 1]} : vector<4x16x8xf32> to vector<4x8x8xf32>
    %66 = vector.extract_strided_slice %42 {offsets = [0, 8, 0], sizes = [4, 8, 8], strides = [1, 1, 1]} : vector<4x16x8xf32> to vector<4x8x8xf32>
    "tpu.trace_start"() <{level = 10 : i32, message = "bqd,bkd->bqk"}> : () -> ()
    %cst_26 = arith.constant dense<0.000000e+00> : vector<4x16x8xf32>
    %67 = tpu.matmul %36, %65, %cst_26 {dimension_numbers = #tpu.dot_dimension_numbers<[2], [2], [1], [1], [0, 0, 0, 1, 1, 1], [0], [0]>} : vector<4x16x8xf32>, vector<4x8x8xf32>, vector<4x16x8xf32> -> vector<4x16x8xf32>
    "tpu.trace_stop"() : () -> ()
    %c8_i32 = arith.constant 8 : i32
    %68 = vector.broadcast %c8_i32 : i32 to vector<16x8xi32>
    %69 = arith.addi %44, %68 : vector<16x8xi32>
    %70 = arith.cmpi sle, %69, %43 : vector<16x8xi32>
    %cst_27 = arith.constant 0.000000e+00 : f32
    %cst_28 = arith.constant -1.000000e+30 : f32
    %71 = vector.broadcast %cst_27 : f32 to vector<16x8xf32>
    %72 = vector.broadcast %cst_28 : f32 to vector<16x8xf32>
    %73 = arith.select %70, %71, %72 : vector<16x8xi1>, vector<16x8xf32>
    %74 = vector.shape_cast %73 : vector<16x8xf32> to vector<1x16x8xf32>
    %75 = vector.broadcast %74 : vector<1x16x8xf32> to vector<4x16x8xf32>
    %76 = arith.addf %67, %75 : vector<4x16x8xf32>
    %cst_29 = arith.constant dense<0xFF800000> : vector<4x16xf32>
    %77 = vector.multi_reduction <maximumf>, %76, %cst_29 [2] : vector<4x16x8xf32> to vector<4x16xf32>
    %78 = vector.shape_cast %77 : vector<4x16xf32> to vector<4x16x1xf32>
    %79 = arith.maximumf %58, %78 : vector<4x16x1xf32>
    %80 = arith.subf %58, %79 : vector<4x16x1xf32>
    %81 = math.exp %80 : vector<4x16x1xf32>
    %82 = vector.broadcast %79 : vector<4x16x1xf32> to vector<4x16x8xf32>
    %83 = arith.subf %76, %82 : vector<4x16x8xf32>
    %84 = math.exp %83 : vector<4x16x8xf32>
    %85 = arith.mulf %81, %63 : vector<4x16x1xf32>
    %cst_30 = arith.constant dense<0.000000e+00> : vector<4x16xf32>
    %86 = vector.multi_reduction <add>, %84, %cst_30 [2] : vector<4x16x8xf32> to vector<4x16xf32>
    %87 = vector.shape_cast %86 : vector<4x16xf32> to vector<4x16x1xf32>
    %88 = arith.addf %85, %87 : vector<4x16x1xf32>
    %89 = vector.broadcast %81 : vector<4x16x1xf32> to vector<4x16x8xf32>
    %90 = arith.mulf %89, %64 : vector<4x16x8xf32>
    "tpu.trace_start"() <{level = 10 : i32, message = "bqk,bkd->bqd"}> : () -> ()
    %cst_31 = arith.constant dense<0.000000e+00> : vector<4x16x8xf32>
    %91 = tpu.matmul %84, %66, %cst_31 {dimension_numbers = #tpu.dot_dimension_numbers<[2], [1], [1], [2], [0, 0, 0, 1, 1, 2], [0], [0]>} : vector<4x16x8xf32>, vector<4x8x8xf32>, vector<4x16x8xf32> -> vector<4x16x8xf32>
    "tpu.trace_stop"() : () -> ()
    %92 = arith.addf %90, %91 : vector<4x16x8xf32>
    %93 = tpu.reciprocal %88 : vector<4x16x1xf32> -> vector<4x16x1xf32>
    %94 = vector.broadcast %93 : vector<4x16x1xf32> to vector<4x16x8xf32>
    %95 = arith.mulf %92, %94 : vector<4x16x8xf32>
    %96 = vector.shape_cast %95 : vector<4x16x8xf32> to vector<1x4x16x8xf32>
    %97 = tpu.transpose %96, [0, 2, 1, 3] : vector<1x4x16x8xf32> -> vector<1x16x4x8xf32>
    %98 = vector.shape_cast %97 : vector<1x16x4x8xf32> to vector<16x32xf32>
    %c0_32 = arith.constant 0 : index
    %c0_33 = arith.constant 0 : index
    %99 = vector.load %arg7[%c0_32, %c0_33] : memref<32x32xf32, #tpu.memory_space<vmem>>, vector<32x32xf32>
    %cst_34 = arith.constant dense<0.000000e+00> : vector<16x32xf32>
    %100 = tpu.matmul %98, %99, %cst_34 {dimension_numbers = #tpu.dot_dimension_numbers<[1], [0], [0], [1], [0, 0, 1, 1], [], []>} : vector<16x32xf32>, vector<32x32xf32>, vector<16x32xf32> -> vector<16x32xf32>
    %c0_35 = arith.constant 0 : index
    %c0_36 = arith.constant 0 : index
    %101 = vector.load %arg8[%c0_35, %c0_36] : memref<1x32xf32, #tpu.memory_space<vmem>>, vector<1x32xf32>
    %102 = vector.broadcast %101 : vector<1x32xf32> to vector<16x32xf32>
    %103 = arith.addf %100, %102 : vector<16x32xf32>
    %104 = arith.addf %1, %103 : vector<16x32xf32>
    %c0_37 = arith.constant 0 : index
    %c0_38 = arith.constant 0 : index
    %105 = vector.load %arg9[%c0_37, %c0_38] : memref<1x32xf32, #tpu.memory_space<vmem>>, vector<1x32xf32>
    %c0_39 = arith.constant 0 : index
    %c0_40 = arith.constant 0 : index
    %106 = vector.load %arg10[%c0_39, %c0_40] : memref<1x32xf32, #tpu.memory_space<vmem>>, vector<1x32xf32>
    %cst_41 = arith.constant dense<0.000000e+00> : vector<16xf32>
    %107 = vector.multi_reduction <add>, %104, %cst_41 [1] : vector<16x32xf32> to vector<16xf32>
    %108 = vector.shape_cast %107 : vector<16xf32> to vector<16x1xf32>
    %cst_42 = arith.constant 3.200000e+01 : f32
    %109 = vector.broadcast %cst_42 : f32 to vector<16x1xf32>
    %110 = arith.divf %108, %109 : vector<16x1xf32>
    %111 = vector.broadcast %110 : vector<16x1xf32> to vector<16x32xf32>
    %112 = arith.subf %104, %111 : vector<16x32xf32>
    %113 = arith.mulf %112, %112 : vector<16x32xf32>
    %cst_43 = arith.constant dense<0.000000e+00> : vector<16xf32>
    %114 = vector.multi_reduction <add>, %113, %cst_43 [1] : vector<16x32xf32> to vector<16xf32>
    %115 = vector.shape_cast %114 : vector<16xf32> to vector<16x1xf32>
    %cst_44 = arith.constant 3.200000e+01 : f32
    %116 = vector.broadcast %cst_44 : f32 to vector<16x1xf32>
    %117 = arith.divf %115, %116 : vector<16x1xf32>
    %118 = vector.broadcast %110 : vector<16x1xf32> to vector<16x32xf32>
    %119 = arith.subf %104, %118 : vector<16x32xf32>
    %cst_45 = arith.constant 9.99999974E-6 : f32
    %120 = vector.broadcast %cst_45 : f32 to vector<16x1xf32>
    %121 = arith.addf %117, %120 : vector<16x1xf32>
    %122 = math.rsqrt %121 : vector<16x1xf32>
    %123 = vector.broadcast %122 : vector<16x1xf32> to vector<16x32xf32>
    %124 = arith.mulf %119, %123 : vector<16x32xf32>
    %125 = vector.broadcast %105 : vector<1x32xf32> to vector<16x32xf32>
    %126 = arith.mulf %124, %125 : vector<16x32xf32>
    %127 = vector.broadcast %106 : vector<1x32xf32> to vector<16x32xf32>
    %128 = arith.addf %126, %127 : vector<16x32xf32>
    %c0_46 = arith.constant 0 : index
    %c0_47 = arith.constant 0 : index
    %129 = vector.load %arg11[%c0_46, %c0_47] : memref<32x128xf32, #tpu.memory_space<vmem>>, vector<32x128xf32>
    %cst_48 = arith.constant dense<0.000000e+00> : vector<16x128xf32>
    %130 = tpu.matmul %128, %129, %cst_48 {dimension_numbers = #tpu.dot_dimension_numbers<[1], [0], [0], [1], [0, 0, 1, 1], [], []>} : vector<16x32xf32>, vector<32x128xf32>, vector<16x128xf32> -> vector<16x128xf32>
    %c0_49 = arith.constant 0 : index
    %c0_50 = arith.constant 0 : index
    %131 = vector.load %arg12[%c0_49, %c0_50] : memref<1x128xf32, #tpu.memory_space<vmem>>, vector<1x128xf32>
    %132 = vector.broadcast %131 : vector<1x128xf32> to vector<16x128xf32>
    %133 = arith.addf %130, %132 : vector<16x128xf32>
    %cst_51 = arith.constant 0.000000e+00 : f32
    %134 = vector.broadcast %cst_51 : f32 to vector<16x128xf32>
    %135 = arith.maximumf %133, %134 : vector<16x128xf32>
    %c0_52 = arith.constant 0 : index
    %c0_53 = arith.constant 0 : index
    %136 = vector.load %arg13[%c0_52, %c0_53] : memref<128x32xf32, #tpu.memory_space<vmem>>, vector<128x32xf32>
    %cst_54 = arith.constant dense<0.000000e+00> : vector<16x32xf32>
    %137 = tpu.matmul %135, %136, %cst_54 {dimension_numbers = #tpu.dot_dimension_numbers<[1], [0], [0], [1], [0, 0, 1, 1], [], []>} : vector<16x128xf32>, vector<128x32xf32>, vector<16x32xf32> -> vector<16x32xf32>
    %c0_55 = arith.constant 0 : index
    %c0_56 = arith.constant 0 : index
    %138 = vector.load %arg14[%c0_55, %c0_56] : memref<1x32xf32, #tpu.memory_space<vmem>>, vector<1x32xf32>
    %139 = vector.broadcast %138 : vector<1x32xf32> to vector<16x32xf32>
    %140 = arith.addf %137, %139 : vector<16x32xf32>
    %141 = arith.addf %104, %140 : vector<16x32xf32>
    %142 = vector.shape_cast %141 : vector<16x32xf32> to vector<1x16x32xf32>
    %c0_57 = arith.constant 0 : index
    %c0_58 = arith.constant 0 : index
    %c0_59 = arith.constant 0 : index
    %143 = vector.load %arg15[%c0_57, %c0_58, %c0_59] : memref<1x16x32xf32, #tpu.memory_space<vmem>>, vector<1x16x32xf32>
    tpu.vector_store %arg15[%c0_57, %c0_58, %c0_59], %142 {strides = array<i32>} : memref<1x16x32xf32, #tpu.memory_space<vmem>>, vector<1x16x32xf32>,
    return
  }
  func.func @transform_0(%arg0: i32) -> (i32, i32, i32) {
    %c0_i32 = arith.constant 0 : i32
    %c0_i32_0 = arith.constant 0 : i32
    %c0_i32_1 = arith.constant 0 : i32
    return %arg0, %c0_i32, %c0_i32_0 : i32, i32, i32
  }
  func.func @transform_1(%arg0: i32) -> (i32, i32) {
    %c0_i32 = arith.constant 0 : i32
    %c0_i32_0 = arith.constant 0 : i32
    %c0_i32_1 = arith.constant 0 : i32
    return %c0_i32, %c0_i32_0 : i32, i32
  }
  func.func @transform_2(%arg0: i32) -> (i32, i32) {
    %c0_i32 = arith.constant 0 : i32
    %c0_i32_0 = arith.constant 0 : i32
    %c0_i32_1 = arith.constant 0 : i32
    return %c0_i32, %c0_i32_0 : i32, i32
  }
  func.func @transform_3(%arg0: i32) -> (i32, i32) {
    %c0_i32 = arith.constant 0 : i32
    %c0_i32_0 = arith.constant 0 : i32
    %c0_i32_1 = arith.constant 0 : i32
    return %c0_i32, %c0_i32_0 : i32, i32
  }
  func.func @transform_4(%arg0: i32) -> (i32, i32) {
    %c0_i32 = arith.constant 0 : i32
    %c0_i32_0 = arith.constant 0 : i32
    %c0_i32_1 = arith.constant 0 : i32
    return %c0_i32, %c0_i32_0 : i32, i32
  }
  func.func @transform_5(%arg0: i32) -> (i32, i32) {
    %c0_i32 = arith.constant 0 : i32
    %c0_i32_0 = arith.constant 0 : i32
    %c0_i32_1 = arith.constant 0 : i32
    return %c0_i32, %c0_i32_0 : i32, i32
  }
  func.func @transform_6(%arg0: i32) -> (i32, i32) {
    %c0_i32 = arith.constant 0 : i32
    %c0_i32_0 = arith.constant 0 : i32
    %c0_i32_1 = arith.constant 0 : i32
    return %c0_i32, %c0_i32_0 : i32, i32
  }
  func.func @transform_7(%arg0: i32) -> (i32, i32) {
    %c0_i32 = arith.constant 0 : i32
    %c0_i32_0 = arith.constant 0 : i32
    %c0_i32_1 = arith.constant 0 : i32
    return %c0_i32, %c0_i32_0 : i32, i32
  }
  func.func @transform_8(%arg0: i32) -> (i32, i32) {
    %c0_i32 = arith.constant 0 : i32
    %c0_i32_0 = arith.constant 0 : i32
    %c0_i32_1 = arith.constant 0 : i32
    return %c0_i32, %c0_i32_0 : i32, i32
  }
  func.func @transform_9(%arg0: i32) -> (i32, i32) {
    %c0_i32 = arith.constant 0 : i32
    %c0_i32_0 = arith.constant 0 : i32
    %c0_i32_1 = arith.constant 0 : i32
    return %c0_i32, %c0_i32_0 : i32, i32
  }
  func.func @transform_10(%arg0: i32) -> (i32, i32) {
    %c0_i32 = arith.constant 0 : i32
    %c0_i32_0 = arith.constant 0 : i32
    %c0_i32_1 = arith.constant 0 : i32
    return %c0_i32, %c0_i32_0 : i32, i32
  }
  func.func @transform_11(%arg0: i32) -> (i32, i32) {
    %c0_i32 = arith.constant 0 : i32
    %c0_i32_0 = arith.constant 0 : i32
    %c0_i32_1 = arith.constant 0 : i32
    return %c0_i32, %c0_i32_0 : i32, i32
  }
  func.func @transform_12(%arg0: i32) -> (i32, i32) {
    %c0_i32 = arith.constant 0 : i32
    %c0_i32_0 = arith.constant 0 : i32
    %c0_i32_1 = arith.constant 0 : i32
    return %c0_i32, %c0_i32_0 : i32, i32
  }
  func.func @transform_13(%arg0: i32) -> (i32, i32) {
    %c0_i32 = arith.constant 0 : i32
    %c0_i32_0 = arith.constant 0 : i32
    %c0_i32_1 = arith.constant 0 : i32
    return %c0_i32, %c0_i32_0 : i32, i32
  }
  func.func @transform_14(%arg0: i32) -> (i32, i32, i32) {
    %c0_i32 = arith.constant 0 : i32
    %c0_i32_0 = arith.constant 0 : i32
    %c0_i32_1 = arith.constant 0 : i32
    return %arg0, %c0_i32, %c0_i32_0 : i32, i32, i32
  }
}

</mosaic_0001>

<bundles_post_ra>
// kernel: tpu_custom_call.1
= control target key start
LH: loop header
LB: loop body
LE: loop exit
PB: predicated region body
PF: predicated region fallthrough
CT: control target
= control target key end

     0   :  { %s4378_s0 = inlined_call_operand.vmem [shape: f32[2,16,32], index: 0, kind: input, shape index: {}]   ;;  %s4379_s1 = inlined_call_operand.hbm [shape: f32[1,32], index: 1, kind: input, shape index: {}]   ;;  %s4380_s2 = inlined_call_operand.vmem [shape: f32[1,32], index: 2, kind: input, shape index: {}]   ;;  %s4381_s3 = inlined_call_operand.vmem [shape: f32[32,32], index: 3, kind: input, shape index: {}]   ;;  %s4382_s4 = inlined_call_operand.vmem [shape: f32[32,32], index: 4, kind: input, shape index: {}]   ;;  %s4383_s5 = inlined_call_operand.vmem [shape: f32[32,32], index: 5, kind: input, shape index: {}]   ;;  %s4384_s6 = inlined_call_operand.vmem [shape: f32[32,32], index: 6, kind: input, shape index: {}]   ;;  %s4385_s7 = inlined_call_operand.vmem [shape: f32[1,32], index: 7, kind: input, shape index: {}]   ;;  %s4386_s8 = inlined_call_operand.vmem [shape: f32[1,32], index: 8, kind: input, shape index: {}]   ;;  %s4387_s9 = inlined_call_operand.vmem [shape: f32[1,32], index: 9, kind: input, shape index: {}]   ;;  %s4388_s10 = inlined_call_operand.hbm [shape: f32[32,128], index: 10, kind: input, shape index: {}]   ;;  %s4389_s11 = inlined_call_operand.vmem [shape: f32[1,128], index: 11, kind: input, shape index: {}]   ;;  %s4390_s12 = inlined_call_operand.vmem [shape: f32[128,32], index: 12, kind: input, shape index: {}]   ;;  %s4391_s13 = inlined_call_operand.vmem [shape: f32[1,32], index: 13, kind: input, shape index: {}]   ;;  %s4392_s14 = inlined_call_operand.hbm [shape: f32[2,16,32], index: 14, kind: output, shape index: {}]  }
   0x1   :  { %4399 = sst [smem:[#allocation15_spill]] %s4378_s0 }
   0x2   :  { %19 = vsyncpa [#allocation3], 0 }
   0x3   :  { %20 = vsyncpa [#allocation6], 0 }
   0x4   :  { %21 = vsyncpa [#allocation4], 0 }
   0x5   :  { %23 = vsyncpa [#allocation4 + $0x1], 0  ;;  %s3164_s29 = smov 0   ;;  %s3166_s30 = smov 0  }
   0x6   :  { %s3168_s15 = smov 0   ;;  %s3170_s16 = smov 0  }
   0x7 LB: > { %4400 = sst [smem:[#allocation11_spill]] %s3068_s15  ;;  %s3185_s17 = sadd.s32 4294967295, %s3072_s16   ;;  %s3072_s16 = sphi %s3170_s16, %s4436_s16   ;;  %s3068_s15 = sphi %s3168_s15, %s4438_s15   ;;  %s3064_s30 = sphi %s3166_s30, %s4440_s30   ;;  %s3060_s29 = sphi %s3164_s29, %s4439_s29  }
   0x8   : > { %s2714_s18 = sadd.s32 4294967294, %s3072_s16   ;;  %s3189_s19 = sadd.s32 1, %s3072_s16  }
   0x9   : > { %4401 = sst [smem:[#allocation12_spill]] %s3189_s19  ;;  %s335_s20 = sadd.s32 1, %s3068_s15 }
   0xa   : > { %s332_s21 = ssub.s32 %s3072_s16, %s3189_s19  ;;  %p345_p0 = scmp.ne.s32.totalorder %s3068_s15, %s3064_s30 }
   0xb   : > { %p333_p1 = scmp.eq.s32.totalorder %s332_s21, 0  ;;  %p346_p2 = scmp.eq.s32.totalorder %s3185_s17, 1 }
   0xc   : > { %p351_p3 = scmp.ne.s32.totalorder %s3064_s30, %s3060_s29  ;;  %p352_p4 = scmp.eq.s32.totalorder %s2714_s18, 1 }
   0xd   : > { %s3200_s22 = scalar_select %p333_p1, %s3068_s15, %s335_s20  }
   0xe   : > { %p3202_p5 = por %p346_p2, %p345_p0  ;;  %p3206_p6 = por %p352_p4, %p351_p3 }
   0xf   : > { %4402 = sst [smem:[#allocation13_spill]] %s3200_s22  ;;  %p2715_p7 = scmp.ge.s32.totalorder %s3072_s16, 1 }
  0x10   : > { %s4404_s24 = scalar_select %p3206_p6, 1, 0 }
  0x11   : > { %p359_p8 = scmp.lt.s32.totalorder %s3072_s16, 3  ;;  %p2807_p9 = scmp.eq.s32.totalorder %s3185_s17, 0 }
  0x12   : > { %4405 = sst [smem:[#allocation14_spill]] %s4404_s24  ;;  %s371_s28 = sshll.u32 %s4379_s1, 4  ;;  %s372_s28 = int_to_ptr.hbm [resolvable:$true] %s371_s28 }
  0x13   : > { %p3213_p10 = pnand %p2715_p7, %p359_p8  ;;  %s3074_s18 = smov [#allocation2]  }
  0x14   : > { %s373_s20 = sshll.u32 %s3074_s18, 4  ;;  %s406_s15 = sshll.u32 %s4388_s10, 4  ;;  %s374_s20 = int_to_ptr.vmem [resolvable:$true] %s373_s20  ;;  %s407_s15 = int_to_ptr.hbm [resolvable:$true] %s406_s15 }
  0x15   : > { %p2796_p11 = pneg %p3213_p10  ;;  %s3075_s19 = smov [#allocation5]  }
  0x16   : > { %s408_s24 = sshll.u32 %s3075_s19, 4  ;;  %s3076_s26 = smov 128   ;;  %s409_s24 = int_to_ptr.vmem [resolvable:$true] %s408_s24 }
  0x17   : > { %p2797_p12 = pnand %p2807_p9, %p2796_p11  ;;  %s3077_s27 = smov 8  }
  0x18   : > { %441 = sbr.rel (%p3213_p10) target bundleno = 2151 (0x867), region = 76 }
  0x19   : > { %2799 = dma.hbm_to_vmem [thread:$0]  (!%p2797_p12), %s372_s28, 16, %s374_s20, [#allocation3]  }
  0x1a   : > { %2802 = dma.hbm_to_vmem [thread:$0]  (!%p2797_p12), %s407_s15, 512, %s409_s24, [#allocation6], %s3076_s26, %s3076_s26, %s3077_s27  }
  0x1d   : > { %3047 = dma.done.wait (%p2807_p9), [#allocation3], 16  }
  0x1e   : > { %3049 = vsyncadd (%p2807_p9), [#allocation3], 4294967280 }
  0x1f   : > { %3051 = dma.done.wait (%p2807_p9), [#allocation6], 512  }
  0x20   : > { %3053 = vsyncadd (%p2807_p9), [#allocation6], 4294966784  ;;  %p493_p13 = scmp.lt.s32.totalorder %s3185_s17, 1  ;;  %s4407_s0 = sld [smem:[#allocation15_spill]]  ;;  %vm4397_vm0 = vcmask 261120   ;;  %v3078_v4 = vmov 32.0  }
  0x21   : > { %2866 = vrcp.f32 %v3078_v4  ;;  %v567_v21 = vld [vmem:[%s4381_s3 + $0x18] sm:$0xff]  ;;  %v566_v22 = vld [vmem:[%s4381_s3 + $0x10] sm:$0xff]  ;;  %v565_v23 = vld [vmem:[%s4381_s3 + $0x8] sm:$0xff]  ;;  %s3081_s22 = smov 112   ;;  %vm674_vm8 = vcmask 1047556   ;;  %vm1383_vm9 = vcmask 64512  }
  0x22   : > { %s494_s19 = scalar_select %p493_p13, %s3185_s17, 1  ;;  %586 = vmatpush.msra.mxu1 %v567_v21  ;;  %2782 = vmatpush.msra.mxu2 %v567_v21  ;;  %v564_v24 = vld [vmem:[%s4381_s3] sm:$0xff]  ;;  %v600_v25 = vld [vmem:[%s4382_s4 + $0x18] sm:$0xff]  ;;  %v599_v26 = vld [vmem:[%s4382_s4 + $0x10] sm:$0xff] }
  0x23   : > { %v598_v27 = vld [vmem:[%s4382_s4 + $0x8] sm:$0xff]  ;;  %v597_v30 = vld [vmem:[%s4382_s4] sm:$0xff]  ;;  %v627_v32 = vld [vmem:[%s4383_s5 + $0x18] sm:$0xff]  ;;  %s3085_s24 = smov 24   ;;  %s3086_s28 = smov 16  }
  0x24   : > { %s2780_s15 = sshll.u32 %s494_s19, 4  ;;  %587 = vmatpush.msra.mxu1 %v566_v22  ;;  %2783 = vmatpush.msra.mxu2 %v566_v22  ;;  %v626_v33 = vld [vmem:[%s4383_s5 + $0x10] sm:$0xff]  ;;  %v625_v34 = vld [vmem:[%s4383_s5 + $0x8] sm:$0xff]  ;;  %v624_v37 = vld [vmem:[%s4383_s5] sm:$0xff]  ;;  %s3079_s19 = smov 120  }
  0x25   : > { %v2859_v47 = vld [vmem:[#allocation2] ss:$0 sm:$0xff]  ;;  %s4398_s18 = smov 8   ;;  %s2781_s27 = sshll.u32 %s3185_s17, 4 }
  0x26   : > { %s3242_s25 = scalar_lea.vmem %s4407_s0, %s2780_s15  ;;  %588 = vmatpush.msra.mxu1 %v565_v23  ;;  %2784 = vmatpush.msra.mxu2 %v565_v23  ;;  %v2860_v51 = vld [vmem:[%s4380_s2] ss:$0 sm:$0xff]  ;;  %s3080_s15 = smov 104  }
  0x27   : > { %v498_v0 = vld [vmem:[%s3242_s25] sm:$0xff]  ;;  %v499_v2 = vld [vmem:[%s3242_s25 + $0x8] sm:$0xff]  ;;  %v2867_v5 = vpop.eup %2866 }
  0x28   : > { %v503_v1 = vsel %vm4397_vm0, %v498_v0, 0.0  ;;  %v506_v3 = vsel %vm4397_vm0, %v499_v2, 0.0  ;;  %v510_v6 = vmul.f32 32.0, %v2867_v5  ;;  %vm514_vm1 = vweird.f32 %v2867_v5  ;;  %589 = vmatpush.msra.mxu1 %v564_v24  ;;  %2785 = vmatpush.msra.mxu2 %v564_v24 }
  0x29   : > { %504 = vadd.xlane.f32.xlu0 %v503_v1 }
  0x2a   : > { %v511_v7 = vsub.f32 1.0, %v510_v6  ;;  %613 = vmatpush.msrb.mxu1 %v600_v25  ;;  %640 = vmatpush.msrb.mxu2 %v627_v32  ;;  %v3082_v6 = vmov 1983009808  }
  0x2c   : > { %v512_v8 = vmul.f32 %v2867_v5, %v511_v7  ;;  %614 = vmatpush.msrb.mxu1 %v599_v26  ;;  %641 = vmatpush.msrb.mxu2 %v626_v33  ;;  %v679_v7 = vunpack.c.l.s4 %v3082_v6 }
  0x2e   : > { %v513_v9 = vadd.f32 %v2867_v5, %v512_v8  ;;  %615 = vmatpush.msrb.mxu1 %v598_v27  ;;  %642 = vmatpush.msrb.mxu2 %v625_v34 }
  0x30   : > { %v3248_v10 = vsel %vm514_vm1, %v2867_v5, %v513_v9  ;;  %616 = vmatpush.msrb.mxu1 %v597_v30  ;;  %643 = vmatpush.msrb.mxu2 %v624_v37 }
  0x31   : > { %507 = vadd.xlane.f32.xlu0 %v506_v3 }
  0x9c   : > { %v505_v11 = vpop.xlane.xlu0 %504 }
  0x9d   : > { %v516_v12 = vmul.f32 %v3248_v10, %v505_v11 }
  0x9f   : > { %v518_v13 = vsub.f32 %v498_v0, %v516_v12 }
  0xa1   : > { %v520_v14 = vmul.f32 %v518_v13, %v518_v13 }
  0xa3   : > { %v522_v15 = vsel %vm4397_vm0, %v520_v14, 0.0  ;;  %v3336_v14 = vunpack.c.0.s8 %v679_v7 }
  0xa4   : > { %523 = vadd.xlane.f32.xlu1 %v522_v15  ;;  %v508_v16 = vpop.xlane.xlu0 %507 }
  0xa5   : > { %v517_v17 = vmul.f32 %v3248_v10, %v508_v16 }
  0xa7   : > { %v3253_v18 = vsub.f32 %v499_v2, %v517_v17 }
  0xa9   : > { %v521_v19 = vmul.f32 %v3253_v18, %v3253_v18 }
  0xab   : > { %v525_v20 = vsel %vm4397_vm0, %v521_v19, 0.0  ;;  %v3083_v19 = vmov 1934713408  }
  0xac   : > { %526 = vadd.xlane.f32.xlu1 %v525_v20  ;;  %v703_v20 = vunpack.c.l.s4 %v3083_v19 }
 0x117   : > { %v524_v28 = vpop.xlane.xlu1 %523 }
 0x118   : > { %v528_v29 = vmul.f32 %v524_v28, %v3248_v10  ;;  %v3346_v28 = vunpack.c.0.s8 %v703_v20 }
 0x11a   : > { %v530_v31 = vadd.f32 1e-05, %v528_v29 }
 0x11c   : > { %2868 = vrsqrt.f32 %v530_v31  ;;  %vm538_vm3 = vweird.f32 %v530_v31 }
 0x11f   : > { %v527_v35 = vpop.xlane.xlu1 %526 }
 0x120   : > { %v529_v36 = vmul.f32 %v527_v35, %v3248_v10 }
 0x122   : > { %v2869_v38 = vpop.eup %2868  ;;  %v531_v39 = vadd.f32 1e-05, %v529_v36 }
 0x123   : > { %v533_v40 = vmul.f32 %v2869_v38, %v530_v31  ;;  %vm539_vm2 = vweird.f32 %v2869_v38 }
 0x124   : > { %2870 = vrsqrt.f32 %v531_v39  ;;  %vm540_vm4 = vmor %vm538_vm3, %vm539_vm2  ;;  %vm548_vm5 = vweird.f32 %v531_v39 }
 0x125   : > { %v534_v41 = vmul.f32 %v2869_v38, %v533_v40 }
 0x127   : > { %v535_v42 = vmul.f32 0.5, %v534_v41 }
 0x129   : > { %v536_v43 = vsub.f32 1.5, %v535_v42 }
 0x12a   : > { %v2871_v44 = vpop.eup %2870 }
 0x12b   : > { %v537_v45 = vmul.f32 %v2869_v38, %v536_v43  ;;  %v543_v46 = vmul.f32 %v2871_v44, %v531_v39  ;;  %vm549_vm6 = vweird.f32 %v2871_v44 }
 0x12c   : > { %vm550_vm7 = vmor %vm548_vm5, %vm549_vm6 }
 0x12d   : > { %v541_v48 = vsel %vm540_vm4, %v2869_v38, %v537_v45  ;;  %v544_v49 = vmul.f32 %v2871_v44, %v543_v46 }
 0x12e   : > { %v552_v50 = vmul.f32 %v541_v48, %v518_v13 }
 0x12f   : > { %v545_v52 = vmul.f32 0.5, %v544_v49 }
 0x130   : > { %v557_v53 = vmul.f32 %v2859_v47, %v552_v50 }
 0x131   : > { %v546_v54 = vsub.f32 1.5, %v545_v52 }
 0x132   : > { %v562_v55 = vadd.f32 %v2860_v51, %v557_v53 }
 0x133   : > { %v547_v56 = vmul.f32 %v2871_v44, %v546_v54 }
 0x134   : > { %2725 = vmatmul.msk.f32.vlgmr.msra.gmra.mxu1 %vm4397_vm0, %v562_v55 }
 0x135   : > { %v551_v57 = vsel %vm550_vm7, %v2871_v44, %v547_v56 }
 0x136   : > { %v553_v58 = vmul.f32 %v551_v57, %v3253_v18 }
 0x138   : > { %v558_v59 = vmul.f32 %v2859_v47, %v553_v58 }
 0x13a   : > { %v563_v60 = vadd.f32 %v2860_v51, %v558_v59 }
 0x13c   : > { %2726 = vmatmul.msk.f32.vlgmr.msra.gmra.mxu2 %vm4397_vm0, %v563_v60  ;;  %2727 = vmatmul.msk.f32.vlgmr.msrb.gmra.mxu1 %vm4397_vm0, %v562_v55 }
 0x144   : > { %2728 = vmatmul.msk.f32.gmra.mxu1 %vm4397_vm0, %v563_v60  ;;  %2729 = vmatmul.msk.f32.vlgmr.msrb.gmra.mxu2 %vm4397_vm0, %v562_v55 }
 0x14c   : > { %2730 = vmatmul.msk.f32.gmra.mxu2 %vm4397_vm0, %v563_v60 }
 0x1b1   : > { %v591_v61 = vpop.f32.mrf.mxu1 }
 0x1b2   : > { %v651_v62 = vmul.f32 0.17677669, %v591_v61 }
 0x1b4   : > { %655 = vrot.lane.b32.xlu1 %v651_v62, %s3079_s19  ;;  %v676_v8 = vrot.slane %v651_v62, 4 }
 0x1b9   : > { %v618_v63 = vpop.f32.mrf.mxu1 }
 0x1ba   : > { %908 = vrot.lane.b32.xlu0 %v618_v63, %s3080_s15  ;;  %896 = vrot.lane.b32.xlu2 %v618_v63, %s3079_s19  ;;  %v916_v13 = vrot.slane %v618_v63, 4 }
 0x1bf   : > { %v594_v0 = vpop.f32.mrf.mxu2 }
 0x1c0   : > { %v3309_v1 = vmul.f32 0.17677669, %v594_v0 }
 0x1c1   : > { %v3321_v3 = vpop.f32.mrf.mxu1 }
 0x1c2   : > { %902 = vrot.lane.b32.xlu2 %v618_v63, %s3081_s22  ;;  %663 = vrot.lane.b32.xlu0 %v3309_v1, %s3081_s22  ;;  %v732_v31 = vrot.slane %v3309_v1, 4  ;;  %v972_v32 = vrot.slane %v3321_v3, 4 }
 0x1c7   : > { %v3314_v2 = vpop.f32.mrf.mxu2 }
 0x1c8   : > { %1136 = vrot.lane.b32.xlu1 %v3314_v2, %s3079_s19  ;;  %v1156_v40 = vrot.slane %v3314_v2, 4 }
 0x1ca   : > { %661 = vrot.lane.b32.xlu2 %v651_v62, %s3081_s22  ;;  %1142 = vrot.lane.b32.xlu0 %v3314_v2, %s3081_s22 }
 0x1d2   : > { %667 = vrot.lane.b32.xlu2 %v651_v62, %s3080_s15  ;;  %898 = vrot.lane.b32.xlu0 %v3321_v3, %s3079_s19 }
 0x1da   : > { %657 = vrot.lane.b32.xlu2 %v3309_v1, %s3079_s19 }
 0x1e2   : > { %669 = vrot.lane.b32.xlu2 %v3309_v1, %s3080_s15 }
 0x1ea   : > { %1148 = vrot.lane.b32.xlu2 %v3314_v2, %s3080_s15 }
 0x1f2   : > { %904 = vrot.lane.b32.xlu2 %v3321_v3, %s3081_s22 }
 0x1fa   : > { %910 = vrot.lane.b32.xlu2 %v3321_v3, %s3080_s15 }
 0x214   : > { %v897_v4 = vpop.permute.xlu2 %896 }
 0x215   : > { %v928_v23 = vrot.slane %v897_v4, 4 }
 0x21c   : > { %v903_v5 = vpop.permute.xlu2 %902 }
 0x21d   : > { %v914_v11 = vrot.slane %v903_v5, 4  ;;  %v917_v16 = vsel %vm674_vm8, %v903_v5, %v916_v13 }
 0x21e   : > { %v925_v24 = vperm.slane %v917_v16, %v3336_v14 }
 0x21f   : > { %v915_v21 = vsel %vm674_vm8, %v914_v11, %v618_v63 }
 0x220   : > { %v921_v27 = vperm.slane %v915_v21, %v3336_v14  ;;  %v952_v41 = vrot.slane %v925_v24, 4 }
 0x222   : > { %v940_v49 = vrot.slane %v921_v27, 4 }
 0x224   : > { %v662_v9 = vpop.permute.xlu2 %661 }
 0x225   : > { %v673_v12 = vrot.slane %v662_v9, 4  ;;  %v677_v15 = vsel %vm674_vm8, %v662_v9, %v676_v8 }
 0x226   : > { %v656_v18 = vpop.permute.xlu1 %655  ;;  %v685_v22 = vperm.slane %v677_v15, %v3336_v14 }
 0x227   : > { %v675_v17 = vsel %vm674_vm8, %v673_v12, %v651_v62  ;;  %v688_v26 = vrot.slane %v656_v18, 4 }
 0x228   : > { %v681_v25 = vperm.slane %v675_v17, %v3336_v14  ;;  %v712_v37 = vrot.slane %v685_v22, 4 }
 0x22a   : > { %v700_v42 = vrot.slane %v681_v25, 4 }
 0x22c   : > { %v668_v29 = vpop.permute.xlu2 %667  ;;  %v909_v30 = vpop.permute.xlu0 %908 }
 0x22d   : > { %v686_v33 = vrot.slane %v668_v29, 4  ;;  %v689_v34 = vsel %vm674_vm8, %v668_v29, %v688_v26  ;;  %v926_v35 = vrot.slane %v909_v30, 4  ;;  %v929_v36 = vsel %vm674_vm8, %v909_v30, %v928_v23 }
 0x22e   : > { %v697_v38 = vperm.slane %v689_v34, %v3336_v14  ;;  %v937_v39 = vperm.slane %v929_v36, %v3336_v14 }
 0x22f   : > { %v687_v43 = vsel %vm674_vm8, %v686_v33, %v656_v18  ;;  %v927_v44 = vsel %vm674_vm8, %v926_v35, %v897_v4 }
 0x230   : > { %v693_v45 = vperm.slane %v687_v43, %v3336_v14  ;;  %v710_v46 = vrot.slane %v697_v38, 4  ;;  %v713_v47 = vsel %vm674_vm8, %v697_v38, %v712_v37  ;;  %v933_v48 = vperm.slane %v927_v44, %v3336_v14 }
 0x231   : > { %v721_v50 = vperm.slane %v713_v47, %v3346_v28  ;;  %v950_v51 = vrot.slane %v937_v39, 4  ;;  %v953_v52 = vsel %vm674_vm8, %v937_v39, %v952_v41 }
 0x232   : > { %v698_v53 = vrot.slane %v693_v45, 4  ;;  %v701_v54 = vsel %vm674_vm8, %v693_v45, %v700_v42  ;;  %v711_v55 = vsel %vm674_vm8, %v710_v46, %v685_v22  ;;  %v938_v56 = vrot.slane %v933_v48, 4 }
 0x233   : > { %v709_v57 = vperm.slane %v701_v54, %v3346_v28  ;;  %v717_v58 = vperm.slane %v711_v55, %v3346_v28  ;;  %v728_v59 = vrot.slane %v721_v50, 4  ;;  %v941_v60 = vsel %vm674_vm8, %v933_v48, %v940_v49 }
 0x234   : > { %v699_v61 = vsel %vm674_vm8, %v698_v53, %v681_v25  ;;  %v939_v62 = vsel %vm674_vm8, %v938_v56, %v921_v27  ;;  %v949_v63 = vperm.slane %v941_v60, %v3346_v28  ;;  %v951_v0 = vsel %vm674_vm8, %v950_v51, %v925_v24  ;;  %v658_v4 = vpop.permute.xlu2 %657  ;;  %v664_v5 = vpop.permute.xlu0 %663 }
 0x235   : > { %v3372_v6 = vperm.slane %v699_v61, %v3346_v28  ;;  %v3374_v7 = vrot.slane %v709_v57, 4  ;;  %v726_v8 = vrot.slane %v717_v58, 4  ;;  %v3377_v9 = vsel %vm674_vm8, 0.0, %v728_v59 }
 0x236   : > { %v797_v11 = vsel %vm674_vm8, %v728_v59, %v717_v58  ;;  %v802_v12 = vrot.slane %v3377_v9, 4  ;;  %v945_v13 = vperm.slane %v939_v62, %v3346_v28  ;;  %v957_v15 = vperm.slane %v951_v0, %v3346_v28 }
 0x237   : > { %v722_v16 = vrot.slane %v3372_v6, 4  ;;  %v3386_v17 = vsel %vm674_vm8, 0.0, %v3374_v7  ;;  %v3389_v18 = vsel %vm674_vm8, 0.0, %v726_v8  ;;  %v3392_v19 = vperm.slane %v797_v11, %v3336_v14 }
 0x238   : > { %v791_v20 = vrot.slane %v3386_v17, 4  ;;  %v961_v21 = vperm.slane %v953_v52, %v3346_v28  ;;  %v964_v22 = vrot.slane %v949_v63, 4  ;;  %v966_v23 = vrot.slane %v957_v15, 4 }
 0x239   : > { %v744_v24 = vrot.slane %v658_v4, 4  ;;  %v730_v25 = vrot.slane %v664_v5, 4  ;;  %v733_v26 = vsel %vm674_vm8, %v664_v5, %v732_v31  ;;  %v962_v27 = vrot.slane %v945_v13, 4 }
 0x23a   : > { %v965_v29 = vsel %vm674_vm8, 0.0, %v964_v22  ;;  %v967_v30 = vsel %vm674_vm8, 0.0, %v966_v23  ;;  %v968_v33 = vrot.slane %v961_v21, 4  ;;  %v741_v34 = vperm.slane %v733_v26, %v3336_v14  ;;  %v3400_v35 = vpop.permute.xlu1 %1136 }
 0x23b   : > { %v1031_v36 = vrot.slane %v965_v29, 4  ;;  %v731_v37 = vsel %vm674_vm8, %v730_v25, %v3309_v1  ;;  %v1168_v38 = vrot.slane %v3400_v35, 4  ;;  %v963_v39 = vsel %vm674_vm8, 0.0, %v962_v27 }
 0x23c   : > { %v969_v31 = vsel %vm674_vm8, 0.0, %v968_v33  ;;  %v1037_v41 = vsel %vm674_vm8, %v968_v33, %v957_v15  ;;  %v737_v42 = vperm.slane %v731_v37, %v3336_v14  ;;  %v768_v43 = vrot.slane %v741_v34, 4  ;;  %v670_v44 = vpop.permute.xlu2 %669  ;;  %v1143_v45 = vpop.permute.xlu0 %1142 }
 0x23d   : > { %v1041_v46 = vperm.slane %v1037_v41, %v3336_v14  ;;  %v1042_v47 = vrot.slane %v969_v31, 4  ;;  %v742_v48 = vrot.slane %v670_v44, 4  ;;  %v745_v49 = vsel %vm674_vm8, %v670_v44, %v744_v24 }
 0x23e   : > { %v756_v1 = vrot.slane %v737_v42, 4  ;;  %v753_v50 = vperm.slane %v745_v49, %v3336_v14  ;;  %v1154_v51 = vrot.slane %v1143_v45, 4  ;;  %v1157_v52 = vsel %vm674_vm8, %v1143_v45, %v1156_v40 }
 0x23f   : > { %v743_v53 = vsel %vm674_vm8, %v742_v48, %v658_v4  ;;  %v3417_v54 = vperm.slane %v1157_v52, %v3336_v14  ;;  %v1026_v55 = vsel %vm674_vm8, %v964_v22, %v945_v13  ;;  %v1032_v56 = vsel %vm674_vm8, %v1031_v36, %v963_v39 }
 0x240   : > { %v749_v57 = vperm.slane %v743_v53, %v3336_v14  ;;  %v766_v58 = vrot.slane %v753_v50, 4  ;;  %v769_v59 = vsel %vm674_vm8, %v753_v50, %v768_v43  ;;  %v1155_v60 = vsel %vm674_vm8, %v1154_v51, %v3314_v2 }
 0x241   : > { %v777_v61 = vperm.slane %v769_v59, %v3346_v28  ;;  %v3427_v40 = vperm.slane %v1155_v60, %v3336_v14  ;;  %v1192_v62 = vrot.slane %v3417_v54, 4  ;;  %v1030_v63 = vperm.slane %v1026_v55, %v3336_v14 }
 0x242   : > { %v754_v0 = vrot.slane %v749_v57, 4  ;;  %v757_v4 = vsel %vm674_vm8, %v749_v57, %v756_v1  ;;  %v767_v5 = vsel %vm674_vm8, %v766_v58, %v741_v34  ;;  %v1036_v8 = vperm.slane %v1032_v56, %v3336_v14 }
 0x243   : > { %v765_v11 = vperm.slane %v757_v4, %v3346_v28  ;;  %v773_v2 = vperm.slane %v767_v5, %v3346_v28  ;;  %v784_v13 = vrot.slane %v777_v61, 4  ;;  %v1180_v15 = vrot.slane %v3427_v40, 4 }
 0x244   : > { %v755_v21 = vsel %vm674_vm8, %v754_v0, %v737_v42  ;;  %v1043_v22 = vsel %vm674_vm8, %v1042_v47, %v967_v30  ;;  %v1050_v23 = vrot.slane %v1030_v63, 4  ;;  %v1062_v24 = vrot.slane %v1041_v46, 4  ;;  %v1149_v33 = vpop.permute.xlu2 %1148 }
 0x245   : > { %v3440_v25 = vperm.slane %v755_v21, %v3346_v28  ;;  %v3442_v26 = vrot.slane %v765_v11, 4  ;;  %v782_v27 = vrot.slane %v773_v2, 4  ;;  %v3445_v29 = vsel %vm674_vm8, 0.0, %v784_v13 }
 0x246   : > { %v851_v34 = vsel %vm674_vm8, %v784_v13, %v773_v2  ;;  %v856_v36 = vrot.slane %v3445_v29, 4  ;;  %v1047_v37 = vperm.slane %v1043_v22, %v3336_v14  ;;  %v1051_v30 = vsel %vm674_vm8, %v1036_v8, %v1050_v23 }
 0x247   : > { %v778_v39 = vrot.slane %v3440_v25, 4  ;;  %v3454_v31 = vsel %vm674_vm8, 0.0, %v3442_v26  ;;  %v3457_v41 = vsel %vm674_vm8, 0.0, %v782_v27  ;;  %v3460_v42 = vperm.slane %v851_v34, %v3336_v14 }
 0x248   : > { %v845_v43 = vrot.slane %v3454_v31, 4  ;;  %v1059_v44 = vperm.slane %v1051_v30, %v3346_v28  ;;  %v1063_v45 = vsel %vm674_vm8, %v1047_v37, %v1062_v24  ;;  %v1048_v47 = vrot.slane %v1036_v8, 4 }
 0x249   : > { %v1071_v48 = vperm.slane %v1063_v45, %v3346_v28  ;;  %v1060_v49 = vrot.slane %v1047_v37, 4  ;;  %v1166_v1 = vrot.slane %v1149_v33, 4  ;;  %v1169_v50 = vsel %vm674_vm8, %v1149_v33, %v1168_v38 }
 0x24a   : > { %v1078_v51 = vrot.slane %v1059_v44, 4  ;;  %v1049_v52 = vsel %vm674_vm8, %v1048_v47, %v1030_v63  ;;  %v1177_v53 = vperm.slane %v1169_v50, %v3336_v14  ;;  %v723_v55 = vsel %vm674_vm8, 0.0, %v722_v16 }
 0x24b   : > { %v1076_v56 = vrot.slane %v1071_v48, 4  ;;  %v1055_v57 = vperm.slane %v1049_v52, %v3346_v28  ;;  %v1061_v58 = vsel %vm674_vm8, %v1060_v49, %v1041_v46  ;;  %v1167_v59 = vsel %vm674_vm8, %v1166_v1, %v3400_v35 }
 0x24c   : > { %v1067_v60 = vperm.slane %v1061_v58, %v3346_v28  ;;  %v1079_v38 = vsel %vm674_vm8, %v1071_v48, %v1078_v51  ;;  %v1173_v61 = vperm.slane %v1167_v59, %v3336_v14  ;;  %v1190_v63 = vrot.slane %v1177_v53, 4  ;;  %v905_v17 = vpop.permute.xlu2 %904 }
 0x24d   : > { %v1077_v0 = vsel %vm674_vm8, %v1076_v56, %v1059_v44  ;;  %2740 = vmatpush.xpose.msk.msra.mxu1 %vm1383_vm9, %v1079_v38  ;;  %v1193_v16 = vsel %vm674_vm8, %v1177_v53, %v1192_v62  ;;  %v786_v46 = vsel %vm674_vm8, %v3374_v7, %v3372_v6  ;;  %v792_v35 = vsel %vm674_vm8, %v791_v20, %v723_v55  ;;  %v3496_v7 = vpop.permute.xlu0 %898 }
 0x24e   : > { %2737 = vmatpush.xpose.msk.msra.mxu0 %vm1383_vm9, %v1077_v0  ;;  %v1072_v4 = vrot.slane %v1067_v60, 4  ;;  %v1178_v5 = vrot.slane %v1173_v61, 4  ;;  %v1181_v8 = vsel %vm674_vm8, %v1173_v61, %v1180_v15  ;;  %v1191_v11 = vsel %vm674_vm8, %v1190_v63, %v3417_v54 }
 0x24f   : > { %v1189_v2 = vperm.slane %v1181_v8, %v3346_v28  ;;  %v1197_v62 = vperm.slane %v1191_v11, %v3346_v28  ;;  %v1201_v13 = vperm.slane %v1193_v16, %v3346_v28  ;;  %v790_v6 = vperm.slane %v786_v46, %v3336_v14 }
 0x250   : > { %v1073_v20 = vsel %vm674_vm8, %v1072_v4, %v1055_v57  ;;  %v1179_v21 = vsel %vm674_vm8, %v1178_v5, %v3427_v40  ;;  %v796_v15 = vperm.slane %v792_v35, %v3336_v14  ;;  %v803_v54 = vsel %vm674_vm8, %v802_v12, %v3389_v18 }
 0x251   : > { %2731 = vmatpush.xpose.msk.msra.mxu3 %vm1383_vm9, %v1073_v20  ;;  %v3508_v22 = vperm.slane %v1179_v21, %v3346_v28  ;;  %v3510_v23 = vrot.slane %v1189_v2, 4  ;;  %v1206_v24 = vrot.slane %v1197_v62, 4  ;;  %v1208_v27 = vrot.slane %v1201_v13, 4 }
 0x252   : > { %v807_v33 = vperm.slane %v803_v54, %v3336_v14  ;;  %v810_v34 = vrot.slane %v790_v6, 4  ;;  %v822_v40 = vrot.slane %v3392_v19, 4  ;;  %v984_v37 = vrot.slane %v3496_v7, 4 }
 0x253   : > { %v3517_v9 = vsel %vm674_vm8, 0.0, %v3510_v23  ;;  %v3520_v12 = vsel %vm674_vm8, 0.0, %v1206_v24  ;;  %v3523_v18 = vsel %vm674_vm8, 0.0, %v1208_v27  ;;  %v1277_v30 = vsel %vm674_vm8, %v1208_v27, %v1197_v62 }
 0x254   : > { %v1271_v44 = vrot.slane %v3517_v9, 4  ;;  %v3528_v45 = vperm.slane %v1277_v30, %v3336_v14  ;;  %v1282_v47 = vrot.slane %v3523_v18, 4  ;;  %v811_v48 = vsel %vm674_vm8, %v796_v15, %v810_v34  ;;  %v911_v4 = vpop.permute.xlu2 %910 }
 0x255   : > { %v819_v49 = vperm.slane %v811_v48, %v3346_v28  ;;  %v823_v1 = vsel %vm674_vm8, %v807_v33, %v822_v40  ;;  %v1074_v50 = vrot.slane %v1055_v57, 4  ;;  %v808_v51 = vrot.slane %v796_v15, 4 }
 0x256   : > { %v831_v52 = vperm.slane %v823_v1, %v3346_v28  ;;  %v820_v53 = vrot.slane %v807_v33, 4  ;;  %v970_v55 = vrot.slane %v905_v17, 4  ;;  %v973_v56 = vsel %vm674_vm8, %v905_v17, %v972_v32 }
 0x257   : > { %v838_v58 = vrot.slane %v819_v49, 4  ;;  %v1075_v59 = vsel %vm674_vm8, %v1067_v60, %v1074_v50  ;;  %v809_v38 = vsel %vm674_vm8, %v808_v51, %v790_v6  ;;  %v981_v61 = vperm.slane %v973_v56, %v3336_v14 }
 0x258   : > { %v836_v63 = vrot.slane %v831_v52, 4  ;;  %2734 = vmatpush.xpose.msk.msrb.mxu3 %vm1383_vm9, %v1075_v59  ;;  %v3543_v57 = vperm.slane %v809_v38, %v3346_v28  ;;  %v821_v0 = vsel %vm674_vm8, %v820_v53, %v3392_v19  ;;  %v971_v16 = vsel %vm674_vm8, %v970_v55, %v3321_v3 }
 0x259   : > { %v3550_v32 = vperm.slane %v821_v0, %v3346_v28  ;;  %v3553_v60 = vsel %vm674_vm8, %v831_v52, %v838_v58  ;;  %v977_v46 = vperm.slane %v971_v16, %v3336_v14  ;;  %v1008_v35 = vrot.slane %v981_v61, 4 }
 0x25a   : > { %v3557_v5 = vsel %vm674_vm8, %v836_v63, %v819_v49  ;;  %2741 = vmatmul.msk.f32.vlgmr.msra.gmra.mxu1 %vm1383_vm9, %v3553_v60  ;;  %v779_v3 = vsel %vm674_vm8, 0.0, %v778_v39  ;;  %v840_v19 = vsel %vm674_vm8, %v3442_v26, %v3440_v25  ;;  %v857_v8 = vsel %vm674_vm8, %v856_v36, %v3457_v41 }
 0x25b   : > { %2738 = vmatmul.msk.f32.vlgmr.msra.gmra.mxu0 %vm1383_vm9, %v3557_v5  ;;  %v832_v11 = vrot.slane %v3550_v32, 4  ;;  %v996_v2 = vrot.slane %v977_v46, 4  ;;  %v844_v62 = vperm.slane %v840_v19, %v3336_v14  ;;  %v846_v39 = vsel %vm674_vm8, %v845_v43, %v779_v3 }
 0x25c   : > { %v850_v13 = vperm.slane %v846_v39, %v3336_v14  ;;  %v861_v25 = vperm.slane %v857_v8, %v3336_v14  ;;  %v876_v26 = vrot.slane %v3460_v42, 4  ;;  %v982_v29 = vrot.slane %v911_v4, 4 }
 0x25d   : > { %v3583_v36 = vsel %vm674_vm8, %v832_v11, %v3543_v57  ;;  %v864_v41 = vrot.slane %v844_v62, 4  ;;  %v985_v6 = vsel %vm674_vm8, %v911_v4, %v984_v37  ;;  %v1202_v17 = vrot.slane %v3508_v22, 4 }
 0x25e   : > { %2732 = vmatmul.msk.f32.vlgmr.msra.gmra.mxu3 %vm1383_vm9, %v3583_v36  ;;  %v877_v31 = vsel %vm674_vm8, %v861_v25, %v876_v26  ;;  %v862_v43 = vrot.slane %v850_v13, 4  ;;  %v874_v20 = vrot.slane %v861_v25, 4  ;;  %v983_v21 = vsel %vm674_vm8, %v982_v29, %v3496_v7 }
 0x25f   : > { %v865_v15 = vsel %vm674_vm8, %v850_v13, %v864_v41  ;;  %v885_v54 = vperm.slane %v877_v31, %v3346_v28  ;;  %v989_v24 = vperm.slane %v983_v21, %v3336_v14  ;;  %v993_v27 = vperm.slane %v985_v6, %v3336_v14 }
 0x260   : > { %v873_v33 = vperm.slane %v865_v15, %v3346_v28  ;;  %v863_v34 = vsel %vm674_vm8, %v862_v43, %v844_v62  ;;  %v875_v40 = vsel %vm674_vm8, %v874_v20, %v3460_v42  ;;  %v1203_v37 = vsel %vm674_vm8, 0.0, %v1202_v17 }
 0x261   : > { %v890_v30 = vrot.slane %v885_v54, 4  ;;  %v3602_v7 = vperm.slane %v863_v34, %v3346_v28  ;;  %v3605_v48 = vperm.slane %v875_v40, %v3346_v28  ;;  %v994_v49 = vrot.slane %v989_v24, 4 }
 0x262   : > { %v892_v1 = vrot.slane %v873_v33, 4  ;;  %v997_v50 = vsel %vm674_vm8, %v989_v24, %v996_v2  ;;  %v1006_v51 = vrot.slane %v993_v27, 4  ;;  %v1009_v52 = vsel %vm674_vm8, %v993_v27, %v1008_v35 }
 0x263   : > { %v3610_v53 = vsel %vm674_vm8, %v890_v30, %v873_v33  ;;  %v886_v42 = vrot.slane %v3605_v48, 4  ;;  %v995_v55 = vsel %vm674_vm8, %v994_v49, %v977_v46  ;;  %v1005_v56 = vperm.slane %v997_v50, %v3346_v28 }
 0x264   : > { %2739 = vmatmul.msk.f32.gmra.mxu0 %vm1383_vm9, %v3610_v53  ;;  %v3618_v58 = vsel %vm674_vm8, %v885_v54, %v892_v1  ;;  %v1001_v59 = vperm.slane %v995_v55, %v3346_v28  ;;  %v1007_v38 = vsel %vm674_vm8, %v1006_v51, %v981_v61  ;;  %v1017_v63 = vperm.slane %v1009_v52, %v3346_v28 }
 0x265   : > { %v3625_v0 = vsel %vm674_vm8, %v886_v42, %v3602_v7  ;;  %2742 = vmatmul.msk.f32.gmra.mxu1 %vm1383_vm9, %v3618_v58  ;;  %v1013_v16 = vperm.slane %v1007_v38, %v3346_v28  ;;  %v1020_v46 = vrot.slane %v1005_v56, 4  ;;  %v1266_v35 = vsel %vm674_vm8, %v3510_v23, %v3508_v22 }
 0x266   : > { %2733 = vmatmul.msk.f32.gmra.mxu3 %vm1383_vm9, %v3625_v0  ;;  %v1018_v61 = vrot.slane %v1001_v59, 4  ;;  %v1024_v4 = vrot.slane %v1017_v63, 4  ;;  %v1270_v3 = vperm.slane %v1266_v35, %v3336_v14  ;;  %v1272_v19 = vsel %vm674_vm8, %v1271_v44, %v1203_v37 }
 0x267   : > { %v1021_v8 = vsel %vm674_vm8, 0.0, %v1020_v46  ;;  %v1022_v11 = vrot.slane %v1013_v16, 4  ;;  %v1276_v2 = vperm.slane %v1272_v19, %v3336_v14  ;;  %v1080_v23 = vsel %vm674_vm8, %v1020_v46, %v1001_v59 }
 0x268   : > { %v1019_v62 = vsel %vm674_vm8, 0.0, %v1018_v61  ;;  %v1025_v22 = vsel %vm674_vm8, 0.0, %v1024_v4  ;;  %v1091_v39 = vsel %vm674_vm8, %v1024_v4, %v1013_v16  ;;  %v1283_v44 = vsel %vm674_vm8, %v1282_v47, %v3520_v12 }
 0x269   : > { %v1023_v13 = vsel %vm674_vm8, 0.0, %v1022_v11  ;;  %v1095_v25 = vperm.slane %v1091_v39, %v3336_v14  ;;  %v1096_v9 = vrot.slane %v1025_v22, 4  ;;  %v1287_v26 = vperm.slane %v1283_v44, %v3336_v14 }
 0x26a   : > { %v1288_v29 = vrot.slane %v1276_v2, 4  ;;  %v1290_v41 = vrot.slane %v1270_v3, 4  ;;  %v1302_v6 = vrot.slane %v3528_v45, 4  ;;  %v1085_v17 = vrot.slane %v1021_v8, 4 }
 0x26b   : > { %v1097_v31 = vsel %vm674_vm8, %v1096_v9, %v1023_v13  ;;  %v1116_v43 = vrot.slane %v1095_v25, 4  ;;  %v834_v20 = vrot.slane %v3543_v57, 4  ;;  %v1300_v54 = vrot.slane %v1287_v26, 4 }
 0x26c   : > { %v1101_v21 = vperm.slane %v1097_v31, %v3336_v14  ;;  %v1291_v15 = vsel %vm674_vm8, %v1276_v2, %v1290_v41  ;;  %v1303_v18 = vsel %vm674_vm8, %v1287_v26, %v1302_v6  ;;  %v1289_v27 = vsel %vm674_vm8, %v1288_v29, %v1270_v3 }
 0x26d   : > { %v1299_v12 = vperm.slane %v1291_v15, %v3346_v28  ;;  %v1311_v47 = vperm.slane %v1303_v18, %v3346_v28  ;;  %v3662_v24 = vsel %vm674_vm8, %v3550_v32, %v834_v20  ;;  %v1295_v57 = vperm.slane %v1289_v27, %v3346_v28 }
 0x26e   : > { %2735 = vmatmul.msk.f32.vlgmr.msrb.gmra.mxu3 %vm1383_vm9, %v3662_v24  ;;  %v1301_v33 = vsel %vm674_vm8, %v1300_v54, %v3528_v45  ;;  %v888_v34 = vrot.slane %v3602_v7, 4  ;;  %v1084_v40 = vperm.slane %v1080_v23, %v3336_v14  ;;  %v1086_v32 = vsel %vm674_vm8, %v1085_v17, %v1019_v62 }
 0x26f   : > { %v1316_v37 = vrot.slane %v1311_v47, 4  ;;  %v1318_v30 = vrot.slane %v1299_v12, 4  ;;  %v1307_v49 = vperm.slane %v1301_v33, %v3346_v28  ;;  %v1314_v1 = vrot.slane %v1295_v57, 4 }
 0x270   : > { %v1090_v50 = vperm.slane %v1086_v32, %v3336_v14  ;;  %v1104_v51 = vrot.slane %v1084_v40, 4  ;;  %v1117_v52 = vsel %vm674_vm8, %v1101_v21, %v1116_v43  ;;  %v1114_v63 = vrot.slane %v1101_v21, 4 }
 0x271   : > { %v1317_v42 = vsel %vm674_vm8, %v1316_v37, %v1299_v12  ;;  %v1312_v55 = vrot.slane %v1307_v49, 4  ;;  %v1319_v45 = vsel %vm674_vm8, %v1311_v47, %v1318_v30  ;;  %v1125_v7 = vperm.slane %v1117_v52, %v3346_v28 }
 0x272   : > { %1663 = vmatpush.msrb.mxu0 %v1317_v42  ;;  %1692 = vmatpush.msrb.mxu1 %v1319_v45  ;;  %v1315_v56 = vsel %vm674_vm8, %v1307_v49, %v1314_v1  ;;  %v1105_v59 = vsel %vm674_vm8, %v1090_v50, %v1104_v51  ;;  %v1102_v38 = vrot.slane %v1090_v50, 4  ;;  %v3685_v61 = vsel %vm674_vm8, %v3605_v48, %v888_v34  ;;  %v3718_v42 = vpop.f32.mrf.mxu2 }
 0x273   : > { %v1313_v16 = vsel %vm674_vm8, %v1312_v55, %v1295_v57  ;;  %1634 = vmatpush.msra.mxu3 %v1315_v56  ;;  %v1113_v46 = vperm.slane %v1105_v59, %v3346_v28  ;;  %v1130_v35 = vrot.slane %v1125_v7, 4  ;;  %v1115_v3 = vsel %vm674_vm8, %v1114_v63, %v1095_v25 }
 0x274   : > { %1605 = vmatpush.msra.mxu2 %v1313_v16  ;;  %v1103_v4 = vsel %vm674_vm8, %v1102_v38, %v1084_v40  ;;  %v1121_v11 = vperm.slane %v1115_v3, %v3346_v28  ;;  %v1374_v13 = vlaneseq  ;;  %v3084_v44 = vmov -1e+30  }
 0x275   : > { %v1131_v19 = vsel %vm674_vm8, %v1130_v35, %v1113_v46  ;;  %v1109_v8 = vperm.slane %v1103_v4, %v3346_v28  ;;  %v1132_v2 = vrot.slane %v1113_v46, 4 }
 0x276   : > { %2736 = vmatmul.msk.f32.gmra.mxu3 %vm1383_vm9, %v3685_v61  ;;  %2757 = vmatpush.xpose.msk.msra.mxu0 %vm1383_vm9, %v1131_v19  ;;  %v1126_v62 = vrot.slane %v1121_v11, 4  ;;  %v1375_v25 = vshrl.u32 %v1374_v13, 7  ;;  %v3701_v9 = vand.u32 127, %v1374_v13 }
 0x277   : > { %v1133_v48 = vsel %vm674_vm8, %v1125_v7, %v1132_v2  ;;  %v1128_v22 = vrot.slane %v1109_v8, 4 }
 0x278   : > { %2760 = vmatpush.xpose.msk.msra.mxu1 %vm1383_vm9, %v1133_v48  ;;  %v1127_v23 = vsel %vm674_vm8, %v1126_v62, %v1109_v8  ;;  %vm1379_vm10 = vcmp.le.s32.totalorder %v3701_v9, %v1375_v25  ;;  %v3705_v6 = vadd.s32 8, %v1375_v25 }
 0x279   : > { %v1129_v39 = vsel %vm674_vm8, %v1121_v11, %v1128_v22  ;;  %2751 = vmatpush.xpose.msk.msrb.mxu2 %vm1383_vm9, %v1127_v23  ;;  %v1381_v26 = vsel %vm1379_vm10, 0.0, %v3084_v44 }
 0x27a   : > { %2754 = vmatpush.xpose.msk.msrb.mxu3 %vm1383_vm9, %v1129_v39  ;;  %vm1380_vm11 = vcmp.le.s32.totalorder %v3701_v9, %v3705_v6 }
 0x27b   : > { %v1382_v20 = vsel %vm1380_vm11, 0.0, %v3084_v44 }
 0x2d7   : > { %v1506_v57 = vpop.f32.mrf.mxu1 }
 0x2d8   : > { %v1474_v31 = vpop.f32.mrf.mxu0  ;;  %v1507_v33 = vadd.f32 %v1506_v57, %v1381_v26 }
 0x2d9   : > { %v1475_v43 = vadd.f32 %v1474_v31, %v1381_v26 }
 0x2da   : > { %v1530_v30 = vsel %vm1383_vm9, %v1507_v33, -inf }
 0x2db   : > { %v1524_v54 = vsel %vm1383_vm9, %v1475_v43, -inf }
 0x2e1   : > { %v1410_v29 = vpop.f32.mrf.mxu3  ;;  %v1477_v49 = vpop.f32.mrf.mxu0 }
 0x2e2   : > { %v1411_v41 = vadd.f32 %v1410_v29, %v1381_v26  ;;  %v1509_v32 = vpop.f32.mrf.mxu1  ;;  %v1478_v1 = vadd.f32 %v1477_v49, %v1382_v20 }
 0x2e3   : > { %v1510_v50 = vadd.f32 %v1509_v32, %v1382_v20 }
 0x2e4   : > { %v1512_v17 = vsel %vm1383_vm9, %v1411_v41, -inf  ;;  %v1527_v51 = vsel %vm1383_vm9, %v1478_v1, -inf }
 0x2e5   : > { %1513 = vmax.xlane.f32.xlu1 %v1512_v17  ;;  %v1533_v52 = vsel %vm1383_vm9, %v1510_v50, -inf }
 0x2e9   : > { %v1413_v21 = vpop.f32.mrf.mxu3 }
 0x2ea   : > { %v1414_v15 = vadd.f32 %v1413_v21, %v1382_v20 }
 0x2ec   : > { %v1515_v18 = vsel %vm1383_vm9, %v1414_v15, -inf }
 0x2ed   : > { %1525 = vmax.xlane.f32.xlu1 %v1524_v54  ;;  %1516 = vmax.xlane.f32.xlu2 %v1515_v18 }
 0x2f1   : > { %v1442_v12 = vpop.f32.mrf.mxu3 }
 0x2f2   : > { %v1443_v47 = vadd.f32 %v1442_v12, %v1381_v26 }
 0x2f4   : > { %v1518_v27 = vsel %vm1383_vm9, %v1443_v47, -inf }
 0x2f5   : > { %1519 = vmax.xlane.f32.xlu0 %v1518_v27  ;;  %v1212_v27 = vrot.slane %v3718_v42, 4 }
 0x2f9   : > { %v1445_v34 = vpop.f32.mrf.mxu3 }
 0x2fa   : > { %v1446_v40 = vadd.f32 %v1445_v34, %v1382_v20 }
 0x2fc   : > { %v1521_v37 = vsel %vm1383_vm9, %v1446_v40, -inf }
 0x2fd   : > { %1522 = vmax.xlane.f32.xlu1 %v1521_v37  ;;  %1531 = vmax.xlane.f32.xlu0 %v1530_v30 }
 0x305   : > { %1528 = vmax.xlane.f32.xlu1 %v1527_v51  ;;  %1534 = vmax.xlane.f32.xlu0 %v1533_v52 }
 0x306   : > { %1138 = vrot.lane.b32.xlu2 %v3718_v42, %s3079_s19  ;;  %s3022_s19 = scalar_lea.hbm %s4392_s14, 32 }
 0x319   : > { %1150 = vrot.lane.b32.xlu0 %v3718_v42, %s3080_s15 }
 0x31e   : > { %1144 = vrot.lane.b32.xlu1 %v3718_v42, %s3081_s22  ;;  %s2626_s22 = scalar_lea.hbm %s4392_s14, %s2781_s27 }
 0x358   : > { %v3726_v55 = vpop.xlane.xlu1 %1513 }
 0x359   : > { %v1536_v45 = vsub.f32 %v1411_v41, %v3726_v55 }
 0x35b   : > { %v1544_v7 = vmul.f32 1.442695, %v1536_v45 }
 0x35d   : > { %2872 = vpow2.f32 %v1544_v7 }
 0x360   : > { %v3729_v56 = vpop.xlane.xlu1 %1525  ;;  %v3731_v59 = vpop.xlane.xlu2 %1516 }
 0x361   : > { %v1540_v38 = vsub.f32 %v1475_v43, %v3729_v56  ;;  %v1537_v63 = vsub.f32 %v1414_v15, %v3731_v59 }
 0x363   : > { %v3735_v16 = vpop.eup %2872  ;;  %v1552_v46 = vmul.f32 1.442695, %v1540_v38  ;;  %v1546_v35 = vmul.f32 1.442695, %v1537_v63 }
 0x364   : > { %2743 = vmatmul.msk.f32.vlgmr.msra.gmra.mxu2 %vm1383_vm9, %v3735_v16 }
 0x365   : > { %2874 = vpow2.f32 %v1552_v46 }
 0x366   : > { %2876 = vpow2.f32 %v1546_v35 }
 0x368   : > { %v3739_v4 = vpop.xlane.xlu0 %1519  ;;  %v1139_v15 = vpop.permute.xlu2 %1138 }
 0x369   : > { %v1538_v3 = vsub.f32 %v1443_v47, %v3739_v4  ;;  %v1224_v54 = vrot.slane %v1139_v15, 4 }
 0x36b   : > { %v3742_v19 = vpop.eup %2874  ;;  %v1548_v8 = vmul.f32 1.442695, %v1538_v3 }
 0x36c   : > { %v3744_v11 = vpop.eup %2876  ;;  %2747 = vmatmul.msk.f32.vlgmr.msrb.gmra.mxu0 %vm1383_vm9, %v3742_v19 }
 0x36d   : > { %2878 = vpow2.f32 %v1548_v8  ;;  %2744 = vmatmul.msk.f32.gmra.mxu2 %vm1383_vm9, %v3744_v11 }
 0x370   : > { %v3750_v2 = vpop.xlane.xlu1 %1522  ;;  %v3752_v62 = vpop.xlane.xlu0 %1531 }
 0x371   : > { %v1539_v48 = vsub.f32 %v1446_v40, %v3750_v2  ;;  %v1542_v22 = vsub.f32 %v1507_v33, %v3752_v62 }
 0x373   : > { %v3756_v23 = vpop.eup %2878  ;;  %v1550_v39 = vmul.f32 1.442695, %v1539_v48  ;;  %v1556_v13 = vmul.f32 1.442695, %v1542_v22 }
 0x374   : > { %2745 = vmatmul.msk.f32.vlgmr.msra.gmra.mxu3 %vm1383_vm9, %v3756_v23 }
 0x375   : > { %2880 = vpow2.f32 %v1550_v39  ;;  %2752 = vmatmul.msk.f32.vlgmr.msrb.gmra.mxu2 %vm1383_vm9, %v3583_v36 }
 0x376   : > { %2882 = vpow2.f32 %v1556_v13 }
 0x378   : > { %v3762_v25 = vpop.xlane.xlu1 %1528  ;;  %v3764_v26 = vpop.xlane.xlu0 %1534 }
 0x379   : > { %v1541_v29 = vsub.f32 %v1478_v1, %v3762_v25  ;;  %v1543_v41 = vsub.f32 %v1510_v50, %v3764_v26 }
 0x37b   : > { %v3768_v17 = vpop.eup %2880  ;;  %v1554_v31 = vmul.f32 1.442695, %v1541_v29  ;;  %v1558_v43 = vmul.f32 1.442695, %v1543_v41 }
 0x37c   : > { %v3770_v20 = vpop.eup %2882  ;;  %2746 = vmatmul.msk.f32.gmra.mxu3 %vm1383_vm9, %v3768_v17 }
 0x37d   : > { %2884 = vpow2.f32 %v1554_v31  ;;  %2749 = vmatmul.msk.f32.vlgmr.msrb.gmra.mxu1 %vm1383_vm9, %v3770_v20  ;;  %2753 = vmatmul.msk.f32.gmra.mxu2 %vm1383_vm9, %v3625_v0 }
 0x37e   : > { %2886 = vpow2.f32 %v1558_v43 }
 0x383   : > { %v3778_v36 = vpop.eup %2884 }
 0x384   : > { %v3780_v21 = vpop.eup %2886  ;;  %2748 = vmatmul.msk.f32.gmra.mxu0 %vm1383_vm9, %v3778_v36  ;;  %2755 = vmatmul.msk.f32.vlgmr.msrb.gmra.mxu3 %vm1383_vm9, %v3662_v24 }
 0x385   : > { %2750 = vmatmul.msk.f32.gmra.mxu1 %vm1383_vm9, %v3780_v21 }
 0x38b   : > { %v1151_v18 = vpop.permute.xlu0 %1150 }
 0x38c   : > { %v1222_v12 = vrot.slane %v1151_v18, 4  ;;  %v1225_v0 = vsel %vm674_vm8, %v1151_v18, %v1224_v54  ;;  %2756 = vmatmul.msk.f32.gmra.mxu3 %vm1383_vm9, %v3685_v61  ;;  %2758 = vmatmul.msk.f32.vlgmr.msra.gmra.mxu0 %vm1383_vm9, %v3557_v5 }
 0x38d   : > { %2761 = vmatmul.msk.f32.vlgmr.msra.gmra.mxu1 %vm1383_vm9, %v3553_v60  ;;  %v1233_v47 = vperm.slane %v1225_v0, %v3336_v14 }
 0x38e   : > { %v1223_v24 = vsel %vm674_vm8, %v1222_v12, %v1139_v15 }
 0x38f   : > { %v1229_v57 = vperm.slane %v1223_v24, %v3336_v14  ;;  %v1246_v37 = vrot.slane %v1233_v47, 4 }
 0x390   : > { %v1145_v33 = vpop.permute.xlu1 %1144 }
 0x391   : > { %v1210_v34 = vrot.slane %v1145_v33, 4  ;;  %v1213_v40 = vsel %vm674_vm8, %v1145_v33, %v1212_v27  ;;  %v1234_v30 = vrot.slane %v1229_v57, 4 }
 0x392   : > { %v1221_v61 = vperm.slane %v1213_v40, %v3336_v14 }
 0x393   : > { %v1211_v5 = vsel %vm674_vm8, %v1210_v34, %v3718_v42 }
 0x394   : > { %v1217_v60 = vperm.slane %v1211_v5, %v3336_v14  ;;  %v1247_v49 = vsel %vm674_vm8, %v1246_v37, %v1221_v61  ;;  %v1248_v32 = vrot.slane %v1221_v61, 4  ;;  %2759 = vmatmul.msk.f32.gmra.mxu0 %vm1383_vm9, %v3610_v53 }
 0x395   : > { %v1253_v1 = vperm.slane %v1247_v49, %v3346_v28  ;;  %2762 = vmatmul.msk.f32.gmra.mxu1 %vm1383_vm9, %v3618_v58 }
 0x396   : > { %v1235_v50 = vsel %vm674_vm8, %v1234_v30, %v1217_v60  ;;  %v1236_v51 = vrot.slane %v1217_v60, 4  ;;  %v1249_v52 = vsel %vm674_vm8, %v1233_v47, %v1248_v32 }
 0x397   : > { %v1241_v42 = vperm.slane %v1235_v50, %v3346_v28  ;;  %v1257_v45 = vperm.slane %v1249_v52, %v3346_v28  ;;  %v1262_v63 = vrot.slane %v1253_v1, 4 }
 0x398   : > { %v1237_v7 = vsel %vm674_vm8, %v1229_v57, %v1236_v51 }
 0x399   : > { %v1245_v38 = vperm.slane %v1237_v7, %v3346_v28  ;;  %v1264_v53 = vrot.slane %v1257_v45, 4  ;;  %v1258_v46 = vrot.slane %v1241_v42, 4  ;;  %v1263_v39 = vsel %vm674_vm8, 0.0, %v1262_v63 }
 0x39b   : > { %v1260_v35 = vrot.slane %v1245_v38, 4  ;;  %v1265_v3 = vsel %vm674_vm8, 0.0, %v1264_v53  ;;  %v1331_v58 = vsel %vm674_vm8, %v1264_v53, %v1253_v1  ;;  %v1259_v15 = vsel %vm674_vm8, 0.0, %v1258_v46 }
 0x39c   : > { %v1335_v8 = vperm.slane %v1331_v58, %v3336_v14  ;;  %v1336_v48 = vrot.slane %v1265_v3, 4 }
 0x39d   : > { %v1261_v22 = vsel %vm674_vm8, 0.0, %v1260_v35  ;;  %v1320_v13 = vsel %vm674_vm8, %v1260_v35, %v1241_v42 }
 0x39e   : > { %v1325_v29 = vrot.slane %v1261_v22, 4  ;;  %v1337_v41 = vsel %vm674_vm8, %v1336_v48, %v1263_v39  ;;  %v1324_v31 = vperm.slane %v1320_v13, %v3336_v14  ;;  %v1356_v43 = vrot.slane %v1335_v8, 4 }
 0x39f   : > { %v1341_v54 = vperm.slane %v1337_v41, %v3336_v14  ;;  %v1700_v48 = vadd.s32 8, %v3701_v9 }
 0x3a0   : > { %v1326_v18 = vsel %vm674_vm8, %v1325_v29, %v1259_v15  ;;  %v1344_v12 = vrot.slane %v1324_v31, 4 }
 0x3a1   : > { %v1330_v0 = vperm.slane %v1326_v18, %v3336_v14  ;;  %v1357_v24 = vsel %vm674_vm8, %v1341_v54, %v1356_v43  ;;  %v1354_v47 = vrot.slane %v1341_v54, 4  ;;  %vm1702_vm12 = vcmp.le.s32.totalorder %v1700_v48, %v3705_v6 }
 0x3a2   : > { %v1365_v27 = vperm.slane %v1357_v24, %v3346_v28  ;;  %v1704_v43 = vsel %vm1702_vm12, 0.0, %v3084_v44 }
 0x3a3   : > { %v1345_v57 = vsel %vm674_vm8, %v1330_v0, %v1344_v12  ;;  %v1342_v33 = vrot.slane %v1330_v0, 4  ;;  %v1355_v34 = vsel %vm674_vm8, %v1354_v47, %v1335_v8 }
 0x3a4   : > { %v1353_v40 = vperm.slane %v1345_v57, %v3346_v28  ;;  %v1370_v37 = vrot.slane %v1365_v27, 4  ;;  %v1361_v61 = vperm.slane %v1355_v34, %v3346_v28 }
 0x3a5   : > { %v1343_v5 = vsel %vm674_vm8, %v1342_v33, %v1324_v31 }
 0x3a6   : > { %v1371_v30 = vsel %vm674_vm8, %v1370_v37, %v1353_v40  ;;  %v1349_v60 = vperm.slane %v1343_v5, %v3346_v28  ;;  %v1366_v49 = vrot.slane %v1361_v61, 4  ;;  %v1372_v32 = vrot.slane %v1353_v40, 4 }
 0x3a7   : > { %2016 = vmatpush.msrb.mxu0 %v1371_v30  ;;  %v1572_v37 = vsel %vm1383_vm9, %v3742_v19, 0.0  ;;  %v1578_v5 = vsel %vm1383_vm9, %v3770_v20, 0.0  ;;  %v1563_v30 = vsel %vm1383_vm9, %v3744_v11, 0.0  ;;  %v1575_v19 = vsel %vm1383_vm9, %v3778_v36, 0.0 }
 0x3a8   : > { %v1367_v1 = vsel %vm674_vm8, %v1366_v49, %v1349_v60  ;;  %v1373_v50 = vsel %vm674_vm8, %v1365_v27, %v1372_v32  ;;  %v1368_v51 = vrot.slane %v1349_v60, 4  ;;  %v1566_v60 = vsel %vm1383_vm9, %v3756_v23, 0.0 }
 0x3a9   : > { %1958 = vmatpush.msra.mxu2 %v1367_v1  ;;  %2045 = vmatpush.msrb.mxu1 %v1373_v50 }
 0x3aa   : > { %v1369_v52 = vsel %vm674_vm8, %v1361_v61, %v1368_v51  ;;  %v1560_v61 = vsel %vm1383_vm9, %v3735_v16, 0.0  ;;  %v1581_v16 = vsel %vm1383_vm9, %v3780_v21, 0.0 }
 0x3ab   : > { %1987 = vmatpush.msra.mxu3 %v1369_v52 }
 0x3e7   : > { %v3840_v42 = vpop.f32.mrf.mxu2 }
 0x3e9   : > { %v3846_v63 = vpop.f32.mrf.mxu0 }
 0x3f0   : > { %v3842_v45 = vpop.f32.mrf.mxu2 }
 0x3f7   : > { %v3844_v7 = vpop.f32.mrf.mxu3 }
 0x3f8   : > { %v1725_v38 = vpop.f32.mrf.mxu2 }
 0x3f9   : > { %v1726_v53 = vadd.f32 -1e+30, %v1725_v38 }
 0x3fa   : > { %v3848_v46 = vpop.f32.mrf.mxu1 }
 0x3fb   : > { %v1809_v35 = vsel %vm1383_vm9, %v1726_v53, -inf }
 0x3fc   : > { %1810 = vmax.xlane.f32.xlu2 %v1809_v35 }
 0x3ff   : > { %v3851_v3 = vpop.f32.mrf.mxu3 }
 0x400   : > { %v1728_v15 = vpop.f32.mrf.mxu2 }
 0x401   : > { %v3853_v58 = vpop.f32.mrf.mxu0  ;;  %v1729_v9 = vadd.f32 %v1728_v15, %v1704_v43 }
 0x402   : > { %v3855_v8 = vpop.f32.mrf.mxu1 }
 0x403   : > { %v1812_v27 = vsel %vm1383_vm9, %v1729_v9, -inf }
 0x407   : > { %v1751_v22 = vpop.f32.mrf.mxu3 }
 0x408   : > { %v1752_v39 = vadd.f32 -1e+30, %v1751_v22 }
 0x409   : > { %v1777_v13 = vpop.f32.mrf.mxu0 }
 0x40a   : > { %v1778_v29 = vadd.f32 -1e+30, %v1777_v13  ;;  %v1803_v41 = vpop.f32.mrf.mxu1  ;;  %v1815_v31 = vsel %vm1383_vm9, %v1752_v39, -inf }
 0x40b   : > { %v1804_v54 = vadd.f32 -1e+30, %v1803_v41  ;;  %1816 = vmax.xlane.f32.xlu0 %v1815_v31 }
 0x40c   : > { %v1821_v18 = vsel %vm1383_vm9, %v1778_v29, -inf }
 0x40d   : > { %1822 = vmax.xlane.f32.xlu1 %v1821_v18  ;;  %v1827_v12 = vsel %vm1383_vm9, %v1804_v54, -inf }
 0x40e   : > { %1828 = vmax.xlane.f32.xlu2 %v1827_v12 }
 0x40f   : > { %v1754_v0 = vpop.f32.mrf.mxu3 }
 0x410   : > { %v1755_v6 = vadd.f32 %v1754_v0, %v1704_v43 }
 0x411   : > { %v1780_v24 = vpop.f32.mrf.mxu0 }
 0x412   : > { %v3863_v47 = vadd.f32 %v1780_v24, %v1704_v43  ;;  %v1806_v57 = vpop.f32.mrf.mxu1  ;;  %v1818_v44 = vsel %vm1383_vm9, %v1755_v6, -inf }
 0x413   : > { %1813 = vmax.xlane.f32.xlu0 %v1812_v27  ;;  %v3869_v34 = vadd.f32 %v1806_v57, %v1704_v43 }
 0x414   : > { %v1824_v33 = vsel %vm1383_vm9, %v3863_v47, -inf }
 0x415   : > { %1819 = vmax.xlane.f32.xlu1 %v1818_v44  ;;  %v1830_v40 = vsel %vm1383_vm9, %v3869_v34, -inf }
 0x416   : > { %1825 = vmax.xlane.f32.xlu2 %v1824_v33 }
 0x41b   : > { %1831 = vmax.xlane.f32.xlu0 %v1830_v40 }
 0x41d   : > { %1573 = vadd.xlane.f32.xlu1 %v1572_v37 }
 0x41e   : > { %1561 = vadd.xlane.f32.xlu2 %v1560_v61 }
 0x423   : > { %1579 = vadd.xlane.f32.xlu0 %v1578_v5 }
 0x425   : > { %1564 = vadd.xlane.f32.xlu1 %v1563_v30 }
 0x426   : > { %1567 = vadd.xlane.f32.xlu2 %v1566_v60 }
 0x42b   : > { %1576 = vadd.xlane.f32.xlu0 %v1575_v19 }
 0x42e   : > { %1582 = vadd.xlane.f32.xlu2 %v1581_v16 }
 0x46f   : > { %v1811_v49 = vpop.xlane.xlu2 %1810 }
 0x470   : > { %v3888_v20 = vmax.f32 %v3726_v55, %v1811_v49 }
 0x472   : > { %v1865_v32 = vsub.f32 %v1726_v53, %v3888_v20 }
 0x474   : > { %v1873_v11 = vmul.f32 1.442695, %v1865_v32  ;;  %v1569_v32 = vsel %vm1383_vm9, %v3768_v17, 0.0 }
 0x476   : > { %2888 = vpow2.f32 %v1873_v11 }
 0x47c   : > { %v3891_v1 = vpop.eup %2888 }
 0x47d   : > { %2763 = vmatmul.msk.f32.vlgmr.msra.gmra.mxu2 %vm1383_vm9, %v3891_v1  ;;  %v1897_v11 = vsel %vm1383_vm9, %v3891_v1, 0.0 }
 0x47e   : > { %v1817_v23 = vpop.xlane.xlu0 %1816 }
 0x47f   : > { %v3896_v36 = vmax.f32 %v3739_v4, %v1817_v23 }
 0x480   : > { %v1823_v50 = vpop.xlane.xlu1 %1822 }
 0x481   : > { %v1867_v21 = vsub.f32 %v1752_v39, %v3896_v36  ;;  %v3900_v51 = vmax.f32 %v3729_v56, %v1823_v50  ;;  %v1829_v52 = vpop.xlane.xlu2 %1828 }
 0x482   : > { %v3903_v38 = vmax.f32 %v3752_v62, %v1829_v52 }
 0x483   : > { %v1877_v53 = vmul.f32 1.442695, %v1867_v21  ;;  %v1869_v35 = vsub.f32 %v1778_v29, %v3900_v51  ;;  %v1845_v17 = vsub.f32 %v3729_v56, %v3900_v51  ;;  %v1841_v56 = vsub.f32 %v3726_v55, %v3888_v20 }
 0x484   : > { %v1871_v48 = vsub.f32 %v1804_v54, %v3903_v38 }
 0x485   : > { %v1881_v22 = vmul.f32 1.442695, %v1869_v35  ;;  %2890 = vpow2.f32 %v1877_v53  ;;  %v1843_v53 = vsub.f32 %v3739_v4, %v3896_v36 }
 0x486   : > { %v1885_v13 = vmul.f32 1.442695, %v1871_v48  ;;  %v1814_v41 = vpop.xlane.xlu0 %1813 }
 0x487   : > { %v3908_v31 = vmax.f32 %v3731_v59, %v1814_v41  ;;  %2892 = vpow2.f32 %v1881_v22  ;;  %v1853_v48 = vmul.f32 1.442695, %v1843_v53  ;;  %v1857_v22 = vmul.f32 1.442695, %v1845_v17 }
 0x488   : > { %v1820_v39 = vpop.xlane.xlu1 %1819  ;;  %2894 = vpow2.f32 %v1885_v13  ;;  %v1847_v41 = vsub.f32 %v3752_v62, %v3903_v38 }
 0x489   : > { %v1866_v43 = vsub.f32 %v1729_v9, %v3908_v31  ;;  %v3912_v15 = vmax.f32 %v3750_v2, %v1820_v39  ;;  %v1826_v18 = vpop.xlane.xlu2 %1825  ;;  %v1842_v1 = vsub.f32 %v3731_v59, %v3908_v31 }
 0x48a   : > { %v3915_v29 = vmax.f32 %v3762_v25, %v1826_v18 }
 0x48b   : > { %v1875_v54 = vmul.f32 1.442695, %v1866_v43  ;;  %v1868_v12 = vsub.f32 %v1755_v6, %v3912_v15  ;;  %v2891_v0 = vpop.eup %2890  ;;  %v1851_v18 = vmul.f32 1.442695, %v1842_v1  ;;  %v1844_v55 = vsub.f32 %v3750_v2, %v3912_v15 }
 0x48c   : > { %v1870_v24 = vsub.f32 %v3863_v47, %v3915_v29  ;;  %2765 = vmatmul.msk.f32.vlgmr.msra.gmra.mxu3 %vm1383_vm9, %v2891_v0  ;;  %v1903_v9 = vsel %vm1383_vm9, %v2891_v0, 0.0  ;;  %v1846_v4 = vsub.f32 %v3762_v25, %v3915_v29 }
 0x48d   : > { %v1879_v27 = vmul.f32 1.442695, %v1868_v12  ;;  %v2893_v57 = vpop.eup %2892  ;;  %2896 = vpow2.f32 %v1875_v54  ;;  %1904 = vadd.xlane.f32.xlu2 %v1903_v9  ;;  %v1861_v54 = vmul.f32 1.442695, %v1847_v41 }
 0x48e   : > { %v1883_v44 = vmul.f32 1.442695, %v1870_v24  ;;  %v1832_v33 = vpop.xlane.xlu0 %1831  ;;  %2767 = vmatmul.msk.f32.vlgmr.msrb.gmra.mxu0 %vm1383_vm9, %v2893_v57  ;;  %v1909_v6 = vsel %vm1383_vm9, %v2893_v57, 0.0  ;;  %v2895_v37 = vpop.eup %2894  ;;  %v1859_v59 = vmul.f32 1.442695, %v1846_v4 }
 0x48f   : > { %v3924_v40 = vmax.f32 %v3764_v26, %v1832_v33  ;;  %2898 = vpow2.f32 %v1879_v27  ;;  %1910 = vadd.xlane.f32.xlu1 %v1909_v6  ;;  %2769 = vmatmul.msk.f32.vlgmr.msrb.gmra.mxu1 %vm1383_vm9, %v2895_v37  ;;  %v1915_v19 = vsel %vm1383_vm9, %v2895_v37, 0.0  ;;  %v1849_v27 = vmul.f32 1.442695, %v1841_v56 }
 0x490   : > { %2900 = vpow2.f32 %v1883_v44  ;;  %v1574_v35 = vpop.xlane.xlu1 %1573  ;;  %v1855_v44 = vmul.f32 1.442695, %v1844_v55 }
 0x491   : > { %v1872_v47 = vsub.f32 %v3869_v34, %v3924_v40  ;;  %v3943_v21 = vpop.xlane.xlu2 %1561  ;;  %v1848_v31 = vsub.f32 %v3764_v26, %v3924_v40 }
 0x493   : > { %v1887_v61 = vmul.f32 1.442695, %v1872_v47  ;;  %v2897_v5 = vpop.eup %2896  ;;  %v1863_v20 = vmul.f32 1.442695, %v1848_v31 }
 0x494   : > { %2764 = vmatmul.msk.f32.gmra.mxu2 %vm1383_vm9, %v2897_v5  ;;  %v1900_v30 = vsel %vm1383_vm9, %v2897_v5, 0.0 }
 0x495   : > { %v2899_v60 = vpop.eup %2898  ;;  %2902 = vpow2.f32 %v1887_v61  ;;  %1901 = vadd.xlane.f32.xlu2 %v1900_v30 }
 0x496   : > { %2766 = vmatmul.msk.f32.gmra.mxu3 %vm1383_vm9, %v2899_v60  ;;  %v2901_v16 = vpop.eup %2900  ;;  %v1906_v23 = vsel %vm1383_vm9, %v2899_v60, 0.0  ;;  %2904 = vpow2.f32 %v1853_v48  ;;  %v1580_v39 = vpop.xlane.xlu0 %1579 }
 0x497   : > { %1916 = vadd.xlane.f32.xlu1 %v1915_v19  ;;  %2768 = vmatmul.msk.f32.gmra.mxu0 %vm1383_vm9, %v2901_v16  ;;  %v1912_v34 = vsel %vm1383_vm9, %v2901_v16, 0.0  ;;  %2906 = vpow2.f32 %v1857_v22 }
 0x498   : > { %1913 = vadd.xlane.f32.xlu0 %v1912_v34  ;;  %v1565_v43 = vpop.xlane.xlu1 %1564  ;;  %2908 = vpow2.f32 %v1851_v18 }
 0x499   : > { %v1568_v52 = vpop.xlane.xlu2 %1567  ;;  %2910 = vpow2.f32 %v1861_v54 }
 0x49b   : > { %v2903_v49 = vpop.eup %2902 }
 0x49c   : > { %2770 = vmatmul.msk.f32.gmra.mxu1 %vm1383_vm9, %v2903_v49  ;;  %v1918_v50 = vsel %vm1383_vm9, %v2903_v49, 0.0  ;;  %v2905_v36 = vpop.eup %2904 }
 0x49d   : > { %v1891_v51 = vmul.f32 %v2905_v36, %v1568_v52  ;;  %v2907_v12 = vpop.eup %2906  ;;  %v3974_v61 = vmul.f32 %v2905_v36, %v3844_v7 }
 0x49e   : > { %v1893_v62 = vmul.f32 %v2907_v12, %v1574_v35  ;;  %v1577_v29 = vpop.xlane.xlu0 %1576  ;;  %v2909_v26 = vpop.eup %2908  ;;  %v1933_v19 = vmul.f32 %v2907_v12, %v3846_v63 }
 0x49f   : > { %1570 = vadd.xlane.f32.xlu1 %v1569_v32  ;;  %v1890_v9 = vmul.f32 %v2909_v26, %v1565_v43  ;;  %v2911_v57 = vpop.eup %2910 }
 0x4a0   : > { %1898 = vadd.xlane.f32.xlu0 %v1897_v11  ;;  %v1895_v6 = vmul.f32 %v2911_v57, %v1580_v39  ;;  %v1935_v32 = vmul.f32 %v2911_v57, %v3848_v46  ;;  %v3999_v46 = vmul.f32 %v2909_v26, %v3842_v45 }
 0x4a1   : > { %v1583_v13 = vpop.xlane.xlu2 %1582 }
 0x4a7   : > { %1907 = vadd.xlane.f32.xlu1 %v1906_v23 }
 0x4a8   : > { %1919 = vadd.xlane.f32.xlu0 %v1918_v50 }
 0x500   : > { %v1905_v0 = vpop.xlane.xlu2 %1904 }
 0x501   : > { %v3959_v38 = vadd.f32 %v1905_v0, %v1891_v51 }
 0x502   : > { %v1911_v24 = vpop.xlane.xlu1 %1910 }
 0x503   : > { %2912 = vrcp.f32 %v3959_v38  ;;  %v3962_v25 = vadd.f32 %v1911_v24, %v1893_v62  ;;  %v2098_v23 = vand.u32 2147483647, %v3959_v38  ;;  %v2100_v50 = vand.u32 2147483648, %v3959_v38  ;;  %v4041_v24 = vpop.f32.mrf.mxu2 }
 0x504   : > { %2914 = vpow2.f32 %v1859_v59  ;;  %vm2094_vm13 = vweird.f32 %v3959_v38 }
 0x505   : > { %2916 = vrcp.f32 %v3962_v25  ;;  %v2128_v53 = vand.u32 2147483648, %v3962_v25  ;;  %vm2122_vm15 = vweird.f32 %v3962_v25  ;;  %vm4016_vm1 = vcmp.eq.f32.partialorder %v2098_v23, 8.507059e+37 }
 0x506   : > { %2918 = vpow2.f32 %v1849_v27 }
 0x507   : > { %2920 = vpow2.f32 %v1863_v20  ;;  %v4024_v36 = vor.u32 1.1754944e-38, %v2128_v53 }
 0x508   : > { %v1902_v33 = vpop.xlane.xlu2 %1901 }
 0x509   : > { %v3967_v40 = vpop.eup %2912  ;;  %v3969_v37 = vadd.f32 %v1902_v33, %v1890_v9 }
 0x50a   : > { %v2915_v47 = vpop.eup %2914  ;;  %v2090_v2 = vmul.f32 %v3967_v40, %v3959_v38  ;;  %v1917_v15 = vpop.xlane.xlu1 %1916  ;;  %vm2095_vm14 = vweird.f32 %v3967_v40 }
 0x50b   : > { %v3976_v5 = vpop.eup %2916  ;;  %v1894_v30 = vmul.f32 %v2915_v47, %v1577_v29  ;;  %2922 = vrcp.f32 %v3969_v37  ;;  %v3979_v60 = vadd.f32 %v1917_v15, %v1895_v6  ;;  %v1914_v49 = vpop.xlane.xlu0 %1913  ;;  %v4007_v48 = vmul.f32 %v2915_v47, %v3853_v58  ;;  %vm4036_vm4 = vmor %vm2094_vm13, %vm2095_vm14 }
 0x50c   : > { %2924 = vpow2.f32 %v1855_v44  ;;  %v2091_v16 = vsub.f32 1.0, %v2090_v2  ;;  %v2118_v34 = vmul.f32 %v3976_v5, %v3962_v25  ;;  %v3985_v11 = vpop.eup %2918  ;;  %v2018_v1 = vpop.f32.mrf.mxu0  ;;  %v2101_v58 = vor.u32 1.1754944e-38, %v2100_v50 }
 0x50d   : > { %2926 = vrcp.f32 %v3979_v60  ;;  %v3988_v7 = vadd.f32 %v1914_v49, %v1894_v30  ;;  %v3992_v52 = vpop.eup %2920  ;;  %v1889_v63 = vmul.f32 %v3985_v11, %v3943_v21  ;;  %v2047_v21 = vpop.f32.mrf.mxu1  ;;  %v2154_v41 = vand.u32 2147483647, %v3979_v60 }
 0x50e   : > { %v2092_v35 = vmul.f32 %v3967_v40, %v2091_v16  ;;  %v4002_v17 = vmul.f32 %v3992_v52, %v1583_v13  ;;  %v2119_v22 = vsub.f32 1.0, %v2118_v34  ;;  %v2126_v13 = vand.u32 2147483647, %v3962_v25 }
 0x50f   : > { %2928 = vrcp.f32 %v3988_v7  ;;  %v2156_v54 = vand.u32 2147483648, %v3979_v60  ;;  %v2084_v51 = vand.u32 2147483647, %v3969_v37  ;;  %v4028_v59 = vadd.f32 %v2018_v1, %v1933_v19  ;;  %v1989_v0 = vpop.f32.mrf.mxu3 }
 0x510   : > { %v2093_v39 = vadd.f32 %v3967_v40, %v2092_v35  ;;  %vm2123_vm2 = vweird.f32 %v3976_v5  ;;  %v2059_v31 = vadd.f32 %v2047_v21, %v1935_v32  ;;  %vm2150_vm3 = vweird.f32 %v3979_v60 }
 0x511   : > { %v4012_v45 = vpop.eup %2922  ;;  %vm2080_vm5 = vweird.f32 %v3969_v37  ;;  %v2120_v55 = vmul.f32 %v3976_v5, %v2119_v22  ;;  %vm4045_vm6 = vcmp.eq.f32.partialorder %v2154_v41, 8.507059e+37  ;;  %vm2136_vm7 = vweird.f32 %v3988_v7  ;;  %vm4079_vm14 = vmor %vm2122_vm15, %vm2123_vm2 }
 0x512   : > { %v4020_v18 = vpop.eup %2924  ;;  %v2076_v4 = vmul.f32 %v4012_v45, %v3969_v37  ;;  %v1571_v56 = vpop.xlane.xlu1 %1570  ;;  %v2097_v38 = vsel %vm4036_vm4, %v3967_v40, %v2093_v39  ;;  %v2140_v44 = vand.u32 2147483647, %v3988_v7  ;;  %vm4057_vm10 = vcmp.eq.f32.partialorder %v2126_v13, 8.507059e+37 }
 0x513   : > { %v2927_v12 = vpop.eup %2926  ;;  %v1899_v29 = vpop.xlane.xlu0 %1898  ;;  %v2157_v2 = vor.u32 1.1754944e-38, %v2156_v54  ;;  %v2055_v15 = vadd.f32 %v1989_v0, %v3974_v61  ;;  %v2102_v40 = vsel %vm4016_vm1, %v2101_v58, %v2097_v38  ;;  %v2142_v30 = vand.u32 2147483648, %v3988_v7 }
 0x514   : > { %v2146_v27 = vmul.f32 %v2927_v12, %v3979_v60  ;;  %v2077_v9 = vsub.f32 1.0, %v2076_v4  ;;  %v4052_v57 = vadd.f32 %v1899_v29, %v1889_v63  ;;  %v2086_v19 = vand.u32 2147483648, %v3969_v37  ;;  %v2021_v35 = vpop.f32.mrf.mxu0 }
 0x515   : > { %v2929_v26 = vpop.eup %2928  ;;  %v2121_v34 = vadd.f32 %v3976_v5, %v2120_v55  ;;  %vm2151_vm11 = vweird.f32 %v2927_v12  ;;  %v1892_v32 = vmul.f32 %v4020_v18, %v1571_v56  ;;  %vm4069_vm12 = vcmp.eq.f32.partialorder %v2140_v44, 8.507059e+37 }
 0x516   : > { %v2147_v33 = vsub.f32 1.0, %v2146_v27  ;;  %v2132_v6 = vmul.f32 %v2929_v26, %v3988_v7  ;;  %2930 = vrcp.f32 %v4052_v57  ;;  %v2078_v61 = vmul.f32 %v4012_v45, %v2077_v9  ;;  %vm2152_vm4 = vmor %vm2150_vm3, %vm2151_vm11 }
 0x517   : > { %vm2081_vm13 = vweird.f32 %v4012_v45  ;;  %v2175_v53 = vmul.f32 %v2102_v40, %v2055_v15  ;;  %vm2137_vm1 = vweird.f32 %v2929_v26  ;;  %v2143_v21 = vor.u32 1.1754944e-38, %v2142_v30  ;;  %v1963_v4 = vpop.f32.mrf.mxu2 }
 0x518   : > { %v2133_v16 = vsub.f32 1.0, %v2132_v6  ;;  %v2148_v49 = vmul.f32 %v2927_v12, %v2147_v33  ;;  %v2079_v41 = vadd.f32 %v4012_v45, %v2078_v61  ;;  %vm4086_vm0 = vcmp.eq.f32.partialorder %v2084_v51, 8.507059e+37  ;;  %vm4099_vm15 = vmor %vm2080_vm5, %vm2081_vm13 }
 0x519   : > { %v2125_v13 = vsel %vm4079_vm14, %v3976_v5, %v2121_v34  ;;  %v2087_v54 = vor.u32 1.1754944e-38, %v2086_v19  ;;  %v2058_v0 = vadd.f32 %v2021_v35, %v4007_v48  ;;  %vm2138_vm2 = vmor %vm2136_vm7, %vm2137_vm1  ;;  %v2054_v7 = vadd.f32 %v1963_v4, %v3999_v46 }
 0x51a   : > { %v2149_v63 = vadd.f32 %v2927_v12, %v2148_v49  ;;  %v2134_v22 = vmul.f32 %v2929_v26, %v2133_v16  ;;  %v1908_v1 = vpop.xlane.xlu1 %1907  ;;  %v2083_v5 = vsel %vm4099_vm15, %v4012_v45, %v2079_v41  ;;  %v2130_v55 = vsel %vm4057_vm10, %v4024_v36, %v2125_v13 }
 0x51b   : > { %v4090_v25 = vadd.f32 %v1908_v1, %v1892_v32  ;;  %v2088_v20 = vsel %vm4086_vm0, %v2087_v54, %v2083_v5  ;;  %v1920_v45 = vpop.xlane.xlu0 %1919  ;;  %v2072_v44 = vand.u32 2147483648, %v4052_v57  ;;  %v1929_v15 = vmul.f32 %v3985_v11, %v3840_v42  ;;  %v2050_v5 = vpop.f32.mrf.mxu1 }
 0x51c   : > { %v2153_v43 = vsel %vm2152_vm4, %v2927_v12, %v2149_v63  ;;  %v2135_v58 = vadd.f32 %v2929_v26, %v2134_v22  ;;  %v2931_v56 = vpop.eup %2930  ;;  %v2195_v12 = vrot.slane %v2175_v53, 4  ;;  %v2174_v36 = vmul.f32 %v2088_v20, %v2054_v7 }
 0x51d   : > { %v2158_v51 = vsel %vm4045_vm6, %v2157_v2, %v2153_v43  ;;  %2932 = vrcp.f32 %v4090_v25  ;;  %v2062_v62 = vmul.f32 %v2931_v56, %v4052_v57  ;;  %vm2067_vm3 = vweird.f32 %v2931_v56 }
 0x51e   : > { %v2179_v37 = vmul.f32 %v2158_v51, %v2059_v31  ;;  %v2139_v27 = vsel %vm2138_vm2, %v2929_v26, %v2135_v58  ;;  %v2070_v26 = vand.u32 2147483647, %v4052_v57  ;;  %v4127_v46 = vadd.f32 %v1920_v45, %v4002_v17 }
 0x51f   : > { %v2144_v48 = vsel %vm4069_vm12, %v2143_v21, %v2139_v27  ;;  %v2063_v29 = vsub.f32 1.0, %v2062_v62  ;;  %v2177_v40 = vmul.f32 %v2130_v55, %v4028_v59  ;;  %v2239_v30 = vrot.slane %v2174_v36, 4  ;;  %v1992_v59 = vpop.f32.mrf.mxu3 }
 0x520   : > { %v2193_v38 = vrot.slane %v2179_v37, 4  ;;  %v2196_v31 = vsel %vm674_vm8, %v2179_v37, %v2195_v12  ;;  %v2178_v9 = vmul.f32 %v2144_v48, %v2058_v0  ;;  %v1932_v19 = vmul.f32 %v4020_v18, %v3851_v3 }
 0x521   : > { %v2064_v6 = vmul.f32 %v2931_v56, %v2063_v29  ;;  %vm2066_vm0 = vweird.f32 %v4052_v57  ;;  %v2053_v17 = vadd.f32 %v4041_v24, %v1929_v15  ;;  %v2073_v32 = vor.u32 1.1754944e-38, %v2072_v44 }
 0x522   : > { %v2194_v33 = vsel %vm674_vm8, %v2193_v38, %v2175_v53  ;;  %v2237_v47 = vrot.slane %v2178_v9, 4  ;;  %vm2068_vm5 = vmor %vm2066_vm0, %vm2067_vm3  ;;  %v2240_v42 = vsel %vm674_vm8, %v2178_v9, %v2239_v30  ;;  %2934 = vrcp.f32 %v4127_v46 }
 0x523   : > { %v2933_v2 = vpop.eup %2932  ;;  %v2065_v16 = vadd.f32 %v2931_v56, %v2064_v6  ;;  %vm2071_vm6 = vcmp.eq.f32.partialorder %v2070_v26, 8.507059e+37  ;;  %v2112_v18 = vand.u32 2147483647, %v4090_v25  ;;  %v2200_v57 = vperm.slane %v2194_v33, %v3336_v14 }
 0x524   : > { %v2238_v34 = vsel %vm674_vm8, %v2237_v47, %v2174_v36  ;;  %v2104_v49 = vmul.f32 %v2933_v2, %v4090_v25  ;;  %v2204_v23 = vperm.slane %v2196_v31, %v3336_v14  ;;  %v2114_v24 = vand.u32 2147483648, %v4090_v25 }
 0x525   : > { %v2069_v11 = vsel %vm2068_vm5, %v2931_v56, %v2065_v16  ;;  %v2181_v50 = vrot.slane %v2177_v40, 4  ;;  %vm2109_vm7 = vweird.f32 %v2933_v2  ;;  %v2056_v35 = vadd.f32 %v1992_v59, %v1932_v19 }
 0x526   : > { %v2105_v3 = vsub.f32 1.0, %v2104_v49  ;;  %v2074_v61 = vsel %vm2071_vm6, %v2073_v32, %v2069_v11  ;;  %v1936_v22 = vmul.f32 %v3992_v52, %v3855_v8  ;;  %vm2108_vm10 = vweird.f32 %v4090_v25 }
 0x527   : > { %v2173_v63 = vmul.f32 %v2074_v61, %v2053_v17  ;;  %vm2113_vm11 = vcmp.eq.f32.partialorder %v2112_v18, 8.507059e+37  ;;  %v2205_v13 = vrot.slane %v2200_v57, 4  ;;  %v2217_v43 = vrot.slane %v2204_v23, 4  ;;  %vm2110_vm12 = vmor %vm2108_vm10, %vm2109_vm7 }
 0x528   : > { %v2106_v53 = vmul.f32 %v2933_v2, %v2105_v3  ;;  %v2935_v39 = vpop.eup %2934  ;;  %v2115_v4 = vor.u32 1.1754944e-38, %v2114_v24  ;;  %v4152_v54 = vperm.slane %v2238_v34, %v3336_v14  ;;  %v2168_v12 = vand.u32 2147483647, %v4127_v46 }
 0x529   : > { %v2182_v1 = vsel %vm674_vm8, %v2181_v50, %v2173_v63  ;;  %v2183_v21 = vrot.slane %v2173_v63, 4  ;;  %v2160_v52 = vmul.f32 %v2935_v39, %v4127_v46  ;;  %v2170_v62 = vand.u32 2147483648, %v4127_v46 }
 0x52a   : > { %v2107_v41 = vadd.f32 %v2933_v2, %v2106_v53  ;;  %v2188_v58 = vperm.slane %v2182_v1, %v3336_v14  ;;  %vm2165_vm13 = vweird.f32 %v2935_v39  ;;  %v2248_v29 = vperm.slane %v2240_v42, %v3336_v14 }
 0x52b   : > { %v2184_v60 = vsel %vm674_vm8, %v2177_v40, %v2183_v21  ;;  %v2161_v37 = vsub.f32 1.0, %v2160_v52  ;;  %v2060_v9 = vadd.f32 %v2050_v5, %v1936_v22  ;;  %vm2164_vm14 = vweird.f32 %v4127_v46 }
 0x52c   : > { %v2111_v8 = vsel %vm2110_vm12, %v2933_v2, %v2107_v41  ;;  %v2192_v25 = vperm.slane %v2184_v60, %v3336_v14  ;;  %v2207_v56 = vrot.slane %v2188_v58, 4  ;;  %v2206_v0 = vsel %vm674_vm8, %v2205_v13, %v2188_v58  ;;  %vm2166_vm1 = vmor %vm2164_vm14, %vm2165_vm13 }
 0x52d   : > { %v2116_v51 = vsel %vm2113_vm11, %v2115_v4, %v2111_v8  ;;  %v2212_v27 = vperm.slane %v2206_v0, %v3346_v28  ;;  %v2162_v45 = vmul.f32 %v2935_v39, %v2161_v37  ;;  %v2263_v47 = vrot.slane %v4152_v54, 4 }
 0x52e   : > { %v2208_v55 = vsel %vm674_vm8, %v2200_v57, %v2207_v56  ;;  %v2218_v48 = vsel %vm674_vm8, %v2217_v43, %v2192_v25  ;;  %v2219_v7 = vrot.slane %v2192_v25, 4  ;;  %v2176_v20 = vmul.f32 %v2116_v51, %v2056_v35 }
 0x52f   : > { %v2216_v38 = vperm.slane %v2208_v55, %v3346_v28  ;;  %v2224_v31 = vperm.slane %v2218_v48, %v3346_v28  ;;  %v2229_v44 = vrot.slane %v2212_v27, 4  ;;  %v2163_v36 = vadd.f32 %v2935_v39, %v2162_v45 }
 0x530   : > { %v2220_v26 = vsel %vm674_vm8, %v2204_v23, %v2219_v7  ;;  %vm2169_vm4 = vcmp.eq.f32.partialorder %v2168_v12, 8.507059e+37  ;;  %v2171_v2 = vor.u32 1.1754944e-38, %v2170_v62  ;;  %v2251_v40 = vrot.slane %v2176_v20, 4 }
 0x531   : > { %v2228_v33 = vperm.slane %v2220_v26, %v3346_v28  ;;  %v2231_v6 = vrot.slane %v2216_v38, 4  ;;  %v2233_v15 = vrot.slane %v2224_v31, 4  ;;  %v2167_v30 = vsel %vm2166_vm1, %v2935_v39, %v2163_v36 }
 0x532   : > { %v2172_v34 = vsel %vm2169_vm4, %v2171_v2, %v2167_v30  ;;  %v2230_v49 = vsel %vm674_vm8, 0.0, %v2229_v44  ;;  %v2275_v53 = vrot.slane %v2248_v29, 4  ;;  %vm2430_vm15 = vcmask 195584  }
 0x533   : > { %v2232_v19 = vsel %vm674_vm8, 0.0, %v2231_v6  ;;  %v2235_v16 = vrot.slane %v2228_v33, 4  ;;  %v2293_v46 = vsel %vm674_vm8, %v2231_v6, %v2212_v27  ;;  %v2180_v32 = vmul.f32 %v2172_v34, %v2060_v9 }
 0x534   : > { %v2298_v17 = vrot.slane %v2232_v19, 4  ;;  %v2297_v11 = vperm.slane %v2293_v46, %v3336_v14  ;;  %v2234_v3 = vsel %vm674_vm8, 0.0, %v2233_v15  ;;  %vm4424_vm2 = vcmask 261120  }
 0x535   : > { %v2236_v42 = vsel %vm674_vm8, 0.0, %v2235_v16  ;;  %v2304_v59 = vsel %vm674_vm8, %v2235_v16, %v2224_v31  ;;  %v2249_v61 = vrot.slane %v2180_v32, 4  ;;  %v2252_v24 = vsel %vm674_vm8, %v2180_v32, %v2251_v40  ;;  %vm4425_vm3 = vmmov %vm4424_vm2 }
 0x536   : > { %v2299_v18 = vsel %vm674_vm8, %v2298_v17, %v2230_v49  ;;  %v2308_v57 = vperm.slane %v2304_v59, %v3336_v14  ;;  %v2309_v23 = vrot.slane %v2236_v42, 4  ;;  %v2317_v63 = vrot.slane %v2297_v11, 4  ;;  %vm4426_vm0 = vmmov %vm4424_vm2 }
 0x537   : > { %v2303_v50 = vperm.slane %v2299_v18, %v3336_v14  ;;  %v2260_v35 = vperm.slane %v2252_v24, %v3336_v14  ;;  %v2250_v21 = vsel %vm674_vm8, %v2249_v61, %v2176_v20  ;;  %vm4428_vm5 = vmmov %vm4426_vm0 }
 0x538   : > { %v2310_v22 = vsel %vm674_vm8, %v2309_v23, %v2234_v3  ;;  %v2329_v1 = vrot.slane %v2308_v57, 4  ;;  %v2256_v43 = vperm.slane %v2250_v21, %v3336_v14  ;;  %vm4429_vm6 = vmmov %vm4426_vm0 }
 0x539   : > { %v2314_v41 = vperm.slane %v2310_v22, %v3336_v14  ;;  %v2318_v39 = vsel %vm674_vm8, %v2303_v50, %v2317_v63  ;;  %v2315_v13 = vrot.slane %v2303_v50, 4  ;;  %v2273_v58 = vrot.slane %v2260_v35, 4  ;;  %vm4430_vm12 = vmmov %vm4426_vm0 }
 0x53a   : > { %v2326_v4 = vperm.slane %v2318_v39, %v3346_v28  ;;  %v2276_v60 = vsel %vm674_vm8, %v2260_v35, %v2275_v53  ;;  %v2261_v51 = vrot.slane %v2256_v43, 4  ;;  %v2264_v62 = vsel %vm674_vm8, %v2256_v43, %v2263_v47  ;;  %vm4431_vm4 = vmmov %vm4426_vm0 }
 0x53b   : > { %v2330_v8 = vsel %vm674_vm8, %v2314_v41, %v2329_v1  ;;  %v2316_v52 = vsel %vm674_vm8, %v2315_v13, %v2297_v11  ;;  %v2327_v25 = vrot.slane %v2314_v41, 4  ;;  %v2284_v56 = vperm.slane %v2276_v60, %v3346_v28  ;;  %v2436_v60 = vld [vmem:[%s4384_s6 + $0x18] sm:$0xff] }
 0x53c   : > { %v2338_v0 = vperm.slane %v2330_v8, %v3346_v28  ;;  %v2345_v5 = vrot.slane %v2326_v4, 4  ;;  %v2322_v37 = vperm.slane %v2316_v52, %v3346_v28  ;;  %v2274_v27 = vsel %vm674_vm8, %v2273_v58, %v2248_v29  ;;  %2459 = vmatpush.msrb.mxu2 %v2436_v60  ;;  %v2434_v8 = vld [vmem:[%s4384_s6 + $0x8] sm:$0xff]  ;;  %v2433_v52 = vld [vmem:[%s4384_s6] sm:$0xff] }
 0x53d   : > { %v2328_v12 = vsel %vm674_vm8, %v2327_v25, %v2308_v57  ;;  %v2291_v55 = vrot.slane %v2284_v56, 4  ;;  %v2262_v38 = vsel %vm674_vm8, %v2261_v51, %v4152_v54  ;;  %v2272_v31 = vperm.slane %v2264_v62, %v3346_v28 }
 0x53e   : > { %v2346_v48 = vsel %vm674_vm8, %v2338_v0, %v2345_v5  ;;  %v2343_v7 = vrot.slane %v2338_v0, 4  ;;  %v2334_v20 = vperm.slane %v2328_v12, %v3346_v28  ;;  %v2341_v45 = vrot.slane %v2322_v37, 4 }
 0x53f   : > { %2419 = vrot.lane.b32.xlu1 %v2346_v48, %s3085_s24  ;;  %v2280_v9 = vperm.slane %v2274_v27, %v3346_v28  ;;  %v2292_v26 = vsel %vm674_vm8, 0.0, %v2291_v55  ;;  %v2268_v33 = vperm.slane %v2262_v38, %v3346_v28  ;;  %v2287_v54 = vrot.slane %v2272_v31, 4  ;;  %v2940_v31 = vld [vmem:[%s3242_s25] sm:$0xff] }
 0x540   : > { %v2344_v29 = vsel %vm674_vm8, %v2343_v7, %v2326_v4  ;;  %v2339_v44 = vrot.slane %v2334_v20, 4  ;;  %v2342_v36 = vsel %vm674_vm8, %v2334_v20, %v2341_v45  ;;  %v2363_v2 = vrot.slane %v2292_v26, 4  ;;  %v2861_v20 = vld [vmem:[%s4385_s7] ss:$0 sm:$0xff] }
 0x541   : > { %2411 = vrot.lane.b32.xlu0 %v2344_v29, %s3086_s28  ;;  %2403 = vrot.lane.b32.xlu2 %v2342_v36, %s4398_s18  ;;  %v2289_v6 = vrot.slane %v2280_v9, 4  ;;  %v2358_v47 = vsel %vm674_vm8, %v2291_v55, %v2280_v9  ;;  %v2285_v15 = vrot.slane %v2268_v33, 4  ;;  %v2288_v19 = vsel %vm674_vm8, 0.0, %v2287_v54  ;;  %v2941_v36 = vld [vmem:[%s3242_s25 + $0x8] sm:$0xff] }
 0x542   : > { %v2362_v40 = vperm.slane %v2358_v47, %v3336_v14  ;;  %v2340_v30 = vsel %vm674_vm8, %v2339_v44, %v2322_v37  ;;  %v2347_v34 = vsel %vm674_vm8, %v2287_v54, %v2268_v33  ;;  %v2352_v17 = vrot.slane %v2288_v19, 4 }
 0x543   : > { %v2290_v16 = vsel %vm674_vm8, 0.0, %v2289_v6  ;;  %v2286_v49 = vsel %vm674_vm8, 0.0, %v2285_v15  ;;  %v2351_v46 = vperm.slane %v2347_v34, %v3336_v14 }
 0x544   : > { %v2364_v32 = vsel %vm674_vm8, %v2363_v2, %v2290_v16  ;;  %v2383_v11 = vrot.slane %v2362_v40, 4  ;;  %v2353_v59 = vsel %vm674_vm8, %v2352_v17, %v2286_v49 }
 0x545   : > { %v2368_v42 = vperm.slane %v2364_v32, %v3336_v14  ;;  %v2371_v3 = vrot.slane %v2351_v46, 4  ;;  %v2357_v18 = vperm.slane %v2353_v59, %v3336_v14  ;;  %v2529_v59 = vld [vmem:[#allocation5 + $0x8] sm:$0xff] }
 0x547   : > { %v2384_v57 = vsel %vm674_vm8, %v2368_v42, %v2383_v11  ;;  %v2381_v23 = vrot.slane %v2368_v42, 4  ;;  %v2372_v24 = vsel %vm674_vm8, %v2357_v18, %v2371_v3  ;;  %v2369_v50 = vrot.slane %v2357_v18, 4  ;;  %v2531_v42 = vld [vmem:[#allocation5 + $0x18] sm:$0xff]  ;;  %v2530_v11 = vld [vmem:[#allocation5 + $0x10] sm:$0xff]  ;;  %v2528_v18 = vld [vmem:[#allocation5] sm:$0xff] }
 0x548   : > { %v2392_v61 = vperm.slane %v2384_v57, %v3346_v28  ;;  %v2380_v53 = vperm.slane %v2372_v24, %v3346_v28  ;;  %2554 = vmatpush.msrb.mxu3 %v2531_v42  ;;  %v2581_v24 = vld [vmem:[%s4390_s12 + $0x70] sm:$0xff] }
 0x549   : > { %v2382_v63 = vsel %vm674_vm8, %v2381_v23, %v2362_v40  ;;  %v2370_v1 = vsel %vm674_vm8, %v2369_v50, %v2351_v46 }
 0x54a   : > { %v2397_v35 = vrot.slane %v2392_v61, 4  ;;  %v2388_v22 = vperm.slane %v2382_v63, %v3346_v28  ;;  %v2399_v21 = vrot.slane %v2380_v53, 4  ;;  %v2376_v41 = vperm.slane %v2370_v1, %v3346_v28  ;;  %v2435_v28 = vld [vmem:[%s4384_s6 + $0x10] sm:$0xff]  ;;  %2555 = vmatpush.msrb.mxu3 %v2530_v11  ;;  %v2580_v63 = vld [vmem:[%s4390_s12 + $0x68] sm:$0xff]  ;;  %v2579_v1 = vld [vmem:[%s4390_s12 + $0x60] sm:$0xff] }
 0x54b   : > { %2460 = vmatpush.msrb.mxu2 %v2435_v28  ;;  %v2575_v28 = vld [vmem:[%s4390_s12 + $0x40] sm:$0xff] }
 0x54c   : > { %v2398_v14 = vsel %vm674_vm8, %v2397_v35, %v2380_v53  ;;  %v2393_v39 = vrot.slane %v2388_v22, 4  ;;  %v2400_v13 = vsel %vm674_vm8, %v2392_v61, %v2399_v21  ;;  %v2395_v43 = vrot.slane %v2376_v41, 4  ;;  %2556 = vmatpush.msrb.mxu3 %v2529_v59  ;;  %v2582_v61 = vld [vmem:[%s4390_s12 + $0x78] sm:$0xff] }
 0x54d   : > { %2413 = vrot.lane.b32.xlu2 %v2398_v14, %s3086_s28  ;;  %2421 = vrot.lane.b32.xlu1 %v2400_v13, %s3085_s24  ;;  %s490_s28 = sand.u32 1, %s3064_s30  }
 0x54e   : > { %v2394_v58 = vsel %vm674_vm8, %v2393_v39, %v2376_v41  ;;  %v2396_v4 = vsel %vm674_vm8, %v2388_v22, %v2395_v43  ;;  %2461 = vmatpush.msrb.mxu2 %v2434_v8  ;;  %vm2427_vm8 = vcmask 130048   ;;  %2557 = vmatpush.msrb.mxu3 %v2528_v18  ;;  %v2578_v41 = vld [vmem:[%s4390_s12 + $0x58] sm:$0xff]  ;;  %v2862_v39 = vld [vmem:[%s4386_s8] ss:$0 sm:$0xff]  ;;  %s2722_s21 = sshll.u32 %s490_s28, 4  ;;  %s2615_s20 = scalar_lea.sflag [#allocation4], %s490_s28 }
 0x54f   : > { %2405 = vrot.lane.b32.xlu0 %v2396_v4, %s4398_s18  ;;  %2587 = vmatpush.msra.mxu0 %v2582_v61  ;;  %v2576_v4 = vld [vmem:[%s4390_s12 + $0x48] sm:$0xff]  ;;  %s492_s26 = scalar_lea.vmem [#allocation7], %s2722_s21  ;;  %s2629_s18 = sshll.u32 %s2626_s22, 4  ;;  %s2630_s18 = int_to_ptr.hbm [resolvable:$true] %s2629_s18 }
 0x550   : > { %2462 = vmatpush.msrb.mxu2 %v2433_v52  ;;  %s2627_s24 = sshll.u32 %s492_s26, 4  ;;  %s3016_s25 = sshra.s32 %s2630_s18, 4  ;;  %s2628_s24 = int_to_ptr.vmem [resolvable:$true] %s2627_s24  ;;  %s3017_s25 = int_to_ptr.hbm [resolvable:$true] %s3016_s25 }
 0x551   : > { %2588 = vmatpush.msra.mxu0 %v2581_v24  ;;  %s3018_s21 = scalar_lea.hbm %s3017_s25, 16  ;;  %p3023_p3 = scmp.lt.s32.totalorder %s3017_s25, %s4392_s14 }
 0x552   : > { %p3019_p0 = scmp.ne.s32.totalorder %s3017_s25, %s3018_s21  ;;  %p3024_p4 = scmp.lt.s32.totalorder %s3022_s19, %s3018_s21 }
 0x553   : > { %2589 = vmatpush.msra.mxu0 %v2580_v63 }
 0x554   : > { %p3020_p1 = pnand %p3019_p0, %p3202_p5  ;;  %p3025_p7 = por %p3024_p4, %p3023_p3 }
 0x555   : > { %2590 = vmatpush.msra.mxu0 %v2579_v1 }
 0x556   : > { %p3021_p2 = pneg %p3020_p1 }
 0x557   : > { %2591 = vmatpush.msra.mxu0 %v2578_v41 }
 0x558   : > { %p3026_p8 = pnand %p3025_p7, %p3021_p2 }
 0x59b   : > { %v2404_v25 = vpop.permute.xlu2 %2403 }
 0x59c   : > { %v2425_v56 = vsel %vm1383_vm9, %v2340_v30, %v2404_v25  ;;  %v2574_v25 = vld [vmem:[%s4390_s12 + $0x38] sm:$0xff] }
 0x5a7   : > { %v2414_v62 = vpop.permute.xlu2 %2413 }
 0x5b1   : > { %v2420_v0 = vpop.permute.xlu1 %2419 }
 0x5b3   : > { %v2412_v51 = vpop.permute.xlu0 %2411 }
 0x5b4   : > { %v2428_v5 = vsel %vm2427_vm8, %v2425_v56, %v2412_v51  ;;  %v2573_v51 = vld [vmem:[%s4390_s12 + $0x30] sm:$0xff] }
 0x5b5   : > { %v2431_v37 = vsel %vm2430_vm15, %v2428_v5, %v2420_v0  ;;  %v2572_v5 = vld [vmem:[%s4390_s12 + $0x28] sm:$0xff] }
 0x5b6   : > { %2771 = vmatmul.msk.f32.vlgmr.msrb.gmra.mxu2 %vm4424_vm2, %v2431_v37 }
 0x5bf   : > { %v2422_v55 = vpop.permute.xlu1 %2421 }
 0x5c1   : > { %v2406_v12 = vpop.permute.xlu0 %2405 }
 0x5c2   : > { %v2426_v27 = vsel %vm1383_vm9, %v2394_v58, %v2406_v12  ;;  %vm4427_vm9 = vmmov %vm4426_vm0  ;;  %v2863_v58 = vld [vmem:[%s4387_s9] ss:$0 sm:$0xff] }
 0x5c3   : > { %v2429_v48 = vsel %vm2427_vm8, %v2426_v27, %v2414_v62  ;;  %v2571_v12 = vld [vmem:[%s4390_s12 + $0x20] sm:$0xff]  ;;  %v2570_v27 = vld [vmem:[%s4390_s12 + $0x18] sm:$0xff]  ;;  %vm4432_vm8 = vmmov %vm4426_vm0 }
 0x5c4   : > { %v2432_v7 = vsel %vm2430_vm15, %v2429_v48, %v2422_v55  ;;  %vm4433_vm15 = vmmov %vm4426_vm0 }
 0x5c5   : > { %2772 = vmatmul.msk.f32.gmra.mxu2 %vm4425_vm3, %v2432_v7 }
 0x639   : > { %v2464_v45 = vpop.f32.mrf.mxu2 }
 0x63a   : > { %v2465_v38 = vadd.f32 %v2861_v20, %v2464_v45 }
 0x63c   : > { %v4257_v9 = vadd.f32 %v2940_v31, %v2465_v38  ;;  %v2569_v38 = vld [vmem:[%s4390_s12 + $0x10] sm:$0xff]  ;;  %v2568_v31 = vld [vmem:[%s4390_s12 + $0x8] sm:$0xff] }
 0x63e   : > { %v2474_v26 = vsel %vm4426_vm0, %v4257_v9, 0.0 }
 0x63f   : > { %2475 = vadd.xlane.f32.xlu0 %v2474_v26  ;;  %v2567_v26 = vld [vmem:[%s4390_s12] sm:$0xff] }
 0x648   : > { %v2467_v29 = vpop.f32.mrf.mxu2 }
 0x649   : > { %v2468_v44 = vadd.f32 %v2861_v20, %v2467_v29  ;;  %v2864_v29 = vld [vmem:[%s4389_s11] ss:$0 sm:$0xff] }
 0x64b   : > { %v4262_v33 = vadd.f32 %v2941_v36, %v2468_v44 }
 0x64d   : > { %v2477_v54 = vsel %vm4427_vm9, %v4262_v33, 0.0 }
 0x64e   : > { %2478 = vadd.xlane.f32.xlu2 %v2477_v54 }
 0x6b2   : > { %v2476_v6 = vpop.xlane.xlu0 %2475 }
 0x6b3   : > { %v2480_v47 = vmul.f32 %v2476_v6, %v3248_v10 }
 0x6b5   : > { %v2482_v2 = vsub.f32 %v4257_v9, %v2480_v47 }
 0x6b7   : > { %v2484_v15 = vmul.f32 %v2482_v2, %v2482_v2 }
 0x6b9   : > { %v2486_v40 = vsel %vm4428_vm5, %v2484_v15, 0.0  ;;  %v2865_v15 = vld [vmem:[%s4391_s13] ss:$0 sm:$0xff] }
 0x6ba   : > { %2487 = vadd.xlane.f32.xlu1 %v2486_v40 }
 0x6c1   : > { %v2479_v30 = vpop.xlane.xlu2 %2478 }
 0x6c2   : > { %v2481_v19 = vmul.f32 %v2479_v30, %v3248_v10 }
 0x6c4   : > { %v4271_v16 = vsub.f32 %v4262_v33, %v2481_v19 }
 0x6c6   : > { %v2485_v34 = vmul.f32 %v4271_v16, %v4271_v16 }
 0x6c8   : > { %v2489_v49 = vsel %vm4429_vm6, %v2485_v34, 0.0 }
 0x6c9   : > { %2490 = vadd.xlane.f32.xlu0 %v2489_v49 }
 0x72d   : > { %v2488_v46 = vpop.xlane.xlu1 %2487 }
 0x72e   : > { %v2492_v17 = vmul.f32 %v2488_v46, %v3248_v10 }
 0x730   : > { %v2494_v32 = vadd.f32 1e-05, %v2492_v17 }
 0x732   : > { %2936 = vrsqrt.f32 %v2494_v32  ;;  %vm2502_vm10 = vweird.f32 %v2494_v32 }
 0x738   : > { %v2937_v3 = vpop.eup %2936 }
 0x739   : > { %v2497_v57 = vmul.f32 %v2937_v3, %v2494_v32  ;;  %vm2503_vm7 = vweird.f32 %v2937_v3 }
 0x73a   : > { %vm2504_vm11 = vmor %vm2502_vm10, %vm2503_vm7 }
 0x73b   : > { %v2498_v23 = vmul.f32 %v2937_v3, %v2497_v57 }
 0x73c   : > { %v2491_v53 = vpop.xlane.xlu0 %2490 }
 0x73d   : > { %v2499_v50 = vmul.f32 0.5, %v2498_v23  ;;  %v2493_v22 = vmul.f32 %v2491_v53, %v3248_v10  ;;  %v2577_v10 = vld [vmem:[%s4390_s12 + $0x50] sm:$0xff] }
 0x73e   : > { %2592 = vmatpush.msra.mxu0 %v2577_v10 }
 0x73f   : > { %v2500_v35 = vsub.f32 1.5, %v2499_v50  ;;  %v2495_v14 = vadd.f32 1e-05, %v2493_v22 }
 0x740   : > { %2593 = vmatpush.msra.mxu0 %v2576_v4 }
 0x741   : > { %v2501_v21 = vmul.f32 %v2937_v3, %v2500_v35  ;;  %2938 = vrsqrt.f32 %v2495_v14  ;;  %vm2512_vm14 = vweird.f32 %v2495_v14 }
 0x742   : > { %2594 = vmatpush.msra.mxu0 %v2575_v28 }
 0x743   : > { %v2505_v13 = vsel %vm2504_vm11, %v2937_v3, %v2501_v21 }
 0x744   : > { %v2516_v43 = vmul.f32 %v2505_v13, %v2482_v2  ;;  %2595 = vmatpush.msra.mxu0 %v2574_v25 }
 0x746   : > { %v2521_v60 = vmul.f32 %v2862_v39, %v2516_v43  ;;  %2596 = vmatpush.msra.mxu0 %v2573_v51 }
 0x747   : > { %v2939_v52 = vpop.eup %2938 }
 0x748   : > { %v2526_v8 = vadd.f32 %v2863_v58, %v2521_v60  ;;  %v2507_v56 = vmul.f32 %v2939_v52, %v2495_v14  ;;  %vm2513_vm13 = vweird.f32 %v2939_v52  ;;  %2597 = vmatpush.msra.mxu0 %v2572_v5 }
 0x749   : > { %vm2514_vm1 = vmor %vm2512_vm14, %vm2513_vm13 }
 0x74a   : > { %2773 = vmatmul.msk.f32.vlgmr.msrb.gmra.mxu3 %vm4430_vm12, %v2526_v8  ;;  %v2508_v0 = vmul.f32 %v2939_v52, %v2507_v56  ;;  %2598 = vmatpush.msra.mxu0 %v2571_v12 }
 0x74c   : > { %v2509_v37 = vmul.f32 0.5, %v2508_v0  ;;  %2599 = vmatpush.msra.mxu0 %v2570_v27 }
 0x74e   : > { %v2510_v62 = vsub.f32 1.5, %v2509_v37  ;;  %2600 = vmatpush.msra.mxu0 %v2569_v38 }
 0x750   : > { %v2511_v55 = vmul.f32 %v2939_v52, %v2510_v62  ;;  %2601 = vmatpush.msra.mxu0 %v2568_v31 }
 0x752   : > { %v2515_v48 = vsel %vm2514_vm1, %v2939_v52, %v2511_v55  ;;  %2602 = vmatpush.msra.mxu0 %v2567_v26 }
 0x753   : > { %v2517_v7 = vmul.f32 %v2515_v48, %v4271_v16 }
 0x755   : > { %v2522_v20 = vmul.f32 %v2862_v39, %v2517_v7 }
 0x757   : > { %v2527_v45 = vadd.f32 %v2863_v58, %v2522_v20 }
 0x759   : > { %2774 = vmatmul.msk.f32.gmra.mxu3 %vm4431_vm4, %v2527_v45 }
 0x7cd   : > { %v2559_v44 = vpop.f32.mrf.mxu3 }
 0x7ce   : > { %v2560_v36 = vadd.f32 %v2864_v29, %v2559_v44 }
 0x7d0   : > { %v2565_v54 = vmax.f32 %v2560_v36, 0.0 }
 0x7d2   : > { %2603 = vmatmul.f32.vlgmr.msra.gmra.mxu0 %v2565_v54 }
 0x7dc   : > { %v2562_v6 = vpop.f32.mrf.mxu3 }
 0x7dd   : > { %v2563_v47 = vadd.f32 %v2864_v29, %v2562_v6 }
 0x7df   : > { %v2566_v2 = vmax.f32 %v2563_v47, 0.0 }
 0x7e1   : > { %2606 = vmatmul.f32.gmra.mxu0 %v2566_v2 }
 0x84f   : > { %v2604_v40 = vpop.f32.mrf.mxu0 }
 0x850   : > { %v2605_v30 = vadd.f32 %v2865_v15, %v2604_v40 }
 0x852   : > { %v2610_v19 = vadd.f32 %v2605_v30, %v4257_v9 }
 0x854   : > { %2612 = vst.msk [vmem:[%s492_s26] sm:$0xff] %vm4432_vm8, %v2610_v19 }
 0x85e   : > { %v2607_v16 = vpop.f32.mrf.mxu0 }
 0x85f   : > { %v2608_v34 = vadd.f32 %v2865_v15, %v2607_v16 }
 0x861   : > { %v2611_v49 = vadd.f32 %v2608_v34, %v4262_v33 }
 0x863   : > { %2613 = vst.msk [vmem:[%s492_s26 + $0x8] sm:$0xff] %vm4433_vm15, %v2611_v49 }
 0x864   : > { %3029 = shalt.err (!%p3026_p8)
}
 0x865   : > { %s3088_s28 = smov 128   ;;  %s4434_s26 = smov 8  }
 0x866   : > { %2794 = dma.vmem_to_hbm [thread:$0]  (%p3202_p5), %s2628_s24, 256, %s2630_s18, %s2615_s20, %s3088_s28, %s3088_s28, %s4434_s26  }
 0x867 PF: > { %p2811_p9 = scmp.ge.s32.totalorder %s3072_s16, 2  ;;  %s2644_s17 = sand.u32 1, %s3060_s29  }
 0x868   : > { %s2645_s27 = scalar_lea.sflag [#allocation4], %s2644_s17 }
 0x869   : > { %p2804_p10 = pnand %p2811_p9, %p3206_p6 }
 0x86b   : > { %p2805_p11 = pneg %p2804_p10 }
 0x86d   : > { %3055 = dma.done.wait (%p2805_p11), %s2645_s27, 256  }
 0x86e   : > { %3057 = vsyncadd (%p2805_p11), %s2645_s27, 4294967040  ;;  %s4436_s16 = sld [smem:[#allocation12_spill]]  ;;  %s4439_s29 = smov %s3064_s30 }
 0x86f   : > { %s4437_s25 = sld [smem:[#allocation11_spill]] }
 0x870   : > { %s4438_s15 = sld [smem:[#allocation13_spill]] }
 0x874   : > { %p26_p12 = scmp.ge.s32.totalorder %s4436_s16, 4  }
 0x875   : > { %s4440_s30 = smov %s4437_s25 }
 0x876   :  { %28 = sbr.rel (!%p26_p12) target bundleno = 7 (0x7), region = 120 }
 0x87b   :  { %2651 = vsyncpa [#allocation3], 1 }
 0x87c   :  { %2653 = vsyncpa [#allocation3 + $0x1], 1 }
 0x87d   :  { %2654 = vsyncpa [#allocation6], 1 }
 0x87e   :  { %2655 = vsyncpa [#allocation4], 1 }
 0x87f   :  { %2657 = vsyncpa [#allocation4 + $0x1], 1 }

// kernel: tpu_custom_call.1
= control target key start
LH: loop header
LB: loop body
LE: loop exit
PB: predicated region body
PF: predicated region fallthrough
CT: control target
= control target key end

     0   :  { %s4378_s0 = inlined_call_operand.vmem [shape: f32[2,16,32], index: 0, kind: input, shape index: {}]   ;;  %s4379_s1 = inlined_call_operand.hbm [shape: f32[1,32], index: 1, kind: input, shape index: {}]   ;;  %s4380_s2 = inlined_call_operand.vmem [shape: f32[1,32], index: 2, kind: input, shape index: {}]   ;;  %s4381_s3 = inlined_call_operand.vmem [shape: f32[32,32], index: 3, kind: input, shape index: {}]   ;;  %s4382_s4 = inlined_call_operand.vmem [shape: f32[32,32], index: 4, kind: input, shape index: {}]   ;;  %s4383_s5 = inlined_call_operand.vmem [shape: f32[32,32], index: 5, kind: input, shape index: {}]   ;;  %s4384_s6 = inlined_call_operand.vmem [shape: f32[32,32], index: 6, kind: input, shape index: {}]   ;;  %s4385_s7 = inlined_call_operand.vmem [shape: f32[1,32], index: 7, kind: input, shape index: {}]   ;;  %s4386_s8 = inlined_call_operand.vmem [shape: f32[1,32], index: 8, kind: input, shape index: {}]   ;;  %s4387_s9 = inlined_call_operand.vmem [shape: f32[1,32], index: 9, kind: input, shape index: {}]   ;;  %s4388_s10 = inlined_call_operand.hbm [shape: f32[32,128], index: 10, kind: input, shape index: {}]   ;;  %s4389_s11 = inlined_call_operand.vmem [shape: f32[1,128], index: 11, kind: input, shape index: {}]   ;;  %s4390_s12 = inlined_call_operand.vmem [shape: f32[128,32], index: 12, kind: input, shape index: {}]   ;;  %s4391_s13 = inlined_call_operand.vmem [shape: f32[1,32], index: 13, kind: input, shape index: {}]   ;;  %s4392_s14 = inlined_call_operand.hbm [shape: f32[2,16,32], index: 14, kind: output, shape index: {}]  }
   0x1   :  { %4399 = sst [smem:[#allocation15_spill]] %s4378_s0 }
   0x2   :  { %19 = vsyncpa [#allocation3], 0 }
   0x3   :  { %20 = vsyncpa [#allocation6], 0 }
   0x4   :  { %21 = vsyncpa [#allocation4], 0 }
   0x5   :  { %23 = vsyncpa [#allocation4 + $0x1], 0  ;;  %s3164_s29 = smov 0   ;;  %s3166_s30 = smov 0  }
   0x6   :  { %s3168_s15 = smov 0   ;;  %s3170_s16 = smov 0  }
   0x7 LB: > { %4400 = sst [smem:[#allocation11_spill]] %s3068_s15  ;;  %s3185_s17 = sadd.s32 4294967295, %s3072_s16   ;;  %s3072_s16 = sphi %s3170_s16, %s4436_s16   ;;  %s3068_s15 = sphi %s3168_s15, %s4438_s15   ;;  %s3064_s30 = sphi %s3166_s30, %s4440_s30   ;;  %s3060_s29 = sphi %s3164_s29, %s4439_s29  }
   0x8   : > { %s2714_s18 = sadd.s32 4294967294, %s3072_s16   ;;  %s3189_s19 = sadd.s32 1, %s3072_s16  }
   0x9   : > { %4401 = sst [smem:[#allocation12_spill]] %s3189_s19  ;;  %s335_s20 = sadd.s32 1, %s3068_s15 }
   0xa   : > { %s332_s21 = ssub.s32 %s3072_s16, %s3189_s19  ;;  %p345_p0 = scmp.ne.s32.totalorder %s3068_s15, %s3064_s30 }
   0xb   : > { %p333_p1 = scmp.eq.s32.totalorder %s332_s21, 0  ;;  %p346_p2 = scmp.eq.s32.totalorder %s3185_s17, 1 }
   0xc   : > { %p351_p3 = scmp.ne.s32.totalorder %s3064_s30, %s3060_s29  ;;  %p352_p4 = scmp.eq.s32.totalorder %s2714_s18, 1 }
   0xd   : > { %s3200_s22 = scalar_select %p333_p1, %s3068_s15, %s335_s20  }
   0xe   : > { %p3202_p5 = por %p346_p2, %p345_p0  ;;  %p3206_p6 = por %p352_p4, %p351_p3 }
   0xf   : > { %4402 = sst [smem:[#allocation13_spill]] %s3200_s22  ;;  %p2715_p7 = scmp.ge.s32.totalorder %s3072_s16, 1 }
  0x10   : > { %s4404_s24 = scalar_select %p3206_p6, 1, 0 }
  0x11   : > { %p359_p8 = scmp.lt.s32.totalorder %s3072_s16, 3  ;;  %p2807_p9 = scmp.eq.s32.totalorder %s3185_s17, 0 }
  0x12   : > { %4405 = sst [smem:[#allocation14_spill]] %s4404_s24  ;;  %s371_s28 = sshll.u32 %s4379_s1, 4  ;;  %s372_s28 = int_to_ptr.hbm [resolvable:$true] %s371_s28 }
  0x13   : > { %p3213_p10 = pnand %p2715_p7, %p359_p8  ;;  %s3074_s18 = smov [#allocation2]  }
  0x14   : > { %s373_s20 = sshll.u32 %s3074_s18, 4  ;;  %s406_s15 = sshll.u32 %s4388_s10, 4  ;;  %s374_s20 = int_to_ptr.vmem [resolvable:$true] %s373_s20  ;;  %s407_s15 = int_to_ptr.hbm [resolvable:$true] %s406_s15 }
  0x15   : > { %p2796_p11 = pneg %p3213_p10  ;;  %s3075_s19 = smov [#allocation5]  }
  0x16   : > { %s408_s24 = sshll.u32 %s3075_s19, 4  ;;  %s3076_s26 = smov 128   ;;  %s409_s24 = int_to_ptr.vmem [resolvable:$true] %s408_s24 }
  0x17   : > { %p2797_p12 = pnand %p2807_p9, %p2796_p11  ;;  %s3077_s27 = smov 8  }
  0x18   : > { %441 = sbr.rel (%p3213_p10) target bundleno = 2151 (0x867), region = 76 }
  0x19   : > { %2799 = dma.hbm_to_vmem [thread:$0]  (!%p2797_p12), %s372_s28, 16, %s374_s20, [#allocation3]  }
  0x1a   : > { %2802 = dma.hbm_to_vmem [thread:$0]  (!%p2797_p12), %s407_s15, 512, %s409_s24, [#allocation6], %s3076_s26, %s3076_s26, %s3077_s27  }
  0x1d   : > { %3047 = dma.done.wait (%p2807_p9), [#allocation3], 16  }
  0x1e   : > { %3049 = vsyncadd (%p2807_p9), [#allocation3], 4294967280 }
  0x1f   : > { %3051 = dma.done.wait (%p2807_p9), [#allocation6], 512  }
  0x20   : > { %3053 = vsyncadd (%p2807_p9), [#allocation6], 4294966784  ;;  %p493_p13 = scmp.lt.s32.totalorder %s3185_s17, 1  ;;  %s4407_s0 = sld [smem:[#allocation15_spill]]  ;;  %vm4397_vm0 = vcmask 261120   ;;  %v3078_v4 = vmov 32.0  }
  0x21   : > { %2866 = vrcp.f32 %v3078_v4  ;;  %v567_v21 = vld [vmem:[%s4381_s3 + $0x18] sm:$0xff]  ;;  %v566_v22 = vld [vmem:[%s4381_s3 + $0x10] sm:$0xff]  ;;  %v565_v23 = vld [vmem:[%s4381_s3 + $0x8] sm:$0xff]  ;;  %s3081_s22 = smov 112   ;;  %vm674_vm8 = vcmask 1047556   ;;  %vm1383_vm9 = vcmask 64512  }
  0x22   : > { %s494_s19 = scalar_select %p493_p13, %s3185_s17, 1  ;;  %586 = vmatpush.msra.mxu1 %v567_v21  ;;  %2782 = vmatpush.msra.mxu2 %v567_v21  ;;  %v564_v24 = vld [vmem:[%s4381_s3] sm:$0xff]  ;;  %v600_v25 = vld [vmem:[%s4382_s4 + $0x18] sm:$0xff]  ;;  %v599_v26 = vld [vmem:[%s4382_s4 + $0x10] sm:$0xff] }
  0x23   : > { %v598_v27 = vld [vmem:[%s4382_s4 + $0x8] sm:$0xff]  ;;  %v597_v30 = vld [vmem:[%s4382_s4] sm:$0xff]  ;;  %v627_v32 = vld [vmem:[%s4383_s5 + $0x18] sm:$0xff]  ;;  %s3085_s24 = smov 24   ;;  %s3086_s28 = smov 16  }
  0x24   : > { %s2780_s15 = sshll.u32 %s494_s19, 4  ;;  %587 = vmatpush.msra.mxu1 %v566_v22  ;;  %2783 = vmatpush.msra.mxu2 %v566_v22  ;;  %v626_v33 = vld [vmem:[%s4383_s5 + $0x10] sm:$0xff]  ;;  %v625_v34 = vld [vmem:[%s4383_s5 + $0x8] sm:$0xff]  ;;  %v624_v37 = vld [vmem:[%s4383_s5] sm:$0xff]  ;;  %s3079_s19 = smov 120  }
  0x25   : > { %v2859_v47 = vld [vmem:[#allocation2] ss:$0 sm:$0xff]  ;;  %s4398_s18 = smov 8   ;;  %s2781_s27 = sshll.u32 %s3185_s17, 4 }
  0x26   : > { %s3242_s25 = scalar_lea.vmem %s4407_s0, %s2780_s15  ;;  %588 = vmatpush.msra.mxu1 %v565_v23  ;;  %2784 = vmatpush.msra.mxu2 %v565_v23  ;;  %v2860_v51 = vld [vmem:[%s4380_s2] ss:$0 sm:$0xff]  ;;  %s3080_s15 = smov 104  }
  0x27   : > { %v498_v0 = vld [vmem:[%s3242_s25] sm:$0xff]  ;;  %v499_v2 = vld [vmem:[%s3242_s25 + $0x8] sm:$0xff]  ;;  %v2867_v5 = vpop.eup %2866 }
  0x28   : > { %v503_v1 = vsel %vm4397_vm0, %v498_v0, 0.0  ;;  %v506_v3 = vsel %vm4397_vm0, %v499_v2, 0.0  ;;  %v510_v6 = vmul.f32 32.0, %v2867_v5  ;;  %vm514_vm1 = vweird.f32 %v2867_v5  ;;  %589 = vmatpush.msra.mxu1 %v564_v24  ;;  %2785 = vmatpush.msra.mxu2 %v564_v24 }
  0x29   : > { %504 = vadd.xlane.f32.xlu0 %v503_v1 }
  0x2a   : > { %v511_v7 = vsub.f32 1.0, %v510_v6  ;;  %613 = vmatpush.msrb.mxu1 %v600_v25  ;;  %640 = vmatpush.msrb.mxu2 %v627_v32  ;;  %v3082_v6 = vmov 1983009808  }
  0x2c   : > { %v512_v8 = vmul.f32 %v2867_v5, %v511_v7  ;;  %614 = vmatpush.msrb.mxu1 %v599_v26  ;;  %641 = vmatpush.msrb.mxu2 %v626_v33  ;;  %v679_v7 = vunpack.c.l.s4 %v3082_v6 }
  0x2e   : > { %v513_v9 = vadd.f32 %v2867_v5, %v512_v8  ;;  %615 = vmatpush.msrb.mxu1 %v598_v27  ;;  %642 = vmatpush.msrb.mxu2 %v625_v34 }
  0x30   : > { %v3248_v10 = vsel %vm514_vm1, %v2867_v5, %v513_v9  ;;  %616 = vmatpush.msrb.mxu1 %v597_v30  ;;  %643 = vmatpush.msrb.mxu2 %v624_v37 }
  0x31   : > { %507 = vadd.xlane.f32.xlu0 %v506_v3 }
  0x9c   : > { %v505_v11 = vpop.xlane.xlu0 %504 }
  0x9d   : > { %v516_v12 = vmul.f32 %v3248_v10, %v505_v11 }
  0x9f   : > { %v518_v13 = vsub.f32 %v498_v0, %v516_v12 }
  0xa1   : > { %v520_v14 = vmul.f32 %v518_v13, %v518_v13 }
  0xa3   : > { %v522_v15 = vsel %vm4397_vm0, %v520_v14, 0.0  ;;  %v3336_v14 = vunpack.c.0.s8 %v679_v7 }
  0xa4   : > { %523 = vadd.xlane.f32.xlu1 %v522_v15  ;;  %v508_v16 = vpop.xlane.xlu0 %507 }
  0xa5   : > { %v517_v17 = vmul.f32 %v3248_v10, %v508_v16 }
  0xa7   : > { %v3253_v18 = vsub.f32 %v499_v2, %v517_v17 }
  0xa9   : > { %v521_v19 = vmul.f32 %v3253_v18, %v3253_v18 }
  0xab   : > { %v525_v20 = vsel %vm4397_vm0, %v521_v19, 0.0  ;;  %v3083_v19 = vmov 1934713408  }
  0xac   : > { %526 = vadd.xlane.f32.xlu1 %v525_v20  ;;  %v703_v20 = vunpack.c.l.s4 %v3083_v19 }
 0x117   : > { %v524_v28 = vpop.xlane.xlu1 %523 }
 0x118   : > { %v528_v29 = vmul.f32 %v524_v28, %v3248_v10  ;;  %v3346_v28 = vunpack.c.0.s8 %v703_v20 }
 0x11a   : > { %v530_v31 = vadd.f32 1e-05, %v528_v29 }
 0x11c   : > { %2868 = vrsqrt.f32 %v530_v31  ;;  %vm538_vm3 = vweird.f32 %v530_v31 }
 0x11f   : > { %v527_v35 = vpop.xlane.xlu1 %526 }
 0x120   : > { %v529_v36 = vmul.f32 %v527_v35, %v3248_v10 }
 0x122   : > { %v2869_v38 = vpop.eup %2868  ;;  %v531_v39 = vadd.f32 1e-05, %v529_v36 }
 0x123   : > { %v533_v40 = vmul.f32 %v2869_v38, %v530_v31  ;;  %vm539_vm2 = vweird.f32 %v2869_v38 }
 0x124   : > { %2870 = vrsqrt.f32 %v531_v39  ;;  %vm540_vm4 = vmor %vm538_vm3, %vm539_vm2  ;;  %vm548_vm5 = vweird.f32 %v531_v39 }
 0x125   : > { %v534_v41 = vmul.f32 %v2869_v38, %v533_v40 }
 0x127   : > { %v535_v42 = vmul.f32 0.5, %v534_v41 }
 0x129   : > { %v536_v43 = vsub.f32 1.5, %v535_v42 }
 0x12a   : > { %v2871_v44 = vpop.eup %2870 }
 0x12b   : > { %v537_v45 = vmul.f32 %v2869_v38, %v536_v43  ;;  %v543_v46 = vmul.f32 %v2871_v44, %v531_v39  ;;  %vm549_vm6 = vweird.f32 %v2871_v44 }
 0x12c   : > { %vm550_vm7 = vmor %vm548_vm5, %vm549_vm6 }
 0x12d   : > { %v541_v48 = vsel %vm540_vm4, %v2869_v38, %v537_v45  ;;  %v544_v49 = vmul.f32 %v2871_v44, %v543_v46 }
 0x12e   : > { %v552_v50 = vmul.f32 %v541_v48, %v518_v13 }
 0x12f   : > { %v545_v52 = vmul.f32 0.5, %v544_v49 }
 0x130   : > { %v557_v53 = vmul.f32 %v2859_v47, %v552_v50 }
 0x131   : > { %v546_v54 = vsub.f32 1.5, %v545_v52 }
 0x132   : > { %v562_v55 = vadd.f32 %v2860_v51, %v557_v53 }
 0x133   : > { %v547_v56 = vmul.f32 %v2871_v44, %v546_v54 }
 0x134   : > { %2725 = vmatmul.msk.f32.vlgmr.msra.gmra.mxu1 %vm4397_vm0, %v562_v55 }
 0x135   : > { %v551_v57 = vsel %vm550_vm7, %v2871_v44, %v547_v56 }
 0x136   : > { %v553_v58 = vmul.f32 %v551_v57, %v3253_v18 }
 0x138   : > { %v558_v59 = vmul.f32 %v2859_v47, %v553_v58 }
 0x13a   : > { %v563_v60 = vadd.f32 %v2860_v51, %v558_v59 }
 0x13c   : > { %2726 = vmatmul.msk.f32.vlgmr.msra.gmra.mxu2 %vm4397_vm0, %v563_v60  ;;  %2727 = vmatmul.msk.f32.vlgmr.msrb.gmra.mxu1 %vm4397_vm0, %v562_v55 }
 0x144   : > { %2728 = vmatmul.msk.f32.gmra.mxu1 %vm4397_vm0, %v563_v60  ;;  %2729 = vmatmul.msk.f32.vlgmr.msrb.gmra.mxu2 %vm4397_vm0, %v562_v55 }
 0x14c   : > { %2730 = vmatmul.msk.f32.gmra.mxu2 %vm4397_vm0, %v563_v60 }
 0x1b1   : > { %v591_v61 = vpop.f32.mrf.mxu1 }
 0x1b2   : > { %v651_v62 = vmul.f32 0.17677669, %v591_v61 }
 0x1b4   : > { %655 = vrot.lane.b32.xlu1 %v651_v62, %s3079_s19  ;;  %v676_v8 = vrot.slane %v651_v62, 4 }
 0x1b9   : > { %v618_v63 = vpop.f32.mrf.mxu1 }
 0x1ba   : > { %908 = vrot.lane.b32.xlu0 %v618_v63, %s3080_s15  ;;  %896 = vrot.lane.b32.xlu2 %v618_v63, %s3079_s19  ;;  %v916_v13 = vrot.slane %v618_v63, 4 }
 0x1bf   : > { %v594_v0 = vpop.f32.mrf.mxu2 }
 0x1c0   : > { %v3309_v1 = vmul.f32 0.17677669, %v594_v0 }
 0x1c1   : > { %v3321_v3 = vpop.f32.mrf.mxu1 }
 0x1c2   : > { %902 = vrot.lane.b32.xlu2 %v618_v63, %s3081_s22  ;;  %663 = vrot.lane.b32.xlu0 %v3309_v1, %s3081_s22  ;;  %v732_v31 = vrot.slane %v3309_v1, 4  ;;  %v972_v32 = vrot.slane %v3321_v3, 4 }
 0x1c7   : > { %v3314_v2 = vpop.f32.mrf.mxu2 }
 0x1c8   : > { %1136 = vrot.lane.b32.xlu1 %v3314_v2, %s3079_s19  ;;  %v1156_v40 = vrot.slane %v3314_v2, 4 }
 0x1ca   : > { %661 = vrot.lane.b32.xlu2 %v651_v62, %s3081_s22  ;;  %1142 = vrot.lane.b32.xlu0 %v3314_v2, %s3081_s22 }
 0x1d2   : > { %667 = vrot.lane.b32.xlu2 %v651_v62, %s3080_s15  ;;  %898 = vrot.lane.b32.xlu0 %v3321_v3, %s3079_s19 }
 0x1da   : > { %657 = vrot.lane.b32.xlu2 %v3309_v1, %s3079_s19 }
 0x1e2   : > { %669 = vrot.lane.b32.xlu2 %v3309_v1, %s3080_s15 }
 0x1ea   : > { %1148 = vrot.lane.b32.xlu2 %v3314_v2, %s3080_s15 }
 0x1f2   : > { %904 = vrot.lane.b32.xlu2 %v3321_v3, %s3081_s22 }
 0x1fa   : > { %910 = vrot.lane.b32.xlu2 %v3321_v3, %s3080_s15 }
 0x214   : > { %v897_v4 = vpop.permute.xlu2 %896 }
 0x215   : > { %v928_v23 = vrot.slane %v897_v4, 4 }
 0x21c   : > { %v903_v5 = vpop.permute.xlu2 %902 }
 0x21d   : > { %v914_v11 = vrot.slane %v903_v5, 4  ;;  %v917_v16 = vsel %vm674_vm8, %v903_v5, %v916_v13 }
 0x21e   : > { %v925_v24 = vperm.slane %v917_v16, %v3336_v14 }
 0x21f   : > { %v915_v21 = vsel %vm674_vm8, %v914_v11, %v618_v63 }
 0x220   : > { %v921_v27 = vperm.slane %v915_v21, %v3336_v14  ;;  %v952_v41 = vrot.slane %v925_v24, 4 }
 0x222   : > { %v940_v49 = vrot.slane %v921_v27, 4 }
 0x224   : > { %v662_v9 = vpop.permute.xlu2 %661 }
 0x225   : > { %v673_v12 = vrot.slane %v662_v9, 4  ;;  %v677_v15 = vsel %vm674_vm8, %v662_v9, %v676_v8 }
 0x226   : > { %v656_v18 = vpop.permute.xlu1 %655  ;;  %v685_v22 = vperm.slane %v677_v15, %v3336_v14 }
 0x227   : > { %v675_v17 = vsel %vm674_vm8, %v673_v12, %v651_v62  ;;  %v688_v26 = vrot.slane %v656_v18, 4 }
 0x228   : > { %v681_v25 = vperm.slane %v675_v17, %v3336_v14  ;;  %v712_v37 = vrot.slane %v685_v22, 4 }
 0x22a   : > { %v700_v42 = vrot.slane %v681_v25, 4 }
 0x22c   : > { %v668_v29 = vpop.permute.xlu2 %667  ;;  %v909_v30 = vpop.permute.xlu0 %908 }
 0x22d   : > { %v686_v33 = vrot.slane %v668_v29, 4  ;;  %v689_v34 = vsel %vm674_vm8, %v668_v29, %v688_v26  ;;  %v926_v35 = vrot.slane %v909_v30, 4  ;;  %v929_v36 = vsel %vm674_vm8, %v909_v30, %v928_v23 }
 0x22e   : > { %v697_v38 = vperm.slane %v689_v34, %v3336_v14  ;;  %v937_v39 = vperm.slane %v929_v36, %v3336_v14 }
 0x22f   : > { %v687_v43 = vsel %vm674_vm8, %v686_v33, %v656_v18  ;;  %v927_v44 = vsel %vm674_vm8, %v926_v35, %v897_v4 }
 0x230   : > { %v693_v45 = vperm.slane %v687_v43, %v3336_v14  ;;  %v710_v46 = vrot.slane %v697_v38, 4  ;;  %v713_v47 = vsel %vm674_vm8, %v697_v38, %v712_v37  ;;  %v933_v48 = vperm.slane %v927_v44, %v3336_v14 }
 0x231   : > { %v721_v50 = vperm.slane %v713_v47, %v3346_v28  ;;  %v950_v51 = vrot.slane %v937_v39, 4  ;;  %v953_v52 = vsel %vm674_vm8, %v937_v39, %v952_v41 }
 0x232   : > { %v698_v53 = vrot.slane %v693_v45, 4  ;;  %v701_v54 = vsel %vm674_vm8, %v693_v45, %v700_v42  ;;  %v711_v55 = vsel %vm674_vm8, %v710_v46, %v685_v22  ;;  %v938_v56 = vrot.slane %v933_v48, 4 }
 0x233   : > { %v709_v57 = vperm.slane %v701_v54, %v3346_v28  ;;  %v717_v58 = vperm.slane %v711_v55, %v3346_v28  ;;  %v728_v59 = vrot.slane %v721_v50, 4  ;;  %v941_v60 = vsel %vm674_vm8, %v933_v48, %v940_v49 }
 0x234   : > { %v699_v61 = vsel %vm674_vm8, %v698_v53, %v681_v25  ;;  %v939_v62 = vsel %vm674_vm8, %v938_v56, %v921_v27  ;;  %v949_v63 = vperm.slane %v941_v60, %v3346_v28  ;;  %v951_v0 = vsel %vm674_vm8, %v950_v51, %v925_v24  ;;  %v658_v4 = vpop.permute.xlu2 %657  ;;  %v664_v5 = vpop.permute.xlu0 %663 }
 0x235   : > { %v3372_v6 = vperm.slane %v699_v61, %v3346_v28  ;;  %v3374_v7 = vrot.slane %v709_v57, 4  ;;  %v726_v8 = vrot.slane %v717_v58, 4  ;;  %v3377_v9 = vsel %vm674_vm8, 0.0, %v728_v59 }
 0x236   : > { %v797_v11 = vsel %vm674_vm8, %v728_v59, %v717_v58  ;;  %v802_v12 = vrot.slane %v3377_v9, 4  ;;  %v945_v13 = vperm.slane %v939_v62, %v3346_v28  ;;  %v957_v15 = vperm.slane %v951_v0, %v3346_v28 }
 0x237   : > { %v722_v16 = vrot.slane %v3372_v6, 4  ;;  %v3386_v17 = vsel %vm674_vm8, 0.0, %v3374_v7  ;;  %v3389_v18 = vsel %vm674_vm8, 0.0, %v726_v8  ;;  %v3392_v19 = vperm.slane %v797_v11, %v3336_v14 }
 0x238   : > { %v791_v20 = vrot.slane %v3386_v17, 4  ;;  %v961_v21 = vperm.slane %v953_v52, %v3346_v28  ;;  %v964_v22 = vrot.slane %v949_v63, 4  ;;  %v966_v23 = vrot.slane %v957_v15, 4 }
 0x239   : > { %v744_v24 = vrot.slane %v658_v4, 4  ;;  %v730_v25 = vrot.slane %v664_v5, 4  ;;  %v733_v26 = vsel %vm674_vm8, %v664_v5, %v732_v31  ;;  %v962_v27 = vrot.slane %v945_v13, 4 }
 0x23a   : > { %v965_v29 = vsel %vm674_vm8, 0.0, %v964_v22  ;;  %v967_v30 = vsel %vm674_vm8, 0.0, %v966_v23  ;;  %v968_v33 = vrot.slane %v961_v21, 4  ;;  %v741_v34 = vperm.slane %v733_v26, %v3336_v14  ;;  %v3400_v35 = vpop.permute.xlu1 %1136 }
 0x23b   : > { %v1031_v36 = vrot.slane %v965_v29, 4  ;;  %v731_v37 = vsel %vm674_vm8, %v730_v25, %v3309_v1  ;;  %v1168_v38 = vrot.slane %v3400_v35, 4  ;;  %v963_v39 = vsel %vm674_vm8, 0.0, %v962_v27 }
 0x23c   : > { %v969_v31 = vsel %vm674_vm8, 0.0, %v968_v33  ;;  %v1037_v41 = vsel %vm674_vm8, %v968_v33, %v957_v15  ;;  %v737_v42 = vperm.slane %v731_v37, %v3336_v14  ;;  %v768_v43 = vrot.slane %v741_v34, 4  ;;  %v670_v44 = vpop.permute.xlu2 %669  ;;  %v1143_v45 = vpop.permute.xlu0 %1142 }
 0x23d   : > { %v1041_v46 = vperm.slane %v1037_v41, %v3336_v14  ;;  %v1042_v47 = vrot.slane %v969_v31, 4  ;;  %v742_v48 = vrot.slane %v670_v44, 4  ;;  %v745_v49 = vsel %vm674_vm8, %v670_v44, %v744_v24 }
 0x23e   : > { %v756_v1 = vrot.slane %v737_v42, 4  ;;  %v753_v50 = vperm.slane %v745_v49, %v3336_v14  ;;  %v1154_v51 = vrot.slane %v1143_v45, 4  ;;  %v1157_v52 = vsel %vm674_vm8, %v1143_v45, %v1156_v40 }
 0x23f   : > { %v743_v53 = vsel %vm674_vm8, %v742_v48, %v658_v4  ;;  %v3417_v54 = vperm.slane %v1157_v52, %v3336_v14  ;;  %v1026_v55 = vsel %vm674_vm8, %v964_v22, %v945_v13  ;;  %v1032_v56 = vsel %vm674_vm8, %v1031_v36, %v963_v39 }
 0x240   : > { %v749_v57 = vperm.slane %v743_v53, %v3336_v14  ;;  %v766_v58 = vrot.slane %v753_v50, 4  ;;  %v769_v59 = vsel %vm674_vm8, %v753_v50, %v768_v43  ;;  %v1155_v60 = vsel %vm674_vm8, %v1154_v51, %v3314_v2 }
 0x241   : > { %v777_v61 = vperm.slane %v769_v59, %v3346_v28  ;;  %v3427_v40 = vperm.slane %v1155_v60, %v3336_v14  ;;  %v1192_v62 = vrot.slane %v3417_v54, 4  ;;  %v1030_v63 = vperm.slane %v1026_v55, %v3336_v14 }
 0x242   : > { %v754_v0 = vrot.slane %v749_v57, 4  ;;  %v757_v4 = vsel %vm674_vm8, %v749_v57, %v756_v1  ;;  %v767_v5 = vsel %vm674_vm8, %v766_v58, %v741_v34  ;;  %v1036_v8 = vperm.slane %v1032_v56, %v3336_v14 }
 0x243   : > { %v765_v11 = vperm.slane %v757_v4, %v3346_v28  ;;  %v773_v2 = vperm.slane %v767_v5, %v3346_v28  ;;  %v784_v13 = vrot.slane %v777_v61, 4  ;;  %v1180_v15 = vrot.slane %v3427_v40, 4 }
 0x244   : > { %v755_v21 = vsel %vm674_vm8, %v754_v0, %v737_v42  ;;  %v1043_v22 = vsel %vm674_vm8, %v1042_v47, %v967_v30  ;;  %v1050_v23 = vrot.slane %v1030_v63, 4  ;;  %v1062_v24 = vrot.slane %v1041_v46, 4  ;;  %v1149_v33 = vpop.permute.xlu2 %1148 }
 0x245   : > { %v3440_v25 = vperm.slane %v755_v21, %v3346_v28  ;;  %v3442_v26 = vrot.slane %v765_v11, 4  ;;  %v782_v27 = vrot.slane %v773_v2, 4  ;;  %v3445_v29 = vsel %vm674_vm8, 0.0, %v784_v13 }
 0x246   : > { %v851_v34 = vsel %vm674_vm8, %v784_v13, %v773_v2  ;;  %v856_v36 = vrot.slane %v3445_v29, 4  ;;  %v1047_v37 = vperm.slane %v1043_v22, %v3336_v14  ;;  %v1051_v30 = vsel %vm674_vm8, %v1036_v8, %v1050_v23 }
 0x247   : > { %v778_v39 = vrot.slane %v3440_v25, 4  ;;  %v3454_v31 = vsel %vm674_vm8, 0.0, %v3442_v26  ;;  %v3457_v41 = vsel %vm674_vm8, 0.0, %v782_v27  ;;  %v3460_v42 = vperm.slane %v851_v34, %v3336_v14 }
 0x248   : > { %v845_v43 = vrot.slane %v3454_v31, 4  ;;  %v1059_v44 = vperm.slane %v1051_v30, %v3346_v28  ;;  %v1063_v45 = vsel %vm674_vm8, %v1047_v37, %v1062_v24  ;;  %v1048_v47 = vrot.slane %v1036_v8, 4 }
 0x249   : > { %v1071_v48 = vperm.slane %v1063_v45, %v3346_v28  ;;  %v1060_v49 = vrot.slane %v1047_v37, 4  ;;  %v1166_v1 = vrot.slane %v1149_v33, 4  ;;  %v1169_v50 = vsel %vm674_vm8, %v1149_v33, %v1168_v38 }
 0x24a   : > { %v1078_v51 = vrot.slane %v1059_v44, 4  ;;  %v1049_v52 = vsel %vm674_vm8, %v1048_v47, %v1030_v63  ;;  %v1177_v53 = vperm.slane %v1169_v50, %v3336_v14  ;;  %v723_v55 = vsel %vm674_vm8, 0.0, %v722_v16 }
 0x24b   : > { %v1076_v56 = vrot.slane %v1071_v48, 4  ;;  %v1055_v57 = vperm.slane %v1049_v52, %v3346_v28  ;;  %v1061_v58 = vsel %vm674_vm8, %v1060_v49, %v1041_v46  ;;  %v1167_v59 = vsel %vm674_vm8, %v1166_v1, %v3400_v35 }
 0x24c   : > { %v1067_v60 = vperm.slane %v1061_v58, %v3346_v28  ;;  %v1079_v38 = vsel %vm674_vm8, %v1071_v48, %v1078_v51  ;;  %v1173_v61 = vperm.slane %v1167_v59, %v3336_v14  ;;  %v1190_v63 = vrot.slane %v1177_v53, 4  ;;  %v905_v17 = vpop.permute.xlu2 %904 }
 0x24d   : > { %v1077_v0 = vsel %vm674_vm8, %v1076_v56, %v1059_v44  ;;  %2740 = vmatpush.xpose.msk.msra.mxu1 %vm1383_vm9, %v1079_v38  ;;  %v1193_v16 = vsel %vm674_vm8, %v1177_v53, %v1192_v62  ;;  %v786_v46 = vsel %vm674_vm8, %v3374_v7, %v3372_v6  ;;  %v792_v35 = vsel %vm674_vm8, %v791_v20, %v723_v55  ;;  %v3496_v7 = vpop.permute.xlu0 %898 }
 0x24e   : > { %2737 = vmatpush.xpose.msk.msra.mxu0 %vm1383_vm9, %v1077_v0  ;;  %v1072_v4 = vrot.slane %v1067_v60, 4  ;;  %v1178_v5 = vrot.slane %v1173_v61, 4  ;;  %v1181_v8 = vsel %vm674_vm8, %v1173_v61, %v1180_v15  ;;  %v1191_v11 = vsel %vm674_vm8, %v1190_v63, %v3417_v54 }
 0x24f   : > { %v1189_v2 = vperm.slane %v1181_v8, %v3346_v28  ;;  %v1197_v62 = vperm.slane %v1191_v11, %v3346_v28  ;;  %v1201_v13 = vperm.slane %v1193_v16, %v3346_v28  ;;  %v790_v6 = vperm.slane %v786_v46, %v3336_v14 }
 0x250   : > { %v1073_v20 = vsel %vm674_vm8, %v1072_v4, %v1055_v57  ;;  %v1179_v21 = vsel %vm674_vm8, %v1178_v5, %v3427_v40  ;;  %v796_v15 = vperm.slane %v792_v35, %v3336_v14  ;;  %v803_v54 = vsel %vm674_vm8, %v802_v12, %v3389_v18 }
 0x251   : > { %2731 = vmatpush.xpose.msk.msra.mxu3 %vm1383_vm9, %v1073_v20  ;;  %v3508_v22 = vperm.slane %v1179_v21, %v3346_v28  ;;  %v3510_v23 = vrot.slane %v1189_v2, 4  ;;  %v1206_v24 = vrot.slane %v1197_v62, 4  ;;  %v1208_v27 = vrot.slane %v1201_v13, 4 }
 0x252   : > { %v807_v33 = vperm.slane %v803_v54, %v3336_v14  ;;  %v810_v34 = vrot.slane %v790_v6, 4  ;;  %v822_v40 = vrot.slane %v3392_v19, 4  ;;  %v984_v37 = vrot.slane %v3496_v7, 4 }
 0x253   : > { %v3517_v9 = vsel %vm674_vm8, 0.0, %v3510_v23  ;;  %v3520_v12 = vsel %vm674_vm8, 0.0, %v1206_v24  ;;  %v3523_v18 = vsel %vm674_vm8, 0.0, %v1208_v27  ;;  %v1277_v30 = vsel %vm674_vm8, %v1208_v27, %v1197_v62 }
 0x254   : > { %v1271_v44 = vrot.slane %v3517_v9, 4  ;;  %v3528_v45 = vperm.slane %v1277_v30, %v3336_v14  ;;  %v1282_v47 = vrot.slane %v3523_v18, 4  ;;  %v811_v48 = vsel %vm674_vm8, %v796_v15, %v810_v34  ;;  %v911_v4 = vpop.permute.xlu2 %910 }
 0x255   : > { %v819_v49 = vperm.slane %v811_v48, %v3346_v28  ;;  %v823_v1 = vsel %vm674_vm8, %v807_v33, %v822_v40  ;;  %v1074_v50 = vrot.slane %v1055_v57, 4  ;;  %v808_v51 = vrot.slane %v796_v15, 4 }
 0x256   : > { %v831_v52 = vperm.slane %v823_v1, %v3346_v28  ;;  %v820_v53 = vrot.slane %v807_v33, 4  ;;  %v970_v55 = vrot.slane %v905_v17, 4  ;;  %v973_v56 = vsel %vm674_vm8, %v905_v17, %v972_v32 }
 0x257   : > { %v838_v58 = vrot.slane %v819_v49, 4  ;;  %v1075_v59 = vsel %vm674_vm8, %v1067_v60, %v1074_v50  ;;  %v809_v38 = vsel %vm674_vm8, %v808_v51, %v790_v6  ;;  %v981_v61 = vperm.slane %v973_v56, %v3336_v14 }
 0x258   : > { %v836_v63 = vrot.slane %v831_v52, 4  ;;  %2734 = vmatpush.xpose.msk.msrb.mxu3 %vm1383_vm9, %v1075_v59  ;;  %v3543_v57 = vperm.slane %v809_v38, %v3346_v28  ;;  %v821_v0 = vsel %vm674_vm8, %v820_v53, %v3392_v19  ;;  %v971_v16 = vsel %vm674_vm8, %v970_v55, %v3321_v3 }
 0x259   : > { %v3550_v32 = vperm.slane %v821_v0, %v3346_v28  ;;  %v3553_v60 = vsel %vm674_vm8, %v831_v52, %v838_v58  ;;  %v977_v46 = vperm.slane %v971_v16, %v3336_v14  ;;  %v1008_v35 = vrot.slane %v981_v61, 4 }
 0x25a   : > { %v3557_v5 = vsel %vm674_vm8, %v836_v63, %v819_v49  ;;  %2741 = vmatmul.msk.f32.vlgmr.msra.gmra.mxu1 %vm1383_vm9, %v3553_v60  ;;  %v779_v3 = vsel %vm674_vm8, 0.0, %v778_v39  ;;  %v840_v19 = vsel %vm674_vm8, %v3442_v26, %v3440_v25  ;;  %v857_v8 = vsel %vm674_vm8, %v856_v36, %v3457_v41 }
 0x25b   : > { %2738 = vmatmul.msk.f32.vlgmr.msra.gmra.mxu0 %vm1383_vm9, %v3557_v5  ;;  %v832_v11 = vrot.slane %v3550_v32, 4  ;;  %v996_v2 = vrot.slane %v977_v46, 4  ;;  %v844_v62 = vperm.slane %v840_v19, %v3336_v14  ;;  %v846_v39 = vsel %vm674_vm8, %v845_v43, %v779_v3 }
 0x25c   : > { %v850_v13 = vperm.slane %v846_v39, %v3336_v14  ;;  %v861_v25 = vperm.slane %v857_v8, %v3336_v14  ;;  %v876_v26 = vrot.slane %v3460_v42, 4  ;;  %v982_v29 = vrot.slane %v911_v4, 4 }
 0x25d   : > { %v3583_v36 = vsel %vm674_vm8, %v832_v11, %v3543_v57  ;;  %v864_v41 = vrot.slane %v844_v62, 4  ;;  %v985_v6 = vsel %vm674_vm8, %v911_v4, %v984_v37  ;;  %v1202_v17 = vrot.slane %v3508_v22, 4 }
 0x25e   : > { %2732 = vmatmul.msk.f32.vlgmr.msra.gmra.mxu3 %vm1383_vm9, %v3583_v36  ;;  %v877_v31 = vsel %vm674_vm8, %v861_v25, %v876_v26  ;;  %v862_v43 = vrot.slane %v850_v13, 4  ;;  %v874_v20 = vrot.slane %v861_v25, 4  ;;  %v983_v21 = vsel %vm674_vm8, %v982_v29, %v3496_v7 }
 0x25f   : > { %v865_v15 = vsel %vm674_vm8, %v850_v13, %v864_v41  ;;  %v885_v54 = vperm.slane %v877_v31, %v3346_v28  ;;  %v989_v24 = vperm.slane %v983_v21, %v3336_v14  ;;  %v993_v27 = vperm.slane %v985_v6, %v3336_v14 }
 0x260   : > { %v873_v33 = vperm.slane %v865_v15, %v3346_v28  ;;  %v863_v34 = vsel %vm674_vm8, %v862_v43, %v844_v62  ;;  %v875_v40 = vsel %vm674_vm8, %v874_v20, %v3460_v42  ;;  %v1203_v37 = vsel %vm674_vm8, 0.0, %v1202_v17 }
 0x261   : > { %v890_v30 = vrot.slane %v885_v54, 4  ;;  %v3602_v7 = vperm.slane %v863_v34, %v3346_v28  ;;  %v3605_v48 = vperm.slane %v875_v40, %v3346_v28  ;;  %v994_v49 = vrot.slane %v989_v24, 4 }
 0x262   : > { %v892_v1 = vrot.slane %v873_v33, 4  ;;  %v997_v50 = vsel %vm674_vm8, %v989_v24, %v996_v2  ;;  %v1006_v51 = vrot.slane %v993_v27, 4  ;;  %v1009_v52 = vsel %vm674_vm8, %v993_v27, %v1008_v35 }
 0x263   : > { %v3610_v53 = vsel %vm674_vm8, %v890_v30, %v873_v33  ;;  %v886_v42 = vrot.slane %v3605_v48, 4  ;;  %v995_v55 = vsel %vm674_vm8, %v994_v49, %v977_v46  ;;  %v1005_v56 = vperm.slane %v997_v50, %v3346_v28 }
 0x264   : > { %2739 = vmatmul.msk.f32.gmra.mxu0 %vm1383_vm9, %v3610_v53  ;;  %v3618_v58 = vsel %vm674_vm8, %v885_v54, %v892_v1  ;;  %v1001_v59 = vperm.slane %v995_v55, %v3346_v28  ;;  %v1007_v38 = vsel %vm674_vm8, %v1006_v51, %v981_v61  ;;  %v1017_v63 = vperm.slane %v1009_v52, %v3346_v28 }
 0x265   : > { %v3625_v0 = vsel %vm674_vm8, %v886_v42, %v3602_v7  ;;  %2742 = vmatmul.msk.f32.gmra.mxu1 %vm1383_vm9, %v3618_v58  ;;  %v1013_v16 = vperm.slane %v1007_v38, %v3346_v28  ;;  %v1020_v46 = vrot.slane %v1005_v56, 4  ;;  %v1266_v35 = vsel %vm674_vm8, %v3510_v23, %v3508_v22 }
 0x266   : > { %2733 = vmatmul.msk.f32.gmra.mxu3 %vm1383_vm9, %v3625_v0  ;;  %v1018_v61 = vrot.slane %v1001_v59, 4  ;;  %v1024_v4 = vrot.slane %v1017_v63, 4  ;;  %v1270_v3 = vperm.slane %v1266_v35, %v3336_v14  ;;  %v1272_v19 = vsel %vm674_vm8, %v1271_v44, %v1203_v37 }
 0x267   : > { %v1021_v8 = vsel %vm674_vm8, 0.0, %v1020_v46  ;;  %v1022_v11 = vrot.slane %v1013_v16, 4  ;;  %v1276_v2 = vperm.slane %v1272_v19, %v3336_v14  ;;  %v1080_v23 = vsel %vm674_vm8, %v1020_v46, %v1001_v59 }
 0x268   : > { %v1019_v62 = vsel %vm674_vm8, 0.0, %v1018_v61  ;;  %v1025_v22 = vsel %vm674_vm8, 0.0, %v1024_v4  ;;  %v1091_v39 = vsel %vm674_vm8, %v1024_v4, %v1013_v16  ;;  %v1283_v44 = vsel %vm674_vm8, %v1282_v47, %v3520_v12 }
 0x269   : > { %v1023_v13 = vsel %vm674_vm8, 0.0, %v1022_v11  ;;  %v1095_v25 = vperm.slane %v1091_v39, %v3336_v14  ;;  %v1096_v9 = vrot.slane %v1025_v22, 4  ;;  %v1287_v26 = vperm.slane %v1283_v44, %v3336_v14 }
 0x26a   : > { %v1288_v29 = vrot.slane %v1276_v2, 4  ;;  %v1290_v41 = vrot.slane %v1270_v3, 4  ;;  %v1302_v6 = vrot.slane %v3528_v45, 4  ;;  %v1085_v17 = vrot.slane %v1021_v8, 4 }
 0x26b   : > { %v1097_v31 = vsel %vm674_vm8, %v1096_v9, %v1023_v13  ;;  %v1116_v43 = vrot.slane %v1095_v25, 4  ;;  %v834_v20 = vrot.slane %v3543_v57, 4  ;;  %v1300_v54 = vrot.slane %v1287_v26, 4 }
 0x26c   : > { %v1101_v21 = vperm.slane %v1097_v31, %v3336_v14  ;;  %v1291_v15 = vsel %vm674_vm8, %v1276_v2, %v1290_v41  ;;  %v1303_v18 = vsel %vm674_vm8, %v1287_v26, %v1302_v6  ;;  %v1289_v27 = vsel %vm674_vm8, %v1288_v29, %v1270_v3 }
 0x26d   : > { %v1299_v12 = vperm.slane %v1291_v15, %v3346_v28  ;;  %v1311_v47 = vperm.slane %v1303_v18, %v3346_v28  ;;  %v3662_v24 = vsel %vm674_vm8, %v3550_v32, %v834_v20  ;;  %v1295_v57 = vperm.slane %v1289_v27, %v3346_v28 }
 0x26e   : > { %2735 = vmatmul.msk.f32.vlgmr.msrb.gmra.mxu3 %vm1383_vm9, %v3662_v24  ;;  %v1301_v33 = vsel %vm674_vm8, %v1300_v54, %v3528_v45  ;;  %v888_v34 = vrot.slane %v3602_v7, 4  ;;  %v1084_v40 = vperm.slane %v1080_v23, %v3336_v14  ;;  %v1086_v32 = vsel %vm674_vm8, %v1085_v17, %v1019_v62 }
 0x26f   : > { %v1316_v37 = vrot.slane %v1311_v47, 4  ;;  %v1318_v30 = vrot.slane %v1299_v12, 4  ;;  %v1307_v49 = vperm.slane %v1301_v33, %v3346_v28  ;;  %v1314_v1 = vrot.slane %v1295_v57, 4 }
 0x270   : > { %v1090_v50 = vperm.slane %v1086_v32, %v3336_v14  ;;  %v1104_v51 = vrot.slane %v1084_v40, 4  ;;  %v1117_v52 = vsel %vm674_vm8, %v1101_v21, %v1116_v43  ;;  %v1114_v63 = vrot.slane %v1101_v21, 4 }
 0x271   : > { %v1317_v42 = vsel %vm674_vm8, %v1316_v37, %v1299_v12  ;;  %v1312_v55 = vrot.slane %v1307_v49, 4  ;;  %v1319_v45 = vsel %vm674_vm8, %v1311_v47, %v1318_v30  ;;  %v1125_v7 = vperm.slane %v1117_v52, %v3346_v28 }
 0x272   : > { %1663 = vmatpush.msrb.mxu0 %v1317_v42  ;;  %1692 = vmatpush.msrb.mxu1 %v1319_v45  ;;  %v1315_v56 = vsel %vm674_vm8, %v1307_v49, %v1314_v1  ;;  %v1105_v59 = vsel %vm674_vm8, %v1090_v50, %v1104_v51  ;;  %v1102_v38 = vrot.slane %v1090_v50, 4  ;;  %v3685_v61 = vsel %vm674_vm8, %v3605_v48, %v888_v34  ;;  %v3718_v42 = vpop.f32.mrf.mxu2 }
 0x273   : > { %v1313_v16 = vsel %vm674_vm8, %v1312_v55, %v1295_v57  ;;  %1634 = vmatpush.msra.mxu3 %v1315_v56  ;;  %v1113_v46 = vperm.slane %v1105_v59, %v3346_v28  ;;  %v1130_v35 = vrot.slane %v1125_v7, 4  ;;  %v1115_v3 = vsel %vm674_vm8, %v1114_v63, %v1095_v25 }
 0x274   : > { %1605 = vmatpush.msra.mxu2 %v1313_v16  ;;  %v1103_v4 = vsel %vm674_vm8, %v1102_v38, %v1084_v40  ;;  %v1121_v11 = vperm.slane %v1115_v3, %v3346_v28  ;;  %v1374_v13 = vlaneseq  ;;  %v3084_v44 = vmov -1e+30  }
 0x275   : > { %v1131_v19 = vsel %vm674_vm8, %v1130_v35, %v1113_v46  ;;  %v1109_v8 = vperm.slane %v1103_v4, %v3346_v28  ;;  %v1132_v2 = vrot.slane %v1113_v46, 4 }
 0x276   : > { %2736 = vmatmul.msk.f32.gmra.mxu3 %vm1383_vm9, %v3685_v61  ;;  %2757 = vmatpush.xpose.msk.msra.mxu0 %vm1383_vm9, %v1131_v19  ;;  %v1126_v62 = vrot.slane %v1121_v11, 4  ;;  %v1375_v25 = vshrl.u32 %v1374_v13, 7  ;;  %v3701_v9 = vand.u32 127, %v1374_v13 }
 0x277   : > { %v1133_v48 = vsel %vm674_vm8, %v1125_v7, %v1132_v2  ;;  %v1128_v22 = vrot.slane %v1109_v8, 4 }
 0x278   : > { %2760 = vmatpush.xpose.msk.msra.mxu1 %vm1383_vm9, %v1133_v48  ;;  %v1127_v23 = vsel %vm674_vm8, %v1126_v62, %v1109_v8  ;;  %vm1379_vm10 = vcmp.le.s32.totalorder %v3701_v9, %v1375_v25  ;;  %v3705_v6 = vadd.s32 8, %v1375_v25 }
 0x279   : > { %v1129_v39 = vsel %vm674_vm8, %v1121_v11, %v1128_v22  ;;  %2751 = vmatpush.xpose.msk.msrb.mxu2 %vm1383_vm9, %v1127_v23  ;;  %v1381_v26 = vsel %vm1379_vm10, 0.0, %v3084_v44 }
 0x27a   : > { %2754 = vmatpush.xpose.msk.msrb.mxu3 %vm1383_vm9, %v1129_v39  ;;  %vm1380_vm11 = vcmp.le.s32.totalorder %v3701_v9, %v3705_v6 }
 0x27b   : > { %v1382_v20 = vsel %vm1380_vm11, 0.0, %v3084_v44 }
 0x2d7   : > { %v1506_v57 = vpop.f32.mrf.mxu1 }
 0x2d8   : > { %v1474_v31 = vpop.f32.mrf.mxu0  ;;  %v1507_v33 = vadd.f32 %v1506_v57, %v1381_v26 }
 0x2d9   : > { %v1475_v43 = vadd.f32 %v1474_v31, %v1381_v26 }
 0x2da   : > { %v1530_v30 = vsel %vm1383_vm9, %v1507_v33, -inf }
 0x2db   : > { %v1524_v54 = vsel %vm1383_vm9, %v1475_v43, -inf }
 0x2e1   : > { %v1410_v29 = vpop.f32.mrf.mxu3  ;;  %v1477_v49 = vpop.f32.mrf.mxu0 }
 0x2e2   : > { %v1411_v41 = vadd.f32 %v1410_v29, %v1381_v26  ;;  %v1509_v32 = vpop.f32.mrf.mxu1  ;;  %v1478_v1 = vadd.f32 %v1477_v49, %v1382_v20 }
 0x2e3   : > { %v1510_v50 = vadd.f32 %v1509_v32, %v1382_v20 }
 0x2e4   : > { %v1512_v17 = vsel %vm1383_vm9, %v1411_v41, -inf  ;;  %v1527_v51 = vsel %vm1383_vm9, %v1478_v1, -inf }
 0x2e5   : > { %1513 = vmax.xlane.f32.xlu1 %v1512_v17  ;;  %v1533_v52 = vsel %vm1383_vm9, %v1510_v50, -inf }
 0x2e9   : > { %v1413_v21 = vpop.f32.mrf.mxu3 }
 0x2ea   : > { %v1414_v15 = vadd.f32 %v1413_v21, %v1382_v20 }
 0x2ec   : > { %v1515_v18 = vsel %vm1383_vm9, %v1414_v15, -inf }
 0x2ed   : > { %1525 = vmax.xlane.f32.xlu1 %v1524_v54  ;;  %1516 = vmax.xlane.f32.xlu2 %v1515_v18 }
 0x2f1   : > { %v1442_v12 = vpop.f32.mrf.mxu3 }
 0x2f2   : > { %v1443_v47 = vadd.f32 %v1442_v12, %v1381_v26 }
 0x2f4   : > { %v1518_v27 = vsel %vm1383_vm9, %v1443_v47, -inf }
 0x2f5   : > { %1519 = vmax.xlane.f32.xlu0 %v1518_v27  ;;  %v1212_v27 = vrot.slane %v3718_v42, 4 }
 0x2f9   : > { %v1445_v34 = vpop.f32.mrf.mxu3 }
 0x2fa   : > { %v1446_v40 = vadd.f32 %v1445_v34, %v1382_v20 }
 0x2fc   : > { %v1521_v37 = vsel %vm1383_vm9, %v1446_v40, -inf }
 0x2fd   : > { %1522 = vmax.xlane.f32.xlu1 %v1521_v37  ;;  %1531 = vmax.xlane.f32.xlu0 %v1530_v30 }
 0x305   : > { %1528 = vmax.xlane.f32.xlu1 %v1527_v51  ;;  %1534 = vmax.xlane.f32.xlu0 %v1533_v52 }
 0x306   : > { %1138 = vrot.lane.b32.xlu2 %v3718_v42, %s3079_s19  ;;  %s3022_s19 = scalar_lea.hbm %s4392_s14, 32 }
 0x319   : > { %1150 = vrot.lane.b32.xlu0 %v3718_v42, %s3080_s15 }
 0x31e   : > { %1144 = vrot.lane.b32.xlu1 %v3718_v42, %s3081_s22  ;;  %s2626_s22 = scalar_lea.hbm %s4392_s14, %s2781_s27 }
 0x358   : > { %v3726_v55 = vpop.xlane.xlu1 %1513 }
 0x359   : > { %v1536_v45 = vsub.f32 %v1411_v41, %v3726_v55 }
 0x35b   : > { %v1544_v7 = vmul.f32 1.442695, %v1536_v45 }
 0x35d   : > { %2872 = vpow2.f32 %v1544_v7 }
 0x360   : > { %v3729_v56 = vpop.xlane.xlu1 %1525  ;;  %v3731_v59 = vpop.xlane.xlu2 %1516 }
 0x361   : > { %v1540_v38 = vsub.f32 %v1475_v43, %v3729_v56  ;;  %v1537_v63 = vsub.f32 %v1414_v15, %v3731_v59 }
 0x363   : > { %v3735_v16 = vpop.eup %2872  ;;  %v1552_v46 = vmul.f32 1.442695, %v1540_v38  ;;  %v1546_v35 = vmul.f32 1.442695, %v1537_v63 }
 0x364   : > { %2743 = vmatmul.msk.f32.vlgmr.msra.gmra.mxu2 %vm1383_vm9, %v3735_v16 }
 0x365   : > { %2874 = vpow2.f32 %v1552_v46 }
 0x366   : > { %2876 = vpow2.f32 %v1546_v35 }
 0x368   : > { %v3739_v4 = vpop.xlane.xlu0 %1519  ;;  %v1139_v15 = vpop.permute.xlu2 %1138 }
 0x369   : > { %v1538_v3 = vsub.f32 %v1443_v47, %v3739_v4  ;;  %v1224_v54 = vrot.slane %v1139_v15, 4 }
 0x36b   : > { %v3742_v19 = vpop.eup %2874  ;;  %v1548_v8 = vmul.f32 1.442695, %v1538_v3 }
 0x36c   : > { %v3744_v11 = vpop.eup %2876  ;;  %2747 = vmatmul.msk.f32.vlgmr.msrb.gmra.mxu0 %vm1383_vm9, %v3742_v19 }
 0x36d   : > { %2878 = vpow2.f32 %v1548_v8  ;;  %2744 = vmatmul.msk.f32.gmra.mxu2 %vm1383_vm9, %v3744_v11 }
 0x370   : > { %v3750_v2 = vpop.xlane.xlu1 %1522  ;;  %v3752_v62 = vpop.xlane.xlu0 %1531 }
 0x371   : > { %v1539_v48 = vsub.f32 %v1446_v40, %v3750_v2  ;;  %v1542_v22 = vsub.f32 %v1507_v33, %v3752_v62 }
 0x373   : > { %v3756_v23 = vpop.eup %2878  ;;  %v1550_v39 = vmul.f32 1.442695, %v1539_v48  ;;  %v1556_v13 = vmul.f32 1.442695, %v1542_v22 }
 0x374   : > { %2745 = vmatmul.msk.f32.vlgmr.msra.gmra.mxu3 %vm1383_vm9, %v3756_v23 }
 0x375   : > { %2880 = vpow2.f32 %v1550_v39  ;;  %2752 = vmatmul.msk.f32.vlgmr.msrb.gmra.mxu2 %vm1383_vm9, %v3583_v36 }
 0x376   : > { %2882 = vpow2.f32 %v1556_v13 }
 0x378   : > { %v3762_v25 = vpop.xlane.xlu1 %1528  ;;  %v3764_v26 = vpop.xlane.xlu0 %1534 }
 0x379   : > { %v1541_v29 = vsub.f32 %v1478_v1, %v3762_v25  ;;  %v1543_v41 = vsub.f32 %v1510_v50, %v3764_v26 }
 0x37b   : > { %v3768_v17 = vpop.eup %2880  ;;  %v1554_v31 = vmul.f32 1.442695, %v1541_v29  ;;  %v1558_v43 = vmul.f32 1.442695, %v1543_v41 }
 0x37c   : > { %v3770_v20 = vpop.eup %2882  ;;  %2746 = vmatmul.msk.f32.gmra.mxu3 %vm1383_vm9, %v3768_v17 }
 0x37d   : > { %2884 = vpow2.f32 %v1554_v31  ;;  %2749 = vmatmul.msk.f32.vlgmr.msrb.gmra.mxu1 %vm1383_vm9, %v3770_v20  ;;  %2753 = vmatmul.msk.f32.gmra.mxu2 %vm1383_vm9, %v3625_v0 }
 0x37e   : > { %2886 = vpow2.f32 %v1558_v43 }
 0x383   : > { %v3778_v36 = vpop.eup %2884 }
 0x384   : > { %v3780_v21 = vpop.eup %2886  ;;  %2748 = vmatmul.msk.f32.gmra.mxu0 %vm1383_vm9, %v3778_v36  ;;  %2755 = vmatmul.msk.f32.vlgmr.msrb.gmra.mxu3 %vm1383_vm9, %v3662_v24 }
 0x385   : > { %2750 = vmatmul.msk.f32.gmra.mxu1 %vm1383_vm9, %v3780_v21 }
 0x38b   : > { %v1151_v18 = vpop.permute.xlu0 %1150 }
 0x38c   : > { %v1222_v12 = vrot.slane %v1151_v18, 4  ;;  %v1225_v0 = vsel %vm674_vm8, %v1151_v18, %v1224_v54  ;;  %2756 = vmatmul.msk.f32.gmra.mxu3 %vm1383_vm9, %v3685_v61  ;;  %2758 = vmatmul.msk.f32.vlgmr.msra.gmra.mxu0 %vm1383_vm9, %v3557_v5 }
 0x38d   : > { %2761 = vmatmul.msk.f32.vlgmr.msra.gmra.mxu1 %vm1383_vm9, %v3553_v60  ;;  %v1233_v47 = vperm.slane %v1225_v0, %v3336_v14 }
 0x38e   : > { %v1223_v24 = vsel %vm674_vm8, %v1222_v12, %v1139_v15 }
 0x38f   : > { %v1229_v57 = vperm.slane %v1223_v24, %v3336_v14  ;;  %v1246_v37 = vrot.slane %v1233_v47, 4 }
 0x390   : > { %v1145_v33 = vpop.permute.xlu1 %1144 }
 0x391   : > { %v1210_v34 = vrot.slane %v1145_v33, 4  ;;  %v1213_v40 = vsel %vm674_vm8, %v1145_v33, %v1212_v27  ;;  %v1234_v30 = vrot.slane %v1229_v57, 4 }
 0x392   : > { %v1221_v61 = vperm.slane %v1213_v40, %v3336_v14 }
 0x393   : > { %v1211_v5 = vsel %vm674_vm8, %v1210_v34, %v3718_v42 }
 0x394   : > { %v1217_v60 = vperm.slane %v1211_v5, %v3336_v14  ;;  %v1247_v49 = vsel %vm674_vm8, %v1246_v37, %v1221_v61  ;;  %v1248_v32 = vrot.slane %v1221_v61, 4  ;;  %2759 = vmatmul.msk.f32.gmra.mxu0 %vm1383_vm9, %v3610_v53 }
 0x395   : > { %v1253_v1 = vperm.slane %v1247_v49, %v3346_v28  ;;  %2762 = vmatmul.msk.f32.gmra.mxu1 %vm1383_vm9, %v3618_v58 }
 0x396   : > { %v1235_v50 = vsel %vm674_vm8, %v1234_v30, %v1217_v60  ;;  %v1236_v51 = vrot.slane %v1217_v60, 4  ;;  %v1249_v52 = vsel %vm674_vm8, %v1233_v47, %v1248_v32 }
 0x397   : > { %v1241_v42 = vperm.slane %v1235_v50, %v3346_v28  ;;  %v1257_v45 = vperm.slane %v1249_v52, %v3346_v28  ;;  %v1262_v63 = vrot.slane %v1253_v1, 4 }
 0x398   : > { %v1237_v7 = vsel %vm674_vm8, %v1229_v57, %v1236_v51 }
 0x399   : > { %v1245_v38 = vperm.slane %v1237_v7, %v3346_v28  ;;  %v1264_v53 = vrot.slane %v1257_v45, 4  ;;  %v1258_v46 = vrot.slane %v1241_v42, 4  ;;  %v1263_v39 = vsel %vm674_vm8, 0.0, %v1262_v63 }
 0x39b   : > { %v1260_v35 = vrot.slane %v1245_v38, 4  ;;  %v1265_v3 = vsel %vm674_vm8, 0.0, %v1264_v53  ;;  %v1331_v58 = vsel %vm674_vm8, %v1264_v53, %v1253_v1  ;;  %v1259_v15 = vsel %vm674_vm8, 0.0, %v1258_v46 }
 0x39c   : > { %v1335_v8 = vperm.slane %v1331_v58, %v3336_v14  ;;  %v1336_v48 = vrot.slane %v1265_v3, 4 }
 0x39d   : > { %v1261_v22 = vsel %vm674_vm8, 0.0, %v1260_v35  ;;  %v1320_v13 = vsel %vm674_vm8, %v1260_v35, %v1241_v42 }
 0x39e   : > { %v1325_v29 = vrot.slane %v1261_v22, 4  ;;  %v1337_v41 = vsel %vm674_vm8, %v1336_v48, %v1263_v39  ;;  %v1324_v31 = vperm.slane %v1320_v13, %v3336_v14  ;;  %v1356_v43 = vrot.slane %v1335_v8, 4 }
 0x39f   : > { %v1341_v54 = vperm.slane %v1337_v41, %v3336_v14  ;;  %v1700_v48 = vadd.s32 8, %v3701_v9 }
 0x3a0   : > { %v1326_v18 = vsel %vm674_vm8, %v1325_v29, %v1259_v15  ;;  %v1344_v12 = vrot.slane %v1324_v31, 4 }
 0x3a1   : > { %v1330_v0 = vperm.slane %v1326_v18, %v3336_v14  ;;  %v1357_v24 = vsel %vm674_vm8, %v1341_v54, %v1356_v43  ;;  %v1354_v47 = vrot.slane %v1341_v54, 4  ;;  %vm1702_vm12 = vcmp.le.s32.totalorder %v1700_v48, %v3705_v6 }
 0x3a2   : > { %v1365_v27 = vperm.slane %v1357_v24, %v3346_v28  ;;  %v1704_v43 = vsel %vm1702_vm12, 0.0, %v3084_v44 }
 0x3a3   : > { %v1345_v57 = vsel %vm674_vm8, %v1330_v0, %v1344_v12  ;;  %v1342_v33 = vrot.slane %v1330_v0, 4  ;;  %v1355_v34 = vsel %vm674_vm8, %v1354_v47, %v1335_v8 }
 0x3a4   : > { %v1353_v40 = vperm.slane %v1345_v57, %v3346_v28  ;;  %v1370_v37 = vrot.slane %v1365_v27, 4  ;;  %v1361_v61 = vperm.slane %v1355_v34, %v3346_v28 }
 0x3a5   : > { %v1343_v5 = vsel %vm674_vm8, %v1342_v33, %v1324_v31 }
 0x3a6   : > { %v1371_v30 = vsel %vm674_vm8, %v1370_v37, %v1353_v40  ;;  %v1349_v60 = vperm.slane %v1343_v5, %v3346_v28  ;;  %v1366_v49 = vrot.slane %v1361_v61, 4  ;;  %v1372_v32 = vrot.slane %v1353_v40, 4 }
 0x3a7   : > { %2016 = vmatpush.msrb.mxu0 %v1371_v30  ;;  %v1572_v37 = vsel %vm1383_vm9, %v3742_v19, 0.0  ;;  %v1578_v5 = vsel %vm1383_vm9, %v3770_v20, 0.0  ;;  %v1563_v30 = vsel %vm1383_vm9, %v3744_v11, 0.0  ;;  %v1575_v19 = vsel %vm1383_vm9, %v3778_v36, 0.0 }
 0x3a8   : > { %v1367_v1 = vsel %vm674_vm8, %v1366_v49, %v1349_v60  ;;  %v1373_v50 = vsel %vm674_vm8, %v1365_v27, %v1372_v32  ;;  %v1368_v51 = vrot.slane %v1349_v60, 4  ;;  %v1566_v60 = vsel %vm1383_vm9, %v3756_v23, 0.0 }
 0x3a9   : > { %1958 = vmatpush.msra.mxu2 %v1367_v1  ;;  %2045 = vmatpush.msrb.mxu1 %v1373_v50 }
 0x3aa   : > { %v1369_v52 = vsel %vm674_vm8, %v1361_v61, %v1368_v51  ;;  %v1560_v61 = vsel %vm1383_vm9, %v3735_v16, 0.0  ;;  %v1581_v16 = vsel %vm1383_vm9, %v3780_v21, 0.0 }
 0x3ab   : > { %1987 = vmatpush.msra.mxu3 %v1369_v52 }
 0x3e7   : > { %v3840_v42 = vpop.f32.mrf.mxu2 }
 0x3e9   : > { %v3846_v63 = vpop.f32.mrf.mxu0 }
 0x3f0   : > { %v3842_v45 = vpop.f32.mrf.mxu2 }
 0x3f7   : > { %v3844_v7 = vpop.f32.mrf.mxu3 }
 0x3f8   : > { %v1725_v38 = vpop.f32.mrf.mxu2 }
 0x3f9   : > { %v1726_v53 = vadd.f32 -1e+30, %v1725_v38 }
 0x3fa   : > { %v3848_v46 = vpop.f32.mrf.mxu1 }
 0x3fb   : > { %v1809_v35 = vsel %vm1383_vm9, %v1726_v53, -inf }
 0x3fc   : > { %1810 = vmax.xlane.f32.xlu2 %v1809_v35 }
 0x3ff   : > { %v3851_v3 = vpop.f32.mrf.mxu3 }
 0x400   : > { %v1728_v15 = vpop.f32.mrf.mxu2 }
 0x401   : > { %v3853_v58 = vpop.f32.mrf.mxu0  ;;  %v1729_v9 = vadd.f32 %v1728_v15, %v1704_v43 }
 0x402   : > { %v3855_v8 = vpop.f32.mrf.mxu1 }
 0x403   : > { %v1812_v27 = vsel %vm1383_vm9, %v1729_v9, -inf }
 0x407   : > { %v1751_v22 = vpop.f32.mrf.mxu3 }
 0x408   : > { %v1752_v39 = vadd.f32 -1e+30, %v1751_v22 }
 0x409   : > { %v1777_v13 = vpop.f32.mrf.mxu0 }
 0x40a   : > { %v1778_v29 = vadd.f32 -1e+30, %v1777_v13  ;;  %v1803_v41 = vpop.f32.mrf.mxu1  ;;  %v1815_v31 = vsel %vm1383_vm9, %v1752_v39, -inf }
 0x40b   : > { %v1804_v54 = vadd.f32 -1e+30, %v1803_v41  ;;  %1816 = vmax.xlane.f32.xlu0 %v1815_v31 }
 0x40c   : > { %v1821_v18 = vsel %vm1383_vm9, %v1778_v29, -inf }
 0x40d   : > { %1822 = vmax.xlane.f32.xlu1 %v1821_v18  ;;  %v1827_v12 = vsel %vm1383_vm9, %v1804_v54, -inf }
 0x40e   : > { %1828 = vmax.xlane.f32.xlu2 %v1827_v12 }
 0x40f   : > { %v1754_v0 = vpop.f32.mrf.mxu3 }
 0x410   : > { %v1755_v6 = vadd.f32 %v1754_v0, %v1704_v43 }
 0x411   : > { %v1780_v24 = vpop.f32.mrf.mxu0 }
 0x412   : > { %v3863_v47 = vadd.f32 %v1780_v24, %v1704_v43  ;;  %v1806_v57 = vpop.f32.mrf.mxu1  ;;  %v1818_v44 = vsel %vm1383_vm9, %v1755_v6, -inf }
 0x413   : > { %1813 = vmax.xlane.f32.xlu0 %v1812_v27  ;;  %v3869_v34 = vadd.f32 %v1806_v57, %v1704_v43 }
 0x414   : > { %v1824_v33 = vsel %vm1383_vm9, %v3863_v47, -inf }
 0x415   : > { %1819 = vmax.xlane.f32.xlu1 %v1818_v44  ;;  %v1830_v40 = vsel %vm1383_vm9, %v3869_v34, -inf }
 0x416   : > { %1825 = vmax.xlane.f32.xlu2 %v1824_v33 }
 0x41b   : > { %1831 = vmax.xlane.f32.xlu0 %v1830_v40 }
 0x41d   : > { %1573 = vadd.xlane.f32.xlu1 %v1572_v37 }
 0x41e   : > { %1561 = vadd.xlane.f32.xlu2 %v1560_v61 }
 0x423   : > { %1579 = vadd.xlane.f32.xlu0 %v1578_v5 }
 0x425   : > { %1564 = vadd.xlane.f32.xlu1 %v1563_v30 }
 0x426   : > { %1567 = vadd.xlane.f32.xlu2 %v1566_v60 }
 0x42b   : > { %1576 = vadd.xlane.f32.xlu0 %v1575_v19 }
 0x42e   : > { %1582 = vadd.xlane.f32.xlu2 %v1581_v16 }
 0x46f   : > { %v1811_v49 = vpop.xlane.xlu2 %1810 }
 0x470   : > { %v3888_v20 = vmax.f32 %v3726_v55, %v1811_v49 }
 0x472   : > { %v1865_v32 = vsub.f32 %v1726_v53, %v3888_v20 }
 0x474   : > { %v1873_v11 = vmul.f32 1.442695, %v1865_v32  ;;  %v1569_v32 = vsel %vm1383_vm9, %v3768_v17, 0.0 }
 0x476   : > { %2888 = vpow2.f32 %v1873_v11 }
 0x47c   : > { %v3891_v1 = vpop.eup %2888 }
 0x47d   : > { %2763 = vmatmul.msk.f32.vlgmr.msra.gmra.mxu2 %vm1383_vm9, %v3891_v1  ;;  %v1897_v11 = vsel %vm1383_vm9, %v3891_v1, 0.0 }
 0x47e   : > { %v1817_v23 = vpop.xlane.xlu0 %1816 }
 0x47f   : > { %v3896_v36 = vmax.f32 %v3739_v4, %v1817_v23 }
 0x480   : > { %v1823_v50 = vpop.xlane.xlu1 %1822 }
 0x481   : > { %v1867_v21 = vsub.f32 %v1752_v39, %v3896_v36  ;;  %v3900_v51 = vmax.f32 %v3729_v56, %v1823_v50  ;;  %v1829_v52 = vpop.xlane.xlu2 %1828 }
 0x482   : > { %v3903_v38 = vmax.f32 %v3752_v62, %v1829_v52 }
 0x483   : > { %v1877_v53 = vmul.f32 1.442695, %v1867_v21  ;;  %v1869_v35 = vsub.f32 %v1778_v29, %v3900_v51  ;;  %v1845_v17 = vsub.f32 %v3729_v56, %v3900_v51  ;;  %v1841_v56 = vsub.f32 %v3726_v55, %v3888_v20 }
 0x484   : > { %v1871_v48 = vsub.f32 %v1804_v54, %v3903_v38 }
 0x485   : > { %v1881_v22 = vmul.f32 1.442695, %v1869_v35  ;;  %2890 = vpow2.f32 %v1877_v53  ;;  %v1843_v53 = vsub.f32 %v3739_v4, %v3896_v36 }
 0x486   : > { %v1885_v13 = vmul.f32 1.442695, %v1871_v48  ;;  %v1814_v41 = vpop.xlane.xlu0 %1813 }
 0x487   : > { %v3908_v31 = vmax.f32 %v3731_v59, %v1814_v41  ;;  %2892 = vpow2.f32 %v1881_v22  ;;  %v1853_v48 = vmul.f32 1.442695, %v1843_v53  ;;  %v1857_v22 = vmul.f32 1.442695, %v1845_v17 }
 0x488   : > { %v1820_v39 = vpop.xlane.xlu1 %1819  ;;  %2894 = vpow2.f32 %v1885_v13  ;;  %v1847_v41 = vsub.f32 %v3752_v62, %v3903_v38 }
 0x489   : > { %v1866_v43 = vsub.f32 %v1729_v9, %v3908_v31  ;;  %v3912_v15 = vmax.f32 %v3750_v2, %v1820_v39  ;;  %v1826_v18 = vpop.xlane.xlu2 %1825  ;;  %v1842_v1 = vsub.f32 %v3731_v59, %v3908_v31 }
 0x48a   : > { %v3915_v29 = vmax.f32 %v3762_v25, %v1826_v18 }
 0x48b   : > { %v1875_v54 = vmul.f32 1.442695, %v1866_v43  ;;  %v1868_v12 = vsub.f32 %v1755_v6, %v3912_v15  ;;  %v2891_v0 = vpop.eup %2890  ;;  %v1851_v18 = vmul.f32 1.442695, %v1842_v1  ;;  %v1844_v55 = vsub.f32 %v3750_v2, %v3912_v15 }
 0x48c   : > { %v1870_v24 = vsub.f32 %v3863_v47, %v3915_v29  ;;  %2765 = vmatmul.msk.f32.vlgmr.msra.gmra.mxu3 %vm1383_vm9, %v2891_v0  ;;  %v1903_v9 = vsel %vm1383_vm9, %v2891_v0, 0.0  ;;  %v1846_v4 = vsub.f32 %v3762_v25, %v3915_v29 }
 0x48d   : > { %v1879_v27 = vmul.f32 1.442695, %v1868_v12  ;;  %v2893_v57 = vpop.eup %2892  ;;  %2896 = vpow2.f32 %v1875_v54  ;;  %1904 = vadd.xlane.f32.xlu2 %v1903_v9  ;;  %v1861_v54 = vmul.f32 1.442695, %v1847_v41 }
 0x48e   : > { %v1883_v44 = vmul.f32 1.442695, %v1870_v24  ;;  %v1832_v33 = vpop.xlane.xlu0 %1831  ;;  %2767 = vmatmul.msk.f32.vlgmr.msrb.gmra.mxu0 %vm1383_vm9, %v2893_v57  ;;  %v1909_v6 = vsel %vm1383_vm9, %v2893_v57, 0.0  ;;  %v2895_v37 = vpop.eup %2894  ;;  %v1859_v59 = vmul.f32 1.442695, %v1846_v4 }
 0x48f   : > { %v3924_v40 = vmax.f32 %v3764_v26, %v1832_v33  ;;  %2898 = vpow2.f32 %v1879_v27  ;;  %1910 = vadd.xlane.f32.xlu1 %v1909_v6  ;;  %2769 = vmatmul.msk.f32.vlgmr.msrb.gmra.mxu1 %vm1383_vm9, %v2895_v37  ;;  %v1915_v19 = vsel %vm1383_vm9, %v2895_v37, 0.0  ;;  %v1849_v27 = vmul.f32 1.442695, %v1841_v56 }
 0x490   : > { %2900 = vpow2.f32 %v1883_v44  ;;  %v1574_v35 = vpop.xlane.xlu1 %1573  ;;  %v1855_v44 = vmul.f32 1.442695, %v1844_v55 }
 0x491   : > { %v1872_v47 = vsub.f32 %v3869_v34, %v3924_v40  ;;  %v3943_v21 = vpop.xlane.xlu2 %1561  ;;  %v1848_v31 = vsub.f32 %v3764_v26, %v3924_v40 }
 0x493   : > { %v1887_v61 = vmul.f32 1.442695, %v1872_v47  ;;  %v2897_v5 = vpop.eup %2896  ;;  %v1863_v20 = vmul.f32 1.442695, %v1848_v31 }
 0x494   : > { %2764 = vmatmul.msk.f32.gmra.mxu2 %vm1383_vm9, %v2897_v5  ;;  %v1900_v30 = vsel %vm1383_vm9, %v2897_v5, 0.0 }
 0x495   : > { %v2899_v60 = vpop.eup %2898  ;;  %2902 = vpow2.f32 %v1887_v61  ;;  %1901 = vadd.xlane.f32.xlu2 %v1900_v30 }
 0x496   : > { %2766 = vmatmul.msk.f32.gmra.mxu3 %vm1383_vm9, %v2899_v60  ;;  %v2901_v16 = vpop.eup %2900  ;;  %v1906_v23 = vsel %vm1383_vm9, %v2899_v60, 0.0  ;;  %2904 = vpow2.f32 %v1853_v48  ;;  %v1580_v39 = vpop.xlane.xlu0 %1579 }
 0x497   : > { %1916 = vadd.xlane.f32.xlu1 %v1915_v19  ;;  %2768 = vmatmul.msk.f32.gmra.mxu0 %vm1383_vm9, %v2901_v16  ;;  %v1912_v34 = vsel %vm1383_vm9, %v2901_v16, 0.0  ;;  %2906 = vpow2.f32 %v1857_v22 }
 0x498   : > { %1913 = vadd.xlane.f32.xlu0 %v1912_v34  ;;  %v1565_v43 = vpop.xlane.xlu1 %1564  ;;  %2908 = vpow2.f32 %v1851_v18 }
 0x499   : > { %v1568_v52 = vpop.xlane.xlu2 %1567  ;;  %2910 = vpow2.f32 %v1861_v54 }
 0x49b   : > { %v2903_v49 = vpop.eup %2902 }
 0x49c   : > { %2770 = vmatmul.msk.f32.gmra.mxu1 %vm1383_vm9, %v2903_v49  ;;  %v1918_v50 = vsel %vm1383_vm9, %v2903_v49, 0.0  ;;  %v2905_v36 = vpop.eup %2904 }
 0x49d   : > { %v1891_v51 = vmul.f32 %v2905_v36, %v1568_v52  ;;  %v2907_v12 = vpop.eup %2906  ;;  %v3974_v61 = vmul.f32 %v2905_v36, %v3844_v7 }
 0x49e   : > { %v1893_v62 = vmul.f32 %v2907_v12, %v1574_v35  ;;  %v1577_v29 = vpop.xlane.xlu0 %1576  ;;  %v2909_v26 = vpop.eup %2908  ;;  %v1933_v19 = vmul.f32 %v2907_v12, %v3846_v63 }
 0x49f   : > { %1570 = vadd.xlane.f32.xlu1 %v1569_v32  ;;  %v1890_v9 = vmul.f32 %v2909_v26, %v1565_v43  ;;  %v2911_v57 = vpop.eup %2910 }
 0x4a0   : > { %1898 = vadd.xlane.f32.xlu0 %v1897_v11  ;;  %v1895_v6 = vmul.f32 %v2911_v57, %v1580_v39  ;;  %v1935_v32 = vmul.f32 %v2911_v57, %v3848_v46  ;;  %v3999_v46 = vmul.f32 %v2909_v26, %v3842_v45 }
 0x4a1   : > { %v1583_v13 = vpop.xlane.xlu2 %1582 }
 0x4a7   : > { %1907 = vadd.xlane.f32.xlu1 %v1906_v23 }
 0x4a8   : > { %1919 = vadd.xlane.f32.xlu0 %v1918_v50 }
 0x500   : > { %v1905_v0 = vpop.xlane.xlu2 %1904 }
 0x501   : > { %v3959_v38 = vadd.f32 %v1905_v0, %v1891_v51 }
 0x502   : > { %v1911_v24 = vpop.xlane.xlu1 %1910 }
 0x503   : > { %2912 = vrcp.f32 %v3959_v38  ;;  %v3962_v25 = vadd.f32 %v1911_v24, %v1893_v62  ;;  %v2098_v23 = vand.u32 2147483647, %v3959_v38  ;;  %v2100_v50 = vand.u32 2147483648, %v3959_v38  ;;  %v4041_v24 = vpop.f32.mrf.mxu2 }
 0x504   : > { %2914 = vpow2.f32 %v1859_v59  ;;  %vm2094_vm13 = vweird.f32 %v3959_v38 }
 0x505   : > { %2916 = vrcp.f32 %v3962_v25  ;;  %v2128_v53 = vand.u32 2147483648, %v3962_v25  ;;  %vm2122_vm15 = vweird.f32 %v3962_v25  ;;  %vm4016_vm1 = vcmp.eq.f32.partialorder %v2098_v23, 8.507059e+37 }
 0x506   : > { %2918 = vpow2.f32 %v1849_v27 }
 0x507   : > { %2920 = vpow2.f32 %v1863_v20  ;;  %v4024_v36 = vor.u32 1.1754944e-38, %v2128_v53 }
 0x508   : > { %v1902_v33 = vpop.xlane.xlu2 %1901 }
 0x509   : > { %v3967_v40 = vpop.eup %2912  ;;  %v3969_v37 = vadd.f32 %v1902_v33, %v1890_v9 }
 0x50a   : > { %v2915_v47 = vpop.eup %2914  ;;  %v2090_v2 = vmul.f32 %v3967_v40, %v3959_v38  ;;  %v1917_v15 = vpop.xlane.xlu1 %1916  ;;  %vm2095_vm14 = vweird.f32 %v3967_v40 }
 0x50b   : > { %v3976_v5 = vpop.eup %2916  ;;  %v1894_v30 = vmul.f32 %v2915_v47, %v1577_v29  ;;  %2922 = vrcp.f32 %v3969_v37  ;;  %v3979_v60 = vadd.f32 %v1917_v15, %v1895_v6  ;;  %v1914_v49 = vpop.xlane.xlu0 %1913  ;;  %v4007_v48 = vmul.f32 %v2915_v47, %v3853_v58  ;;  %vm4036_vm4 = vmor %vm2094_vm13, %vm2095_vm14 }
 0x50c   : > { %2924 = vpow2.f32 %v1855_v44  ;;  %v2091_v16 = vsub.f32 1.0, %v2090_v2  ;;  %v2118_v34 = vmul.f32 %v3976_v5, %v3962_v25  ;;  %v3985_v11 = vpop.eup %2918  ;;  %v2018_v1 = vpop.f32.mrf.mxu0  ;;  %v2101_v58 = vor.u32 1.1754944e-38, %v2100_v50 }
 0x50d   : > { %2926 = vrcp.f32 %v3979_v60  ;;  %v3988_v7 = vadd.f32 %v1914_v49, %v1894_v30  ;;  %v3992_v52 = vpop.eup %2920  ;;  %v1889_v63 = vmul.f32 %v3985_v11, %v3943_v21  ;;  %v2047_v21 = vpop.f32.mrf.mxu1  ;;  %v2154_v41 = vand.u32 2147483647, %v3979_v60 }
 0x50e   : > { %v2092_v35 = vmul.f32 %v3967_v40, %v2091_v16  ;;  %v4002_v17 = vmul.f32 %v3992_v52, %v1583_v13  ;;  %v2119_v22 = vsub.f32 1.0, %v2118_v34  ;;  %v2126_v13 = vand.u32 2147483647, %v3962_v25 }
 0x50f   : > { %2928 = vrcp.f32 %v3988_v7  ;;  %v2156_v54 = vand.u32 2147483648, %v3979_v60  ;;  %v2084_v51 = vand.u32 2147483647, %v3969_v37  ;;  %v4028_v59 = vadd.f32 %v2018_v1, %v1933_v19  ;;  %v1989_v0 = vpop.f32.mrf.mxu3 }
 0x510   : > { %v2093_v39 = vadd.f32 %v3967_v40, %v2092_v35  ;;  %vm2123_vm2 = vweird.f32 %v3976_v5  ;;  %v2059_v31 = vadd.f32 %v2047_v21, %v1935_v32  ;;  %vm2150_vm3 = vweird.f32 %v3979_v60 }
 0x511   : > { %v4012_v45 = vpop.eup %2922  ;;  %vm2080_vm5 = vweird.f32 %v3969_v37  ;;  %v2120_v55 = vmul.f32 %v3976_v5, %v2119_v22  ;;  %vm4045_vm6 = vcmp.eq.f32.partialorder %v2154_v41, 8.507059e+37  ;;  %vm2136_vm7 = vweird.f32 %v3988_v7  ;;  %vm4079_vm14 = vmor %vm2122_vm15, %vm2123_vm2 }
 0x512   : > { %v4020_v18 = vpop.eup %2924  ;;  %v2076_v4 = vmul.f32 %v4012_v45, %v3969_v37  ;;  %v1571_v56 = vpop.xlane.xlu1 %1570  ;;  %v2097_v38 = vsel %vm4036_vm4, %v3967_v40, %v2093_v39  ;;  %v2140_v44 = vand.u32 2147483647, %v3988_v7  ;;  %vm4057_vm10 = vcmp.eq.f32.partialorder %v2126_v13, 8.507059e+37 }
 0x513   : > { %v2927_v12 = vpop.eup %2926  ;;  %v1899_v29 = vpop.xlane.xlu0 %1898  ;;  %v2157_v2 = vor.u32 1.1754944e-38, %v2156_v54  ;;  %v2055_v15 = vadd.f32 %v1989_v0, %v3974_v61  ;;  %v2102_v40 = vsel %vm4016_vm1, %v2101_v58, %v2097_v38  ;;  %v2142_v30 = vand.u32 2147483648, %v3988_v7 }
 0x514   : > { %v2146_v27 = vmul.f32 %v2927_v12, %v3979_v60  ;;  %v2077_v9 = vsub.f32 1.0, %v2076_v4  ;;  %v4052_v57 = vadd.f32 %v1899_v29, %v1889_v63  ;;  %v2086_v19 = vand.u32 2147483648, %v3969_v37  ;;  %v2021_v35 = vpop.f32.mrf.mxu0 }
 0x515   : > { %v2929_v26 = vpop.eup %2928  ;;  %v2121_v34 = vadd.f32 %v3976_v5, %v2120_v55  ;;  %vm2151_vm11 = vweird.f32 %v2927_v12  ;;  %v1892_v32 = vmul.f32 %v4020_v18, %v1571_v56  ;;  %vm4069_vm12 = vcmp.eq.f32.partialorder %v2140_v44, 8.507059e+37 }
 0x516   : > { %v2147_v33 = vsub.f32 1.0, %v2146_v27  ;;  %v2132_v6 = vmul.f32 %v2929_v26, %v3988_v7  ;;  %2930 = vrcp.f32 %v4052_v57  ;;  %v2078_v61 = vmul.f32 %v4012_v45, %v2077_v9  ;;  %vm2152_vm4 = vmor %vm2150_vm3, %vm2151_vm11 }
 0x517   : > { %vm2081_vm13 = vweird.f32 %v4012_v45  ;;  %v2175_v53 = vmul.f32 %v2102_v40, %v2055_v15  ;;  %vm2137_vm1 = vweird.f32 %v2929_v26  ;;  %v2143_v21 = vor.u32 1.1754944e-38, %v2142_v30  ;;  %v1963_v4 = vpop.f32.mrf.mxu2 }
 0x518   : > { %v2133_v16 = vsub.f32 1.0, %v2132_v6  ;;  %v2148_v49 = vmul.f32 %v2927_v12, %v2147_v33  ;;  %v2079_v41 = vadd.f32 %v4012_v45, %v2078_v61  ;;  %vm4086_vm0 = vcmp.eq.f32.partialorder %v2084_v51, 8.507059e+37  ;;  %vm4099_vm15 = vmor %vm2080_vm5, %vm2081_vm13 }
 0x519   : > { %v2125_v13 = vsel %vm4079_vm14, %v3976_v5, %v2121_v34  ;;  %v2087_v54 = vor.u32 1.1754944e-38, %v2086_v19  ;;  %v2058_v0 = vadd.f32 %v2021_v35, %v4007_v48  ;;  %vm2138_vm2 = vmor %vm2136_vm7, %vm2137_vm1  ;;  %v2054_v7 = vadd.f32 %v1963_v4, %v3999_v46 }
 0x51a   : > { %v2149_v63 = vadd.f32 %v2927_v12, %v2148_v49  ;;  %v2134_v22 = vmul.f32 %v2929_v26, %v2133_v16  ;;  %v1908_v1 = vpop.xlane.xlu1 %1907  ;;  %v2083_v5 = vsel %vm4099_vm15, %v4012_v45, %v2079_v41  ;;  %v2130_v55 = vsel %vm4057_vm10, %v4024_v36, %v2125_v13 }
 0x51b   : > { %v4090_v25 = vadd.f32 %v1908_v1, %v1892_v32  ;;  %v2088_v20 = vsel %vm4086_vm0, %v2087_v54, %v2083_v5  ;;  %v1920_v45 = vpop.xlane.xlu0 %1919  ;;  %v2072_v44 = vand.u32 2147483648, %v4052_v57  ;;  %v1929_v15 = vmul.f32 %v3985_v11, %v3840_v42  ;;  %v2050_v5 = vpop.f32.mrf.mxu1 }
 0x51c   : > { %v2153_v43 = vsel %vm2152_vm4, %v2927_v12, %v2149_v63  ;;  %v2135_v58 = vadd.f32 %v2929_v26, %v2134_v22  ;;  %v2931_v56 = vpop.eup %2930  ;;  %v2195_v12 = vrot.slane %v2175_v53, 4  ;;  %v2174_v36 = vmul.f32 %v2088_v20, %v2054_v7 }
 0x51d   : > { %v2158_v51 = vsel %vm4045_vm6, %v2157_v2, %v2153_v43  ;;  %2932 = vrcp.f32 %v4090_v25  ;;  %v2062_v62 = vmul.f32 %v2931_v56, %v4052_v57  ;;  %vm2067_vm3 = vweird.f32 %v2931_v56 }
 0x51e   : > { %v2179_v37 = vmul.f32 %v2158_v51, %v2059_v31  ;;  %v2139_v27 = vsel %vm2138_vm2, %v2929_v26, %v2135_v58  ;;  %v2070_v26 = vand.u32 2147483647, %v4052_v57  ;;  %v4127_v46 = vadd.f32 %v1920_v45, %v4002_v17 }
 0x51f   : > { %v2144_v48 = vsel %vm4069_vm12, %v2143_v21, %v2139_v27  ;;  %v2063_v29 = vsub.f32 1.0, %v2062_v62  ;;  %v2177_v40 = vmul.f32 %v2130_v55, %v4028_v59  ;;  %v2239_v30 = vrot.slane %v2174_v36, 4  ;;  %v1992_v59 = vpop.f32.mrf.mxu3 }
 0x520   : > { %v2193_v38 = vrot.slane %v2179_v37, 4  ;;  %v2196_v31 = vsel %vm674_vm8, %v2179_v37, %v2195_v12  ;;  %v2178_v9 = vmul.f32 %v2144_v48, %v2058_v0  ;;  %v1932_v19 = vmul.f32 %v4020_v18, %v3851_v3 }
 0x521   : > { %v2064_v6 = vmul.f32 %v2931_v56, %v2063_v29  ;;  %vm2066_vm0 = vweird.f32 %v4052_v57  ;;  %v2053_v17 = vadd.f32 %v4041_v24, %v1929_v15  ;;  %v2073_v32 = vor.u32 1.1754944e-38, %v2072_v44 }
 0x522   : > { %v2194_v33 = vsel %vm674_vm8, %v2193_v38, %v2175_v53  ;;  %v2237_v47 = vrot.slane %v2178_v9, 4  ;;  %vm2068_vm5 = vmor %vm2066_vm0, %vm2067_vm3  ;;  %v2240_v42 = vsel %vm674_vm8, %v2178_v9, %v2239_v30  ;;  %2934 = vrcp.f32 %v4127_v46 }
 0x523   : > { %v2933_v2 = vpop.eup %2932  ;;  %v2065_v16 = vadd.f32 %v2931_v56, %v2064_v6  ;;  %vm2071_vm6 = vcmp.eq.f32.partialorder %v2070_v26, 8.507059e+37  ;;  %v2112_v18 = vand.u32 2147483647, %v4090_v25  ;;  %v2200_v57 = vperm.slane %v2194_v33, %v3336_v14 }
 0x524   : > { %v2238_v34 = vsel %vm674_vm8, %v2237_v47, %v2174_v36  ;;  %v2104_v49 = vmul.f32 %v2933_v2, %v4090_v25  ;;  %v2204_v23 = vperm.slane %v2196_v31, %v3336_v14  ;;  %v2114_v24 = vand.u32 2147483648, %v4090_v25 }
 0x525   : > { %v2069_v11 = vsel %vm2068_vm5, %v2931_v56, %v2065_v16  ;;  %v2181_v50 = vrot.slane %v2177_v40, 4  ;;  %vm2109_vm7 = vweird.f32 %v2933_v2  ;;  %v2056_v35 = vadd.f32 %v1992_v59, %v1932_v19 }
 0x526   : > { %v2105_v3 = vsub.f32 1.0, %v2104_v49  ;;  %v2074_v61 = vsel %vm2071_vm6, %v2073_v32, %v2069_v11  ;;  %v1936_v22 = vmul.f32 %v3992_v52, %v3855_v8  ;;  %vm2108_vm10 = vweird.f32 %v4090_v25 }
 0x527   : > { %v2173_v63 = vmul.f32 %v2074_v61, %v2053_v17  ;;  %vm2113_vm11 = vcmp.eq.f32.partialorder %v2112_v18, 8.507059e+37  ;;  %v2205_v13 = vrot.slane %v2200_v57, 4  ;;  %v2217_v43 = vrot.slane %v2204_v23, 4  ;;  %vm2110_vm12 = vmor %vm2108_vm10, %vm2109_vm7 }
 0x528   : > { %v2106_v53 = vmul.f32 %v2933_v2, %v2105_v3  ;;  %v2935_v39 = vpop.eup %2934  ;;  %v2115_v4 = vor.u32 1.1754944e-38, %v2114_v24  ;;  %v4152_v54 = vperm.slane %v2238_v34, %v3336_v14  ;;  %v2168_v12 = vand.u32 2147483647, %v4127_v46 }
 0x529   : > { %v2182_v1 = vsel %vm674_vm8, %v2181_v50, %v2173_v63  ;;  %v2183_v21 = vrot.slane %v2173_v63, 4  ;;  %v2160_v52 = vmul.f32 %v2935_v39, %v4127_v46  ;;  %v2170_v62 = vand.u32 2147483648, %v4127_v46 }
 0x52a   : > { %v2107_v41 = vadd.f32 %v2933_v2, %v2106_v53  ;;  %v2188_v58 = vperm.slane %v2182_v1, %v3336_v14  ;;  %vm2165_vm13 = vweird.f32 %v2935_v39  ;;  %v2248_v29 = vperm.slane %v2240_v42, %v3336_v14 }
 0x52b   : > { %v2184_v60 = vsel %vm674_vm8, %v2177_v40, %v2183_v21  ;;  %v2161_v37 = vsub.f32 1.0, %v2160_v52  ;;  %v2060_v9 = vadd.f32 %v2050_v5, %v1936_v22  ;;  %vm2164_vm14 = vweird.f32 %v4127_v46 }
 0x52c   : > { %v2111_v8 = vsel %vm2110_vm12, %v2933_v2, %v2107_v41  ;;  %v2192_v25 = vperm.slane %v2184_v60, %v3336_v14  ;;  %v2207_v56 = vrot.slane %v2188_v58, 4  ;;  %v2206_v0 = vsel %vm674_vm8, %v2205_v13, %v2188_v58  ;;  %vm2166_vm1 = vmor %vm2164_vm14, %vm2165_vm13 }
 0x52d   : > { %v2116_v51 = vsel %vm2113_vm11, %v2115_v4, %v2111_v8  ;;  %v2212_v27 = vperm.slane %v2206_v0, %v3346_v28  ;;  %v2162_v45 = vmul.f32 %v2935_v39, %v2161_v37  ;;  %v2263_v47 = vrot.slane %v4152_v54, 4 }
 0x52e   : > { %v2208_v55 = vsel %vm674_vm8, %v2200_v57, %v2207_v56  ;;  %v2218_v48 = vsel %vm674_vm8, %v2217_v43, %v2192_v25  ;;  %v2219_v7 = vrot.slane %v2192_v25, 4  ;;  %v2176_v20 = vmul.f32 %v2116_v51, %v2056_v35 }
 0x52f   : > { %v2216_v38 = vperm.slane %v2208_v55, %v3346_v28  ;;  %v2224_v31 = vperm.slane %v2218_v48, %v3346_v28  ;;  %v2229_v44 = vrot.slane %v2212_v27, 4  ;;  %v2163_v36 = vadd.f32 %v2935_v39, %v2162_v45 }
 0x530   : > { %v2220_v26 = vsel %vm674_vm8, %v2204_v23, %v2219_v7  ;;  %vm2169_vm4 = vcmp.eq.f32.partialorder %v2168_v12, 8.507059e+37  ;;  %v2171_v2 = vor.u32 1.1754944e-38, %v2170_v62  ;;  %v2251_v40 = vrot.slane %v2176_v20, 4 }
 0x531   : > { %v2228_v33 = vperm.slane %v2220_v26, %v3346_v28  ;;  %v2231_v6 = vrot.slane %v2216_v38, 4  ;;  %v2233_v15 = vrot.slane %v2224_v31, 4  ;;  %v2167_v30 = vsel %vm2166_vm1, %v2935_v39, %v2163_v36 }
 0x532   : > { %v2172_v34 = vsel %vm2169_vm4, %v2171_v2, %v2167_v30  ;;  %v2230_v49 = vsel %vm674_vm8, 0.0, %v2229_v44  ;;  %v2275_v53 = vrot.slane %v2248_v29, 4  ;;  %vm2430_vm15 = vcmask 195584  }
 0x533   : > { %v2232_v19 = vsel %vm674_vm8, 0.0, %v2231_v6  ;;  %v2235_v16 = vrot.slane %v2228_v33, 4  ;;  %v2293_v46 = vsel %vm674_vm8, %v2231_v6, %v2212_v27  ;;  %v2180_v32 = vmul.f32 %v2172_v34, %v2060_v9 }
 0x534   : > { %v2298_v17 = vrot.slane %v2232_v19, 4  ;;  %v2297_v11 = vperm.slane %v2293_v46, %v3336_v14  ;;  %v2234_v3 = vsel %vm674_vm8, 0.0, %v2233_v15  ;;  %vm4424_vm2 = vcmask 261120  }
 0x535   : > { %v2236_v42 = vsel %vm674_vm8, 0.0, %v2235_v16  ;;  %v2304_v59 = vsel %vm674_vm8, %v2235_v16, %v2224_v31  ;;  %v2249_v61 = vrot.slane %v2180_v32, 4  ;;  %v2252_v24 = vsel %vm674_vm8, %v2180_v32, %v2251_v40  ;;  %vm4425_vm3 = vmmov %vm4424_vm2 }
 0x536   : > { %v2299_v18 = vsel %vm674_vm8, %v2298_v17, %v2230_v49  ;;  %v2308_v57 = vperm.slane %v2304_v59, %v3336_v14  ;;  %v2309_v23 = vrot.slane %v2236_v42, 4  ;;  %v2317_v63 = vrot.slane %v2297_v11, 4  ;;  %vm4426_vm0 = vmmov %vm4424_vm2 }
 0x537   : > { %v2303_v50 = vperm.slane %v2299_v18, %v3336_v14  ;;  %v2260_v35 = vperm.slane %v2252_v24, %v3336_v14  ;;  %v2250_v21 = vsel %vm674_vm8, %v2249_v61, %v2176_v20  ;;  %vm4428_vm5 = vmmov %vm4426_vm0 }
 0x538   : > { %v2310_v22 = vsel %vm674_vm8, %v2309_v23, %v2234_v3  ;;  %v2329_v1 = vrot.slane %v2308_v57, 4  ;;  %v2256_v43 = vperm.slane %v2250_v21, %v3336_v14  ;;  %vm4429_vm6 = vmmov %vm4426_vm0 }
 0x539   : > { %v2314_v41 = vperm.slane %v2310_v22, %v3336_v14  ;;  %v2318_v39 = vsel %vm674_vm8, %v2303_v50, %v2317_v63  ;;  %v2315_v13 = vrot.slane %v2303_v50, 4  ;;  %v2273_v58 = vrot.slane %v2260_v35, 4  ;;  %vm4430_vm12 = vmmov %vm4426_vm0 }
 0x53a   : > { %v2326_v4 = vperm.slane %v2318_v39, %v3346_v28  ;;  %v2276_v60 = vsel %vm674_vm8, %v2260_v35, %v2275_v53  ;;  %v2261_v51 = vrot.slane %v2256_v43, 4  ;;  %v2264_v62 = vsel %vm674_vm8, %v2256_v43, %v2263_v47  ;;  %vm4431_vm4 = vmmov %vm4426_vm0 }
 0x53b   : > { %v2330_v8 = vsel %vm674_vm8, %v2314_v41, %v2329_v1  ;;  %v2316_v52 = vsel %vm674_vm8, %v2315_v13, %v2297_v11  ;;  %v2327_v25 = vrot.slane %v2314_v41, 4  ;;  %v2284_v56 = vperm.slane %v2276_v60, %v3346_v28  ;;  %v2436_v60 = vld [vmem:[%s4384_s6 + $0x18] sm:$0xff] }
 0x53c   : > { %v2338_v0 = vperm.slane %v2330_v8, %v3346_v28  ;;  %v2345_v5 = vrot.slane %v2326_v4, 4  ;;  %v2322_v37 = vperm.slane %v2316_v52, %v3346_v28  ;;  %v2274_v27 = vsel %vm674_vm8, %v2273_v58, %v2248_v29  ;;  %2459 = vmatpush.msrb.mxu2 %v2436_v60  ;;  %v2434_v8 = vld [vmem:[%s4384_s6 + $0x8] sm:$0xff]  ;;  %v2433_v52 = vld [vmem:[%s4384_s6] sm:$0xff] }
 0x53d   : > { %v2328_v12 = vsel %vm674_vm8, %v2327_v25, %v2308_v57  ;;  %v2291_v55 = vrot.slane %v2284_v56, 4  ;;  %v2262_v38 = vsel %vm674_vm8, %v2261_v51, %v4152_v54  ;;  %v2272_v31 = vperm.slane %v2264_v62, %v3346_v28 }
 0x53e   : > { %v2346_v48 = vsel %vm674_vm8, %v2338_v0, %v2345_v5  ;;  %v2343_v7 = vrot.slane %v2338_v0, 4  ;;  %v2334_v20 = vperm.slane %v2328_v12, %v3346_v28  ;;  %v2341_v45 = vrot.slane %v2322_v37, 4 }
 0x53f   : > { %2419 = vrot.lane.b32.xlu1 %v2346_v48, %s3085_s24  ;;  %v2280_v9 = vperm.slane %v2274_v27, %v3346_v28  ;;  %v2292_v26 = vsel %vm674_vm8, 0.0, %v2291_v55  ;;  %v2268_v33 = vperm.slane %v2262_v38, %v3346_v28  ;;  %v2287_v54 = vrot.slane %v2272_v31, 4  ;;  %v2940_v31 = vld [vmem:[%s3242_s25] sm:$0xff] }
 0x540   : > { %v2344_v29 = vsel %vm674_vm8, %v2343_v7, %v2326_v4  ;;  %v2339_v44 = vrot.slane %v2334_v20, 4  ;;  %v2342_v36 = vsel %vm674_vm8, %v2334_v20, %v2341_v45  ;;  %v2363_v2 = vrot.slane %v2292_v26, 4  ;;  %v2861_v20 = vld [vmem:[%s4385_s7] ss:$0 sm:$0xff] }
 0x541   : > { %2411 = vrot.lane.b32.xlu0 %v2344_v29, %s3086_s28  ;;  %2403 = vrot.lane.b32.xlu2 %v2342_v36, %s4398_s18  ;;  %v2289_v6 = vrot.slane %v2280_v9, 4  ;;  %v2358_v47 = vsel %vm674_vm8, %v2291_v55, %v2280_v9  ;;  %v2285_v15 = vrot.slane %v2268_v33, 4  ;;  %v2288_v19 = vsel %vm674_vm8, 0.0, %v2287_v54  ;;  %v2941_v36 = vld [vmem:[%s3242_s25 + $0x8] sm:$0xff] }
 0x542   : > { %v2362_v40 = vperm.slane %v2358_v47, %v3336_v14  ;;  %v2340_v30 = vsel %vm674_vm8, %v2339_v44, %v2322_v37  ;;  %v2347_v34 = vsel %vm674_vm8, %v2287_v54, %v2268_v33  ;;  %v2352_v17 = vrot.slane %v2288_v19, 4 }
 0x543   : > { %v2290_v16 = vsel %vm674_vm8, 0.0, %v2289_v6  ;;  %v2286_v49 = vsel %vm674_vm8, 0.0, %v2285_v15  ;;  %v2351_v46 = vperm.slane %v2347_v34, %v3336_v14 }
 0x544   : > { %v2364_v32 = vsel %vm674_vm8, %v2363_v2, %v2290_v16  ;;  %v2383_v11 = vrot.slane %v2362_v40, 4  ;;  %v2353_v59 = vsel %vm674_vm8, %v2352_v17, %v2286_v49 }
 0x545   : > { %v2368_v42 = vperm.slane %v2364_v32, %v3336_v14  ;;  %v2371_v3 = vrot.slane %v2351_v46, 4  ;;  %v2357_v18 = vperm.slane %v2353_v59, %v3336_v14  ;;  %v2529_v59 = vld [vmem:[#allocation5 + $0x8] sm:$0xff] }
 0x547   : > { %v2384_v57 = vsel %vm674_vm8, %v2368_v42, %v2383_v11  ;;  %v2381_v23 = vrot.slane %v2368_v42, 4  ;;  %v2372_v24 = vsel %vm674_vm8, %v2357_v18, %v2371_v3  ;;  %v2369_v50 = vrot.slane %v2357_v18, 4  ;;  %v2531_v42 = vld [vmem:[#allocation5 + $0x18] sm:$0xff]  ;;  %v2530_v11 = vld [vmem:[#allocation5 + $0x10] sm:$0xff]  ;;  %v2528_v18 = vld [vmem:[#allocation5] sm:$0xff] }
 0x548   : > { %v2392_v61 = vperm.slane %v2384_v57, %v3346_v28  ;;  %v2380_v53 = vperm.slane %v2372_v24, %v3346_v28  ;;  %2554 = vmatpush.msrb.mxu3 %v2531_v42  ;;  %v2581_v24 = vld [vmem:[%s4390_s12 + $0x70] sm:$0xff] }
 0x549   : > { %v2382_v63 = vsel %vm674_vm8, %v2381_v23, %v2362_v40  ;;  %v2370_v1 = vsel %vm674_vm8, %v2369_v50, %v2351_v46 }
 0x54a   : > { %v2397_v35 = vrot.slane %v2392_v61, 4  ;;  %v2388_v22 = vperm.slane %v2382_v63, %v3346_v28  ;;  %v2399_v21 = vrot.slane %v2380_v53, 4  ;;  %v2376_v41 = vperm.slane %v2370_v1, %v3346_v28  ;;  %v2435_v28 = vld [vmem:[%s4384_s6 + $0x10] sm:$0xff]  ;;  %2555 = vmatpush.msrb.mxu3 %v2530_v11  ;;  %v2580_v63 = vld [vmem:[%s4390_s12 + $0x68] sm:$0xff]  ;;  %v2579_v1 = vld [vmem:[%s4390_s12 + $0x60] sm:$0xff] }
 0x54b   : > { %2460 = vmatpush.msrb.mxu2 %v2435_v28  ;;  %v2575_v28 = vld [vmem:[%s4390_s12 + $0x40] sm:$0xff] }
 0x54c   : > { %v2398_v14 = vsel %vm674_vm8, %v2397_v35, %v2380_v53  ;;  %v2393_v39 = vrot.slane %v2388_v22, 4  ;;  %v2400_v13 = vsel %vm674_vm8, %v2392_v61, %v2399_v21  ;;  %v2395_v43 = vrot.slane %v2376_v41, 4  ;;  %2556 = vmatpush.msrb.mxu3 %v2529_v59  ;;  %v2582_v61 = vld [vmem:[%s4390_s12 + $0x78] sm:$0xff] }
 0x54d   : > { %2413 = vrot.lane.b32.xlu2 %v2398_v14, %s3086_s28  ;;  %2421 = vrot.lane.b32.xlu1 %v2400_v13, %s3085_s24  ;;  %s490_s28 = sand.u32 1, %s3064_s30  }
 0x54e   : > { %v2394_v58 = vsel %vm674_vm8, %v2393_v39, %v2376_v41  ;;  %v2396_v4 = vsel %vm674_vm8, %v2388_v22, %v2395_v43  ;;  %2461 = vmatpush.msrb.mxu2 %v2434_v8  ;;  %vm2427_vm8 = vcmask 130048   ;;  %2557 = vmatpush.msrb.mxu3 %v2528_v18  ;;  %v2578_v41 = vld [vmem:[%s4390_s12 + $0x58] sm:$0xff]  ;;  %v2862_v39 = vld [vmem:[%s4386_s8] ss:$0 sm:$0xff]  ;;  %s2722_s21 = sshll.u32 %s490_s28, 4  ;;  %s2615_s20 = scalar_lea.sflag [#allocation4], %s490_s28 }
 0x54f   : > { %2405 = vrot.lane.b32.xlu0 %v2396_v4, %s4398_s18  ;;  %2587 = vmatpush.msra.mxu0 %v2582_v61  ;;  %v2576_v4 = vld [vmem:[%s4390_s12 + $0x48] sm:$0xff]  ;;  %s492_s26 = scalar_lea.vmem [#allocation7], %s2722_s21  ;;  %s2629_s18 = sshll.u32 %s2626_s22, 4  ;;  %s2630_s18 = int_to_ptr.hbm [resolvable:$true] %s2629_s18 }
 0x550   : > { %2462 = vmatpush.msrb.mxu2 %v2433_v52  ;;  %s2627_s24 = sshll.u32 %s492_s26, 4  ;;  %s3016_s25 = sshra.s32 %s2630_s18, 4  ;;  %s2628_s24 = int_to_ptr.vmem [resolvable:$true] %s2627_s24  ;;  %s3017_s25 = int_to_ptr.hbm [resolvable:$true] %s3016_s25 }
 0x551   : > { %2588 = vmatpush.msra.mxu0 %v2581_v24  ;;  %s3018_s21 = scalar_lea.hbm %s3017_s25, 16  ;;  %p3023_p3 = scmp.lt.s32.totalorder %s3017_s25, %s4392_s14 }
 0x552   : > { %p3019_p0 = scmp.ne.s32.totalorder %s3017_s25, %s3018_s21  ;;  %p3024_p4 = scmp.lt.s32.totalorder %s3022_s19, %s3018_s21 }
 0x553   : > { %2589 = vmatpush.msra.mxu0 %v2580_v63 }
 0x554   : > { %p3020_p1 = pnand %p3019_p0, %p3202_p5  ;;  %p3025_p7 = por %p3024_p4, %p3023_p3 }
 0x555   : > { %2590 = vmatpush.msra.mxu0 %v2579_v1 }
 0x556   : > { %p3021_p2 = pneg %p3020_p1 }
 0x557   : > { %2591 = vmatpush.msra.mxu0 %v2578_v41 }
 0x558   : > { %p3026_p8 = pnand %p3025_p7, %p3021_p2 }
 0x59b   : > { %v2404_v25 = vpop.permute.xlu2 %2403 }
 0x59c   : > { %v2425_v56 = vsel %vm1383_vm9, %v2340_v30, %v2404_v25  ;;  %v2574_v25 = vld [vmem:[%s4390_s12 + $0x38] sm:$0xff] }
 0x5a7   : > { %v2414_v62 = vpop.permute.xlu2 %2413 }
 0x5b1   : > { %v2420_v0 = vpop.permute.xlu1 %2419 }
 0x5b3   : > { %v2412_v51 = vpop.permute.xlu0 %2411 }
 0x5b4   : > { %v2428_v5 = vsel %vm2427_vm8, %v2425_v56, %v2412_v51  ;;  %v2573_v51 = vld [vmem:[%s4390_s12 + $0x30] sm:$0xff] }
 0x5b5   : > { %v2431_v37 = vsel %vm2430_vm15, %v2428_v5, %v2420_v0  ;;  %v2572_v5 = vld [vmem:[%s4390_s12 + $0x28] sm:$0xff] }
 0x5b6   : > { %2771 = vmatmul.msk.f32.vlgmr.msrb.gmra.mxu2 %vm4424_vm2, %v2431_v37 }
 0x5bf   : > { %v2422_v55 = vpop.permute.xlu1 %2421 }
 0x5c1   : > { %v2406_v12 = vpop.permute.xlu0 %2405 }
 0x5c2   : > { %v2426_v27 = vsel %vm1383_vm9, %v2394_v58, %v2406_v12  ;;  %vm4427_vm9 = vmmov %vm4426_vm0  ;;  %v2863_v58 = vld [vmem:[%s4387_s9] ss:$0 sm:$0xff] }
 0x5c3   : > { %v2429_v48 = vsel %vm2427_vm8, %v2426_v27, %v2414_v62  ;;  %v2571_v12 = vld [vmem:[%s4390_s12 + $0x20] sm:$0xff]  ;;  %v2570_v27 = vld [vmem:[%s4390_s12 + $0x18] sm:$0xff]  ;;  %vm4432_vm8 = vmmov %vm4426_vm0 }
 0x5c4   : > { %v2432_v7 = vsel %vm2430_vm15, %v2429_v48, %v2422_v55  ;;  %vm4433_vm15 = vmmov %vm4426_vm0 }
 0x5c5   : > { %2772 = vmatmul.msk.f32.gmra.mxu2 %vm4425_vm3, %v2432_v7 }
 0x639   : > { %v2464_v45 = vpop.f32.mrf.mxu2 }
 0x63a   : > { %v2465_v38 = vadd.f32 %v2861_v20, %v2464_v45 }
 0x63c   : > { %v4257_v9 = vadd.f32 %v2940_v31, %v2465_v38  ;;  %v2569_v38 = vld [vmem:[%s4390_s12 + $0x10] sm:$0xff]  ;;  %v2568_v31 = vld [vmem:[%s4390_s12 + $0x8] sm:$0xff] }
 0x63e   : > { %v2474_v26 = vsel %vm4426_vm0, %v4257_v9, 0.0 }
 0x63f   : > { %2475 = vadd.xlane.f32.xlu0 %v2474_v26  ;;  %v2567_v26 = vld [vmem:[%s4390_s12] sm:$0xff] }
 0x648   : > { %v2467_v29 = vpop.f32.mrf.mxu2 }
 0x649   : > { %v2468_v44 = vadd.f32 %v2861_v20, %v2467_v29  ;;  %v2864_v29 = vld [vmem:[%s4389_s11] ss:$0 sm:$0xff] }
 0x64b   : > { %v4262_v33 = vadd.f32 %v2941_v36, %v2468_v44 }
 0x64d   : > { %v2477_v54 = vsel %vm4427_vm9, %v4262_v33, 0.0 }
 0x64e   : > { %2478 = vadd.xlane.f32.xlu2 %v2477_v54 }
 0x6b2   : > { %v2476_v6 = vpop.xlane.xlu0 %2475 }
 0x6b3   : > { %v2480_v47 = vmul.f32 %v2476_v6, %v3248_v10 }
 0x6b5   : > { %v2482_v2 = vsub.f32 %v4257_v9, %v2480_v47 }
 0x6b7   : > { %v2484_v15 = vmul.f32 %v2482_v2, %v2482_v2 }
 0x6b9   : > { %v2486_v40 = vsel %vm4428_vm5, %v2484_v15, 0.0  ;;  %v2865_v15 = vld [vmem:[%s4391_s13] ss:$0 sm:$0xff] }
 0x6ba   : > { %2487 = vadd.xlane.f32.xlu1 %v2486_v40 }
 0x6c1   : > { %v2479_v30 = vpop.xlane.xlu2 %2478 }
 0x6c2   : > { %v2481_v19 = vmul.f32 %v2479_v30, %v3248_v10 }
 0x6c4   : > { %v4271_v16 = vsub.f32 %v4262_v33, %v2481_v19 }
 0x6c6   : > { %v2485_v34 = vmul.f32 %v4271_v16, %v4271_v16 }
 0x6c8   : > { %v2489_v49 = vsel %vm4429_vm6, %v2485_v34, 0.0 }
 0x6c9   : > { %2490 = vadd.xlane.f32.xlu0 %v2489_v49 }
 0x72d   : > { %v2488_v46 = vpop.xlane.xlu1 %2487 }
 0x72e   : > { %v2492_v17 = vmul.f32 %v2488_v46, %v3248_v10 }
 0x730   : > { %v2494_v32 = vadd.f32 1e-05, %v2492_v17 }
 0x732   : > { %2936 = vrsqrt.f32 %v2494_v32  ;;  %vm2502_vm10 = vweird.f32 %v2494_v32 }
 0x738   : > { %v2937_v3 = vpop.eup %2936 }
 0x739   : > { %v2497_v57 = vmul.f32 %v2937_v3, %v2494_v32  ;;  %vm2503_vm7 = vweird.f32 %v2937_v3 }
 0x73a   : > { %vm2504_vm11 = vmor %vm2502_vm10, %vm2503_vm7 }
 0x73b   : > { %v2498_v23 = vmul.f32 %v2937_v3, %v2497_v57 }
 0x73c   : > { %v2491_v53 = vpop.xlane.xlu0 %2490 }
 0x73d   : > { %v2499_v50 = vmul.f32 0.5, %v2498_v23  ;;  %v2493_v22 = vmul.f32 %v2491_v53, %v3248_v10  ;;  %v2577_v10 = vld [vmem:[%s4390_s12 + $0x50] sm:$0xff] }
 0x73e   : > { %2592 = vmatpush.msra.mxu0 %v2577_v10 }
 0x73f   : > { %v2500_v35 = vsub.f32 1.5, %v2499_v50  ;;  %v2495_v14 = vadd.f32 1e-05, %v2493_v22 }
 0x740   : > { %2593 = vmatpush.msra.mxu0 %v2576_v4 }
 0x741   : > { %v2501_v21 = vmul.f32 %v2937_v3, %v2500_v35  ;;  %2938 = vrsqrt.f32 %v2495_v14  ;;  %vm2512_vm14 = vweird.f32 %v2495_v14 }
 0x742   : > { %2594 = vmatpush.msra.mxu0 %v2575_v28 }
 0x743   : > { %v2505_v13 = vsel %vm2504_vm11, %v2937_v3, %v2501_v21 }
 0x744   : > { %v2516_v43 = vmul.f32 %v2505_v13, %v2482_v2  ;;  %2595 = vmatpush.msra.mxu0 %v2574_v25 }
 0x746   : > { %v2521_v60 = vmul.f32 %v2862_v39, %v2516_v43  ;;  %2596 = vmatpush.msra.mxu0 %v2573_v51 }
 0x747   : > { %v2939_v52 = vpop.eup %2938 }
 0x748   : > { %v2526_v8 = vadd.f32 %v2863_v58, %v2521_v60  ;;  %v2507_v56 = vmul.f32 %v2939_v52, %v2495_v14  ;;  %vm2513_vm13 = vweird.f32 %v2939_v52  ;;  %2597 = vmatpush.msra.mxu0 %v2572_v5 }
 0x749   : > { %vm2514_vm1 = vmor %vm2512_vm14, %vm2513_vm13 }
 0x74a   : > { %2773 = vmatmul.msk.f32.vlgmr.msrb.gmra.mxu3 %vm4430_vm12, %v2526_v8  ;;  %v2508_v0 = vmul.f32 %v2939_v52, %v2507_v56  ;;  %2598 = vmatpush.msra.mxu0 %v2571_v12 }
 0x74c   : > { %v2509_v37 = vmul.f32 0.5, %v2508_v0  ;;  %2599 = vmatpush.msra.mxu0 %v2570_v27 }
 0x74e   : > { %v2510_v62 = vsub.f32 1.5, %v2509_v37  ;;  %2600 = vmatpush.msra.mxu0 %v2569_v38 }
 0x750   : > { %v2511_v55 = vmul.f32 %v2939_v52, %v2510_v62  ;;  %2601 = vmatpush.msra.mxu0 %v2568_v31 }
 0x752   : > { %v2515_v48 = vsel %vm2514_vm1, %v2939_v52, %v2511_v55  ;;  %2602 = vmatpush.msra.mxu0 %v2567_v26 }
 0x753   : > { %v2517_v7 = vmul.f32 %v2515_v48, %v4271_v16 }
 0x755   : > { %v2522_v20 = vmul.f32 %v2862_v39, %v2517_v7 }
 0x757   : > { %v2527_v45 = vadd.f32 %v2863_v58, %v2522_v20 }
 0x759   : > { %2774 = vmatmul.msk.f32.gmra.mxu3 %vm4431_vm4, %v2527_v45 }
 0x7cd   : > { %v2559_v44 = vpop.f32.mrf.mxu3 }
 0x7ce   : > { %v2560_v36 = vadd.f32 %v2864_v29, %v2559_v44 }
 0x7d0   : > { %v2565_v54 = vmax.f32 %v2560_v36, 0.0 }
 0x7d2   : > { %2603 = vmatmul.f32.vlgmr.msra.gmra.mxu0 %v2565_v54 }
 0x7dc   : > { %v2562_v6 = vpop.f32.mrf.mxu3 }
 0x7dd   : > { %v2563_v47 = vadd.f32 %v2864_v29, %v2562_v6 }
 0x7df   : > { %v2566_v2 = vmax.f32 %v2563_v47, 0.0 }
 0x7e1   : > { %2606 = vmatmul.f32.gmra.mxu0 %v2566_v2 }
 0x84f   : > { %v2604_v40 = vpop.f32.mrf.mxu0 }
 0x850   : > { %v2605_v30 = vadd.f32 %v2865_v15, %v2604_v40 }
 0x852   : > { %v2610_v19 = vadd.f32 %v2605_v30, %v4257_v9 }
 0x854   : > { %2612 = vst.msk [vmem:[%s492_s26] sm:$0xff] %vm4432_vm8, %v2610_v19 }
 0x85e   : > { %v2607_v16 = vpop.f32.mrf.mxu0 }
 0x85f   : > { %v2608_v34 = vadd.f32 %v2865_v15, %v2607_v16 }
 0x861   : > { %v2611_v49 = vadd.f32 %v2608_v34, %v4262_v33 }
 0x863   : > { %2613 = vst.msk [vmem:[%s492_s26 + $0x8] sm:$0xff] %vm4433_vm15, %v2611_v49 }
 0x864   : > { %3029 = shalt.err (!%p3026_p8)
}
 0x865   : > { %s3088_s28 = smov 128   ;;  %s4434_s26 = smov 8  }
 0x866   : > { %2794 = dma.vmem_to_hbm [thread:$0]  (%p3202_p5), %s2628_s24, 256, %s2630_s18, %s2615_s20, %s3088_s28, %s3088_s28, %s4434_s26  }
 0x867 PF: > { %p2811_p9 = scmp.ge.s32.totalorder %s3072_s16, 2  ;;  %s2644_s17 = sand.u32 1, %s3060_s29  }
 0x868   : > { %s2645_s27 = scalar_lea.sflag [#allocation4], %s2644_s17 }
 0x869   : > { %p2804_p10 = pnand %p2811_p9, %p3206_p6 }
 0x86b   : > { %p2805_p11 = pneg %p2804_p10 }
 0x86d   : > { %3055 = dma.done.wait (%p2805_p11), %s2645_s27, 256  }
 0x86e   : > { %3057 = vsyncadd (%p2805_p11), %s2645_s27, 4294967040  ;;  %s4436_s16 = sld [smem:[#allocation12_spill]]  ;;  %s4439_s29 = smov %s3064_s30 }
 0x86f   : > { %s4437_s25 = sld [smem:[#allocation11_spill]] }
 0x870   : > { %s4438_s15 = sld [smem:[#allocation13_spill]] }
 0x874   : > { %p26_p12 = scmp.ge.s32.totalorder %s4436_s16, 4  }
 0x875   : > { %s4440_s30 = smov %s4437_s25 }
 0x876   :  { %28 = sbr.rel (!%p26_p12) target bundleno = 7 (0x7), region = 120 }
 0x87b   :  { %2651 = vsyncpa [#allocation3], 1 }
 0x87c   :  { %2653 = vsyncpa [#allocation3 + $0x1], 1 }
 0x87d   :  { %2654 = vsyncpa [#allocation6], 1 }
 0x87e   :  { %2655 = vsyncpa [#allocation4], 1 }
 0x87f   :  { %2657 = vsyncpa [#allocation4 + $0x1], 1 }

</bundles_post_ra>
